<compile_context>
chip_gen: v6e
topology: v6e:2x2x1
jax: 0.10.0
libtpu: 0.0.40
codegen_flags: <defaults>
</compile_context>

<pallas_src>
import functools

import jax
import jax.numpy as jnp
from jax.experimental import pallas as pl
from jax.experimental.pallas import tpu as pltpu


def _swish(x):
    # x * sigmoid(x); exp and approx-reciprocal both go to the EUP slot.
    return x * pl.reciprocal(1.0 + jnp.exp(-x), approx=True)


# ---------------------------------------------------------------------------
# Fused whole-network kernel (one grid step == one batch element)
# ---------------------------------------------------------------------------
def gonet_kernel(
    # per-batch inputs
    sp_ref,      # (HW, P)   spatial planes
    sc_ref,      # (F, 1)    scalar features (column)
    mask_ref,    # (1, HW)   legal-move mask row (plane 0 of the spatial input)
    # stem params
    wsp_ref, wlin_ref, blin_ref, s0_ref, h0_ref,
    # stacked block params (leading axis = num_blocks)
    w1_ref, s1_ref, b1_ref, wd_ref, s2_ref, b2_ref, w3_ref, s3_ref, b3_ref,
    shuf_ref,    # (C, C)    groups=2 channel-shuffle permutation matrix
    # trunk / policy / value head params
    wt_ref, st_ref, bt_ref, wp_ref, bpol_ref,
    wf1_ref, bf1_ref, wf2_ref, bf2_ref,
    # output
    out_ref,     # (1, HW + 2)  == [masked policy (HW), pass logit, value]
    *, H, W, num_blocks):
  f32 = jnp.float32
  HW = H * W

  # ---------------- stem: 1x1 conv + scalar broadcast + BN + swish ----------
  x = jnp.dot(sp_ref[...], wsp_ref[...], preferred_element_type=f32)   # (HW, C)
  # scalar branch: tiny (F x C) contraction kept on the VPU (no MXU push/pop)
  scal = jnp.sum(sc_ref[...] * wlin_ref[...], axis=0, keepdims=True) + blin_ref[...]
  x = _swish((x + scal) * s0_ref[...] + h0_ref[...])                   # (HW, C)

  C = x.shape[-1]
  Cb = C // 2
  Cexp = w1_ref.shape[-1]

  # boundary masks for the depthwise dx = +-1 shifts (built once, reused)
  col = jax.lax.broadcasted_iota(jnp.int32, (H, W, Cexp), 1)
  m_left = col >= 1            # valid positions for dx = -1
  m_right = col < (W - 1)      # valid positions for dx = +1
  zrow = jnp.zeros((1, W, Cexp), f32)

  shuf = shuf_ref[...]
  shuf_top = shuf[:Cb, :]      # rows for the passthrough half
  shuf_bot = shuf[Cb:, :]      # rows for the branch output half

  # ---------------- ShuffleNetV2 blocks (all VMEM/vreg resident) ------------
  for blk in range(num_blocks):
    x1 = x[:, :Cb]
    x2 = x[:, Cb:]

    # 1x1 expansion + BN + swish
    t = jnp.dot(x2, w1_ref[blk], preferred_element_type=f32)           # (HW, Cexp)
    t = _swish(t * s1_ref[blk] + b1_ref[blk])

    # depthwise 3x3, padding=1: dy via leading axis, dx via sublane roll+mask
    td = t.reshape(H, W, Cexp)
    wdk = wd_ref[blk]                                                  # (9, Cexp)
    acc = jnp.zeros((H, W, Cexp), f32)
    for dy in (-1, 0, 1):
      if dy == -1:
        ty = jnp.concatenate([zrow, td[:H - 1]], axis=0)
      elif dy == 1:
        ty = jnp.concatenate([td[1:], zrow], axis=0)
      else:
        ty = td
      for dx in (-1, 0, 1):
        if dx == 0:
          tx = ty
        else:
          rolled = pltpu.roll(ty, shift=(-dx) % W, axis=1)
          tx = jnp.where(m_left if dx == -1 else m_right, rolled, 0.0)
        tap = (dy + 1) * 3 + (dx + 1)
        acc = acc + tx * wdk[tap].reshape(1, 1, Cexp)
    acc = acc.reshape(HW, Cexp) * s2_ref[blk] + b2_ref[blk]            # BN only

    # 1x1 projection + BN + swish
    u = jnp.dot(acc, w3_ref[blk], preferred_element_type=f32)          # (HW, Cb)
    u = _swish(u * s3_ref[blk] + b3_ref[blk])

    # concat([x1, u]) followed by groups=2 channel shuffle, folded into one
    # constant permutation matmul (exact: 0/1 weights, single term per column)
    x = (jnp.dot(x1, shuf_top, preferred_element_type=f32) +
         jnp.dot(u, shuf_bot, preferred_element_type=f32))             # (HW, C)

  # ---------------- trunk head + policy + value -----------------------------
  t = jnp.dot(x, wt_ref[...], preferred_element_type=f32)              # (HW, C)
  t = _swish(t * st_ref[...] + bt_ref[...])

  pooled = jnp.mean(t, axis=0, keepdims=True)                          # (1, C)
  h = _swish(jnp.dot(pooled, wf1_ref[...], preferred_element_type=f32) + bf1_ref[...])
  pv = jnp.dot(h, wf2_ref[...], preferred_element_type=f32) + bf2_ref[...]   # (1, 2)

  # lane-dense policy row: (1, C) x (C, HW)
  pol = jnp.dot(wp_ref[...], t.T, preferred_element_type=f32) + bpol_ref[...]  # (1, HW)
  pol = jnp.where(mask_ref[...] == 1.0, pol, -jnp.inf)

  out_ref[...] = jnp.concatenate([pol, pv], axis=1)                    # (1, HW+2)


# ---------------------------------------------------------------------------
# Wrapper
# ---------------------------------------------------------------------------
def gonet_forward(params, spatial_input, scalar_input):
  B, H, W, Pn = spatial_input.shape
  HW = H * W
  F = scalar_input.shape[-1]
  NB = params["blocks"]["w1"].shape[0]

  sp = spatial_input.reshape(B, HW, Pn)
  sc = scalar_input.reshape(B, F, 1)
  mask = spatial_input[..., 0].reshape(B, 1, HW)

  st = params["stem"]
  bk = params["blocks"]
  hd = params["head"]
  weights = [
      st["wsp"], st["wlin"], st["blin"], st["bn_s"], st["bn_b"],
      bk["w1"], bk["s1"], bk["b1"], bk["wd"], bk["s2"], bk["b2"],
      bk["w3"], bk["s3"], bk["b3"], params["shuffle"],
      hd["wt"], hd["st"], hd["bt"], hd["wp"], hd["bp"],
      hd["w1"], hd["b1"], hd["w2"], hd["b2"],
  ]

  def _full(a):
    n = a.ndim
    return pl.BlockSpec(a.shape, lambda b, _n=n: (0,) * _n)

  kern = functools.partial(gonet_kernel, H=H, W=W, num_blocks=NB)

  out = pl.pallas_call(
      kern,
      out_shape=jax.ShapeDtypeStruct((B, 1, HW + 2), jnp.float32),
      grid=(B,),
      in_specs=[
          pl.BlockSpec((None, HW, Pn), lambda b: (b, 0, 0)),
          pl.BlockSpec((None, F, 1), lambda b: (b, 0, 0)),
          pl.BlockSpec((None, 1, HW), lambda b: (b, 0, 0)),
      ] + [_full(w) for w in weights],
      out_specs=pl.BlockSpec((None, 1, HW + 2), lambda b: (b, 0, 0)),
      compiler_params=pltpu.CompilerParams(dimension_semantics=("parallel",)),
  )(sp, sc, mask, *weights)

  combined_policy = out[:, 0, :HW + 1]   # masked board logits + pass logit
  value = out[:, 0, HW + 1]
  return combined_policy, value


# ---------------------------------------------------------------------------
# Deterministic synthetic parameters
# ---------------------------------------------------------------------------
def init_params(key, Pn, F, C, num_blocks, c_head):
  keys = iter(jax.random.split(key, 64))

  def nrm(shape, scale=0.1):
    return scale * jax.random.normal(next(keys), shape, jnp.float32)

  def bn(c, lead=()):
    shape = lead + (1, c)
    gamma = 1.0 + nrm(shape)
    beta = nrm(shape)
    mean = nrm(shape)
    var = 1.0 + jnp.abs(nrm(shape))
    scale = gamma / jnp.sqrt(var + 1e-5)
    shift = beta - mean * scale
    return scale, shift

  Cb, Cexp = C // 2, (C // 2) * 4
  NB = num_blocks

  stem = dict(wsp=nrm((Pn, C)), wlin=nrm((F, C)), blin=nrm((1, C)))
  stem["bn_s"], stem["bn_b"] = bn(C)

  blocks = dict(w1=nrm((NB, Cb, Cexp)), wd=nrm((NB, 9, Cexp)), w3=nrm((NB, Cexp, Cb)))
  blocks["s1"], blocks["b1"] = bn(Cexp, (NB,))
  blocks["s2"], blocks["b2"] = bn(Cexp, (NB,))
  blocks["s3"], blocks["b3"] = bn(Cb, (NB,))

  head = dict(wt=nrm((C, C)), wp=nrm((1, C)), bp=nrm((1, 1)),
              w1=nrm((C, c_head)), b1=nrm((1, c_head)),
              w2=nrm((c_head, 2)), b2=nrm((1, 2)))
  head["st"], head["bt"] = bn(C)

  # groups=2 channel shuffle as a constant permutation matrix:
  #   shuffled = cat([x1, u]) @ pmat,   pmat[perm[j], j] = 1
  perm = jnp.arange(C).reshape(2, C // 2).T.reshape(-1)
  pmat = jnp.zeros((C, C), jnp.float32).at[perm, jnp.arange(C)].set(1.0)

  return dict(stem=stem, blocks=blocks, head=head, shuffle=pmat)


if __name__ == "__main__":
  B, H, W = 2, 8, 8
  Pn, F, C, num_blocks, c_head = 4, 8, 32, 2, 32

  key = jax.random.PRNGKey(0)
  k_par, k_sp, k_mask, k_sc = jax.random.split(key, 4)
  params = init_params(k_par, Pn, F, C, num_blocks, c_head)

  spatial = jax.random.normal(k_sp, (B, H, W, Pn), jnp.float32)
  # plane 0 acts as the binary legal-moves mask, as the torch model expects
  spatial = spatial.at[..., 0].set(
      (jax.random.uniform(k_mask, (B, H, W)) > 0.3).astype(jnp.float32))
  scalar = jax.random.normal(k_sc, (B, F), jnp.float32)

  combined_policy, value = gonet_forward(params, spatial, scalar)
  jax.block_until_ready((combined_policy, value))

  assert combined_policy.shape == (B, H * W + 1)
  assert value.shape == (B,)
  print("KERNEL_OK")
</pallas_src>

<mosaic_0001>
module attributes {stable_mosaic.version = 11 : i64} {
  func.func @gonet_kernel(%arg0: i32, %arg1: memref<1x64x4xf32, #tpu.memory_space<vmem>>, %arg2: memref<1x8x1xf32, #tpu.memory_space<vmem>>, %arg3: memref<1x1x64xf32, #tpu.memory_space<vmem>>, %arg4: memref<4x32xf32, #tpu.memory_space<vmem>>, %arg5: memref<8x32xf32, #tpu.memory_space<vmem>>, %arg6: memref<1x32xf32, #tpu.memory_space<vmem>>, %arg7: memref<1x32xf32, #tpu.memory_space<vmem>>, %arg8: memref<1x32xf32, #tpu.memory_space<vmem>>, %arg9: memref<2x16x64xf32, #tpu.memory_space<vmem>>, %arg10: memref<2x1x64xf32, #tpu.memory_space<vmem>>, %arg11: memref<2x1x64xf32, #tpu.memory_space<vmem>>, %arg12: memref<2x9x64xf32, #tpu.memory_space<vmem>>, %arg13: memref<2x1x64xf32, #tpu.memory_space<vmem>>, %arg14: memref<2x1x64xf32, #tpu.memory_space<vmem>>, %arg15: memref<2x64x16xf32, #tpu.memory_space<vmem>>, %arg16: memref<2x1x16xf32, #tpu.memory_space<vmem>>, %arg17: memref<2x1x16xf32, #tpu.memory_space<vmem>>, %arg18: memref<32x32xf32, #tpu.memory_space<vmem>>, %arg19: memref<32x32xf32, #tpu.memory_space<vmem>>, %arg20: memref<1x32xf32, #tpu.memory_space<vmem>>, %arg21: memref<1x32xf32, #tpu.memory_space<vmem>>, %arg22: memref<1x32xf32, #tpu.memory_space<vmem>>, %arg23: memref<1x1xf32, #tpu.memory_space<vmem>>, %arg24: memref<32x32xf32, #tpu.memory_space<vmem>>, %arg25: memref<1x32xf32, #tpu.memory_space<vmem>>, %arg26: memref<32x2xf32, #tpu.memory_space<vmem>>, %arg27: memref<1x2xf32, #tpu.memory_space<vmem>>, %arg28: memref<1x1x66xf32, #tpu.memory_space<vmem>>) attributes {dimension_semantics = [#tpu.dimension_semantics<parallel>], iteration_bounds = array<i64: 2>, scalar_prefetch = 0 : i64, scratch_operands = 0 : i64, tpu.core_type = #tpu.core_type<tc>, window_params = [{transform_indices = @transform_0, window_bounds = array<i64: 1, 64, 4>}, {transform_indices = @transform_1, window_bounds = array<i64: 1, 8, 1>}, {transform_indices = @transform_2, window_bounds = array<i64: 1, 1, 64>}, {pipeline_mode = #tpu.pipeline_mode<synchronous>, transform_indices = @transform_3, window_bounds = array<i64: 4, 32>}, {pipeline_mode = #tpu.pipeline_mode<synchronous>, transform_indices = @transform_4, window_bounds = array<i64: 8, 32>}, {pipeline_mode = #tpu.pipeline_mode<synchronous>, transform_indices = @transform_5, window_bounds = array<i64: 1, 32>}, {pipeline_mode = #tpu.pipeline_mode<synchronous>, transform_indices = @transform_6, window_bounds = array<i64: 1, 32>}, {pipeline_mode = #tpu.pipeline_mode<synchronous>, transform_indices = @transform_7, window_bounds = array<i64: 1, 32>}, {pipeline_mode = #tpu.pipeline_mode<synchronous>, transform_indices = @transform_8, window_bounds = array<i64: 2, 16, 64>}, {pipeline_mode = #tpu.pipeline_mode<synchronous>, transform_indices = @transform_9, window_bounds = array<i64: 2, 1, 64>}, {pipeline_mode = #tpu.pipeline_mode<synchronous>, transform_indices = @transform_10, window_bounds = array<i64: 2, 1, 64>}, {pipeline_mode = #tpu.pipeline_mode<synchronous>, transform_indices = @transform_11, window_bounds = array<i64: 2, 9, 64>}, {pipeline_mode = #tpu.pipeline_mode<synchronous>, transform_indices = @transform_12, window_bounds = array<i64: 2, 1, 64>}, {pipeline_mode = #tpu.pipeline_mode<synchronous>, transform_indices = @transform_13, window_bounds = array<i64: 2, 1, 64>}, {pipeline_mode = #tpu.pipeline_mode<synchronous>, transform_indices = @transform_14, window_bounds = array<i64: 2, 64, 16>}, {pipeline_mode = #tpu.pipeline_mode<synchronous>, transform_indices = @transform_15, window_bounds = array<i64: 2, 1, 16>}, {pipeline_mode = #tpu.pipeline_mode<synchronous>, transform_indices = @transform_16, window_bounds = array<i64: 2, 1, 16>}, {pipeline_mode = #tpu.pipeline_mode<synchronous>, transform_indices = @transform_17, window_bounds = array<i64: 32, 32>}, {pipeline_mode = #tpu.pipeline_mode<synchronous>, transform_indices = @transform_18, window_bounds = array<i64: 32, 32>}, {pipeline_mode = #tpu.pipeline_mode<synchronous>, transform_indices = @transform_19, window_bounds = array<i64: 1, 32>}, {pipeline_mode = #tpu.pipeline_mode<synchronous>, transform_indices = @transform_20, window_bounds = array<i64: 1, 32>}, {pipeline_mode = #tpu.pipeline_mode<synchronous>, transform_indices = @transform_21, window_bounds = array<i64: 1, 32>}, {pipeline_mode = #tpu.pipeline_mode<synchronous>, transform_indices = @transform_22, window_bounds = array<i64: 1, 1>}, {pipeline_mode = #tpu.pipeline_mode<synchronous>, transform_indices = @transform_23, window_bounds = array<i64: 32, 32>}, {pipeline_mode = #tpu.pipeline_mode<synchronous>, transform_indices = @transform_24, window_bounds = array<i64: 1, 32>}, {pipeline_mode = #tpu.pipeline_mode<synchronous>, transform_indices = @transform_25, window_bounds = array<i64: 32, 2>}, {pipeline_mode = #tpu.pipeline_mode<synchronous>, transform_indices = @transform_26, window_bounds = array<i64: 1, 2>}, {transform_indices = @transform_27, window_bounds = array<i64: 1, 1, 66>}]} {
    %c0 = arith.constant 0 : index
    %c0_0 = arith.constant 0 : index
    %c0_1 = arith.constant 0 : index
    %0 = vector.load %arg1[%c0, %c0_0, %c0_1] : memref<1x64x4xf32, #tpu.memory_space<vmem>>, vector<1x64x4xf32>
    %1 = vector.shape_cast %0 : vector<1x64x4xf32> to vector<64x4xf32>
    %c0_2 = arith.constant 0 : index
    %c0_3 = arith.constant 0 : index
    %2 = vector.load %arg4[%c0_2, %c0_3] : memref<4x32xf32, #tpu.memory_space<vmem>>, vector<4x32xf32>
    %cst = arith.constant dense<0.000000e+00> : vector<64x32xf32>
    %3 = tpu.matmul %1, %2, %cst {dimension_numbers = #tpu.dot_dimension_numbers<[1], [0], [0], [1], [0, 0, 1, 1], [], []>} : vector<64x4xf32>, vector<4x32xf32>, vector<64x32xf32> -> vector<64x32xf32>
    %c0_4 = arith.constant 0 : index
    %c0_5 = arith.constant 0 : index
    %c0_6 = arith.constant 0 : index
    %4 = vector.load %arg2[%c0_4, %c0_5, %c0_6] : memref<1x8x1xf32, #tpu.memory_space<vmem>>, vector<1x8x1xf32>
    %5 = vector.shape_cast %4 : vector<1x8x1xf32> to vector<8x1xf32>
    %c0_7 = arith.constant 0 : index
    %c0_8 = arith.constant 0 : index
    %6 = vector.load %arg5[%c0_7, %c0_8] : memref<8x32xf32, #tpu.memory_space<vmem>>, vector<8x32xf32>
    %7 = vector.broadcast %5 : vector<8x1xf32> to vector<8x32xf32>
    %8 = arith.mulf %7, %6 : vector<8x32xf32>
    %cst_9 = arith.constant dense<0.000000e+00> : vector<32xf32>
    %9 = vector.multi_reduction <add>, %8, %cst_9 [0] : vector<8x32xf32> to vector<32xf32>
    %10 = vector.shape_cast %9 : vector<32xf32> to vector<1x32xf32>
    %c0_10 = arith.constant 0 : index
    %c0_11 = arith.constant 0 : index
    %11 = vector.load %arg6[%c0_10, %c0_11] : memref<1x32xf32, #tpu.memory_space<vmem>>, vector<1x32xf32>
    %12 = arith.addf %10, %11 : vector<1x32xf32>
    %13 = vector.broadcast %12 : vector<1x32xf32> to vector<64x32xf32>
    %14 = arith.addf %3, %13 : vector<64x32xf32>
    %c0_12 = arith.constant 0 : index
    %c0_13 = arith.constant 0 : index
    %15 = vector.load %arg7[%c0_12, %c0_13] : memref<1x32xf32, #tpu.memory_space<vmem>>, vector<1x32xf32>
    %16 = vector.broadcast %15 : vector<1x32xf32> to vector<64x32xf32>
    %17 = arith.mulf %14, %16 : vector<64x32xf32>
    %c0_14 = arith.constant 0 : index
    %c0_15 = arith.constant 0 : index
    %18 = vector.load %arg8[%c0_14, %c0_15] : memref<1x32xf32, #tpu.memory_space<vmem>>, vector<1x32xf32>
    %19 = vector.broadcast %18 : vector<1x32xf32> to vector<64x32xf32>
    %20 = arith.addf %17, %19 : vector<64x32xf32>
    %cst_16 = arith.constant 0.000000e+00 : f32
    %21 = vector.broadcast %cst_16 : f32 to vector<64x32xf32>
    %22 = arith.subf %21, %20 : vector<64x32xf32>
    %23 = math.exp %22 : vector<64x32xf32>
    %cst_17 = arith.constant 1.000000e+00 : f32
    %24 = vector.broadcast %cst_17 : f32 to vector<64x32xf32>
    %25 = arith.addf %24, %23 : vector<64x32xf32>
    %26 = tpu.reciprocal %25 {approx = true} : vector<64x32xf32> -> vector<64x32xf32>
    %27 = arith.mulf %20, %26 : vector<64x32xf32>
    %28 = tpu.iota {dimensions = array<i32: 1>} : vector<8x8x64xi32>
    %c1_i32 = arith.constant 1 : i32
    %29 = vector.broadcast %c1_i32 : i32 to vector<8x8x64xi32>
    %30 = arith.cmpi sge, %28, %29 : vector<8x8x64xi32>
    %c7_i32 = arith.constant 7 : i32
    %31 = vector.broadcast %c7_i32 : i32 to vector<8x8x64xi32>
    %32 = arith.cmpi slt, %28, %31 : vector<8x8x64xi32>
    %cst_18 = arith.constant 0.000000e+00 : f32
    %33 = vector.broadcast %cst_18 : f32 to vector<1x8x64xf32>
    %c0_19 = arith.constant 0 : index
    %c0_20 = arith.constant 0 : index
    %34 = vector.load %arg18[%c0_19, %c0_20] : memref<32x32xf32, #tpu.memory_space<vmem>>, vector<32x32xf32>
    %35 = vector.extract_strided_slice %34 {offsets = [0, 0], sizes = [16, 32], strides = [1, 1]} : vector<32x32xf32> to vector<16x32xf32>
    %36 = vector.extract_strided_slice %34 {offsets = [16, 0], sizes = [16, 32], strides = [1, 1]} : vector<32x32xf32> to vector<16x32xf32>
    %37 = vector.extract_strided_slice %27 {offsets = [0, 0], sizes = [64, 16], strides = [1, 1]} : vector<64x32xf32> to vector<64x16xf32>
    %38 = vector.extract_strided_slice %27 {offsets = [0, 16], sizes = [64, 16], strides = [1, 1]} : vector<64x32xf32> to vector<64x16xf32>
    %c0_21 = arith.constant 0 : index
    %c0_22 = arith.constant 0 : index
    %c0_23 = arith.constant 0 : index
    %39 = vector.load %arg9[%c0_21, %c0_22, %c0_23] : memref<2x16x64xf32, #tpu.memory_space<vmem>>, vector<1x16x64xf32>
    %40 = vector.shape_cast %39 : vector<1x16x64xf32> to vector<16x64xf32>
    %cst_24 = arith.constant dense<0.000000e+00> : vector<64x64xf32>
    %41 = tpu.matmul %38, %40, %cst_24 {dimension_numbers = #tpu.dot_dimension_numbers<[1], [0], [0], [1], [0, 0, 1, 1], [], []>} : vector<64x16xf32>, vector<16x64xf32>, vector<64x64xf32> -> vector<64x64xf32>
    %c0_25 = arith.constant 0 : index
    %c0_26 = arith.constant 0 : index
    %c0_27 = arith.constant 0 : index
    %42 = vector.load %arg10[%c0_25, %c0_26, %c0_27] : memref<2x1x64xf32, #tpu.memory_space<vmem>>, vector<1x1x64xf32>
    %43 = vector.shape_cast %42 : vector<1x1x64xf32> to vector<1x64xf32>
    %44 = vector.broadcast %43 : vector<1x64xf32> to vector<64x64xf32>
    %45 = arith.mulf %41, %44 : vector<64x64xf32>
    %c0_28 = arith.constant 0 : index
    %c0_29 = arith.constant 0 : index
    %c0_30 = arith.constant 0 : index
    %46 = vector.load %arg11[%c0_28, %c0_29, %c0_30] : memref<2x1x64xf32, #tpu.memory_space<vmem>>, vector<1x1x64xf32>
    %47 = vector.shape_cast %46 : vector<1x1x64xf32> to vector<1x64xf32>
    %48 = vector.broadcast %47 : vector<1x64xf32> to vector<64x64xf32>
    %49 = arith.addf %45, %48 : vector<64x64xf32>
    %cst_31 = arith.constant 0.000000e+00 : f32
    %50 = vector.broadcast %cst_31 : f32 to vector<64x64xf32>
    %51 = arith.subf %50, %49 : vector<64x64xf32>
    %52 = math.exp %51 : vector<64x64xf32>
    %cst_32 = arith.constant 1.000000e+00 : f32
    %53 = vector.broadcast %cst_32 : f32 to vector<64x64xf32>
    %54 = arith.addf %53, %52 : vector<64x64xf32>
    %55 = tpu.reciprocal %54 {approx = true} : vector<64x64xf32> -> vector<64x64xf32>
    %56 = arith.mulf %49, %55 : vector<64x64xf32>
    %57 = vector.shape_cast %56 : vector<64x64xf32> to vector<8x8x64xf32>
    %c0_33 = arith.constant 0 : index
    %c0_34 = arith.constant 0 : index
    %c0_35 = arith.constant 0 : index
    %58 = vector.load %arg12[%c0_33, %c0_34, %c0_35] : memref<2x9x64xf32, #tpu.memory_space<vmem>>, vector<1x9x64xf32>
    %59 = vector.shape_cast %58 : vector<1x9x64xf32> to vector<9x64xf32>
    %cst_36 = arith.constant 0.000000e+00 : f32
    %60 = vector.broadcast %cst_36 : f32 to vector<8x8x64xf32>
    %61 = vector.extract_strided_slice %57 {offsets = [0, 0, 0], sizes = [7, 8, 64], strides = [1, 1, 1]} : vector<8x8x64xf32> to vector<7x8x64xf32>
    %62 = tpu.concatenate %33, %61 in 0 : vector<1x8x64xf32>, vector<7x8x64xf32> -> vector<8x8x64xf32>
    %c1_i32_37 = arith.constant 1 : i32
    %63 = tpu.dynamic_rotate %62 by %c1_i32_37 dim 1 : vector<8x8x64xf32>, i32 -> vector<8x8x64xf32>
    %cst_38 = arith.constant 0.000000e+00 : f32
    %64 = vector.broadcast %cst_38 : f32 to vector<8x8x64xf32>
    %65 = arith.select %30, %63, %64 : vector<8x8x64xi1>, vector<8x8x64xf32>
    %66 = vector.extract_strided_slice %59 {offsets = [0, 0], sizes = [1, 64], strides = [1, 1]} : vector<9x64xf32> to vector<1x64xf32>
    %67 = vector.shape_cast %66 : vector<1x64xf32> to vector<64xf32>
    %68 = vector.shape_cast %67 : vector<64xf32> to vector<1x1x64xf32>
    %69 = vector.broadcast %68 : vector<1x1x64xf32> to vector<8x8x64xf32>
    %70 = arith.mulf %65, %69 : vector<8x8x64xf32>
    %71 = arith.addf %60, %70 : vector<8x8x64xf32>
    %72 = vector.extract_strided_slice %59 {offsets = [1, 0], sizes = [1, 64], strides = [1, 1]} : vector<9x64xf32> to vector<1x64xf32>
    %73 = vector.shape_cast %72 : vector<1x64xf32> to vector<64xf32>
    %74 = vector.shape_cast %73 : vector<64xf32> to vector<1x1x64xf32>
    %75 = vector.broadcast %74 : vector<1x1x64xf32> to vector<8x8x64xf32>
    %76 = arith.mulf %62, %75 : vector<8x8x64xf32>
    %77 = arith.addf %71, %76 : vector<8x8x64xf32>
    %c7_i32_39 = arith.constant 7 : i32
    %78 = tpu.dynamic_rotate %62 by %c7_i32_39 dim 1 : vector<8x8x64xf32>, i32 -> vector<8x8x64xf32>
    %cst_40 = arith.constant 0.000000e+00 : f32
    %79 = vector.broadcast %cst_40 : f32 to vector<8x8x64xf32>
    %80 = arith.select %32, %78, %79 : vector<8x8x64xi1>, vector<8x8x64xf32>
    %81 = vector.extract_strided_slice %59 {offsets = [2, 0], sizes = [1, 64], strides = [1, 1]} : vector<9x64xf32> to vector<1x64xf32>
    %82 = vector.shape_cast %81 : vector<1x64xf32> to vector<64xf32>
    %83 = vector.shape_cast %82 : vector<64xf32> to vector<1x1x64xf32>
    %84 = vector.broadcast %83 : vector<1x1x64xf32> to vector<8x8x64xf32>
    %85 = arith.mulf %80, %84 : vector<8x8x64xf32>
    %86 = arith.addf %77, %85 : vector<8x8x64xf32>
    %c1_i32_41 = arith.constant 1 : i32
    %87 = tpu.dynamic_rotate %57 by %c1_i32_41 dim 1 : vector<8x8x64xf32>, i32 -> vector<8x8x64xf32>
    %cst_42 = arith.constant 0.000000e+00 : f32
    %88 = vector.broadcast %cst_42 : f32 to vector<8x8x64xf32>
    %89 = arith.select %30, %87, %88 : vector<8x8x64xi1>, vector<8x8x64xf32>
    %90 = vector.extract_strided_slice %59 {offsets = [3, 0], sizes = [1, 64], strides = [1, 1]} : vector<9x64xf32> to vector<1x64xf32>
    %91 = vector.shape_cast %90 : vector<1x64xf32> to vector<64xf32>
    %92 = vector.shape_cast %91 : vector<64xf32> to vector<1x1x64xf32>
    %93 = vector.broadcast %92 : vector<1x1x64xf32> to vector<8x8x64xf32>
    %94 = arith.mulf %89, %93 : vector<8x8x64xf32>
    %95 = arith.addf %86, %94 : vector<8x8x64xf32>
    %96 = vector.extract_strided_slice %59 {offsets = [4, 0], sizes = [1, 64], strides = [1, 1]} : vector<9x64xf32> to vector<1x64xf32>
    %97 = vector.shape_cast %96 : vector<1x64xf32> to vector<64xf32>
    %98 = vector.shape_cast %97 : vector<64xf32> to vector<1x1x64xf32>
    %99 = vector.broadcast %98 : vector<1x1x64xf32> to vector<8x8x64xf32>
    %100 = arith.mulf %57, %99 : vector<8x8x64xf32>
    %101 = arith.addf %95, %100 : vector<8x8x64xf32>
    %c7_i32_43 = arith.constant 7 : i32
    %102 = tpu.dynamic_rotate %57 by %c7_i32_43 dim 1 : vector<8x8x64xf32>, i32 -> vector<8x8x64xf32>
    %cst_44 = arith.constant 0.000000e+00 : f32
    %103 = vector.broadcast %cst_44 : f32 to vector<8x8x64xf32>
    %104 = arith.select %32, %102, %103 : vector<8x8x64xi1>, vector<8x8x64xf32>
    %105 = vector.extract_strided_slice %59 {offsets = [5, 0], sizes = [1, 64], strides = [1, 1]} : vector<9x64xf32> to vector<1x64xf32>
    %106 = vector.shape_cast %105 : vector<1x64xf32> to vector<64xf32>
    %107 = vector.shape_cast %106 : vector<64xf32> to vector<1x1x64xf32>
    %108 = vector.broadcast %107 : vector<1x1x64xf32> to vector<8x8x64xf32>
    %109 = arith.mulf %104, %108 : vector<8x8x64xf32>
    %110 = arith.addf %101, %109 : vector<8x8x64xf32>
    %111 = vector.extract_strided_slice %57 {offsets = [1, 0, 0], sizes = [7, 8, 64], strides = [1, 1, 1]} : vector<8x8x64xf32> to vector<7x8x64xf32>
    %112 = tpu.concatenate %111, %33 in 0 : vector<7x8x64xf32>, vector<1x8x64xf32> -> vector<8x8x64xf32>
    %c1_i32_45 = arith.constant 1 : i32
    %113 = tpu.dynamic_rotate %112 by %c1_i32_45 dim 1 : vector<8x8x64xf32>, i32 -> vector<8x8x64xf32>
    %cst_46 = arith.constant 0.000000e+00 : f32
    %114 = vector.broadcast %cst_46 : f32 to vector<8x8x64xf32>
    %115 = arith.select %30, %113, %114 : vector<8x8x64xi1>, vector<8x8x64xf32>
    %116 = vector.extract_strided_slice %59 {offsets = [6, 0], sizes = [1, 64], strides = [1, 1]} : vector<9x64xf32> to vector<1x64xf32>
    %117 = vector.shape_cast %116 : vector<1x64xf32> to vector<64xf32>
    %118 = vector.shape_cast %117 : vector<64xf32> to vector<1x1x64xf32>
    %119 = vector.broadcast %118 : vector<1x1x64xf32> to vector<8x8x64xf32>
    %120 = arith.mulf %115, %119 : vector<8x8x64xf32>
    %121 = arith.addf %110, %120 : vector<8x8x64xf32>
    %122 = vector.extract_strided_slice %59 {offsets = [7, 0], sizes = [1, 64], strides = [1, 1]} : vector<9x64xf32> to vector<1x64xf32>
    %123 = vector.shape_cast %122 : vector<1x64xf32> to vector<64xf32>
    %124 = vector.shape_cast %123 : vector<64xf32> to vector<1x1x64xf32>
    %125 = vector.broadcast %124 : vector<1x1x64xf32> to vector<8x8x64xf32>
    %126 = arith.mulf %112, %125 : vector<8x8x64xf32>
    %127 = arith.addf %121, %126 : vector<8x8x64xf32>
    %c7_i32_47 = arith.constant 7 : i32
    %128 = tpu.dynamic_rotate %112 by %c7_i32_47 dim 1 : vector<8x8x64xf32>, i32 -> vector<8x8x64xf32>
    %cst_48 = arith.constant 0.000000e+00 : f32
    %129 = vector.broadcast %cst_48 : f32 to vector<8x8x64xf32>
    %130 = arith.select %32, %128, %129 : vector<8x8x64xi1>, vector<8x8x64xf32>
    %131 = vector.extract_strided_slice %59 {offsets = [8, 0], sizes = [1, 64], strides = [1, 1]} : vector<9x64xf32> to vector<1x64xf32>
    %132 = vector.shape_cast %131 : vector<1x64xf32> to vector<64xf32>
    %133 = vector.shape_cast %132 : vector<64xf32> to vector<1x1x64xf32>
    %134 = vector.broadcast %133 : vector<1x1x64xf32> to vector<8x8x64xf32>
    %135 = arith.mulf %130, %134 : vector<8x8x64xf32>
    %136 = arith.addf %127, %135 : vector<8x8x64xf32>
    %137 = vector.shape_cast %136 : vector<8x8x64xf32> to vector<64x64xf32>
    %c0_49 = arith.constant 0 : index
    %c0_50 = arith.constant 0 : index
    %c0_51 = arith.constant 0 : index
    %138 = vector.load %arg13[%c0_49, %c0_50, %c0_51] : memref<2x1x64xf32, #tpu.memory_space<vmem>>, vector<1x1x64xf32>
    %139 = vector.shape_cast %138 : vector<1x1x64xf32> to vector<1x64xf32>
    %140 = vector.broadcast %139 : vector<1x64xf32> to vector<64x64xf32>
    %141 = arith.mulf %137, %140 : vector<64x64xf32>
    %c0_52 = arith.constant 0 : index
    %c0_53 = arith.constant 0 : index
    %c0_54 = arith.constant 0 : index
    %142 = vector.load %arg14[%c0_52, %c0_53, %c0_54] : memref<2x1x64xf32, #tpu.memory_space<vmem>>, vector<1x1x64xf32>
    %143 = vector.shape_cast %142 : vector<1x1x64xf32> to vector<1x64xf32>
    %144 = vector.broadcast %143 : vector<1x64xf32> to vector<64x64xf32>
    %145 = arith.addf %141, %144 : vector<64x64xf32>
    %c0_55 = arith.constant 0 : index
    %c0_56 = arith.constant 0 : index
    %c0_57 = arith.constant 0 : index
    %146 = vector.load %arg15[%c0_55, %c0_56, %c0_57] : memref<2x64x16xf32, #tpu.memory_space<vmem>>, vector<1x64x16xf32>
    %147 = vector.shape_cast %146 : vector<1x64x16xf32> to vector<64x16xf32>
    %cst_58 = arith.constant dense<0.000000e+00> : vector<64x16xf32>
    %148 = tpu.matmul %145, %147, %cst_58 {dimension_numbers = #tpu.dot_dimension_numbers<[1], [0], [0], [1], [0, 0, 1, 1], [], []>} : vector<64x64xf32>, vector<64x16xf32>, vector<64x16xf32> -> vector<64x16xf32>
    %c0_59 = arith.constant 0 : index
    %c0_60 = arith.constant 0 : index
    %c0_61 = arith.constant 0 : index
    %149 = vector.load %arg16[%c0_59, %c0_60, %c0_61] : memref<2x1x16xf32, #tpu.memory_space<vmem>>, vector<1x1x16xf32>
    %150 = vector.shape_cast %149 : vector<1x1x16xf32> to vector<1x16xf32>
    %151 = vector.broadcast %150 : vector<1x16xf32> to vector<64x16xf32>
    %152 = arith.mulf %148, %151 : vector<64x16xf32>
    %c0_62 = arith.constant 0 : index
    %c0_63 = arith.constant 0 : index
    %c0_64 = arith.constant 0 : index
    %153 = vector.load %arg17[%c0_62, %c0_63, %c0_64] : memref<2x1x16xf32, #tpu.memory_space<vmem>>, vector<1x1x16xf32>
    %154 = vector.shape_cast %153 : vector<1x1x16xf32> to vector<1x16xf32>
    %155 = vector.broadcast %154 : vector<1x16xf32> to vector<64x16xf32>
    %156 = arith.addf %152, %155 : vector<64x16xf32>
    %cst_65 = arith.constant 0.000000e+00 : f32
    %157 = vector.broadcast %cst_65 : f32 to vector<64x16xf32>
    %158 = arith.subf %157, %156 : vector<64x16xf32>
    %159 = math.exp %158 : vector<64x16xf32>
    %cst_66 = arith.constant 1.000000e+00 : f32
    %160 = vector.broadcast %cst_66 : f32 to vector<64x16xf32>
    %161 = arith.addf %160, %159 : vector<64x16xf32>
    %162 = tpu.reciprocal %161 {approx = true} : vector<64x16xf32> -> vector<64x16xf32>
    %163 = arith.mulf %156, %162 : vector<64x16xf32>
    %cst_67 = arith.constant dense<0.000000e+00> : vector<64x32xf32>
    %164 = tpu.matmul %37, %35, %cst_67 {dimension_numbers = #tpu.dot_dimension_numbers<[1], [0], [0], [1], [0, 0, 1, 1], [], []>} : vector<64x16xf32>, vector<16x32xf32>, vector<64x32xf32> -> vector<64x32xf32>
    %cst_68 = arith.constant dense<0.000000e+00> : vector<64x32xf32>
    %165 = tpu.matmul %163, %36, %cst_68 {dimension_numbers = #tpu.dot_dimension_numbers<[1], [0], [0], [1], [0, 0, 1, 1], [], []>} : vector<64x16xf32>, vector<16x32xf32>, vector<64x32xf32> -> vector<64x32xf32>
    %166 = arith.addf %164, %165 : vector<64x32xf32>
    %167 = vector.extract_strided_slice %166 {offsets = [0, 0], sizes = [64, 16], strides = [1, 1]} : vector<64x32xf32> to vector<64x16xf32>
    %168 = vector.extract_strided_slice %166 {offsets = [0, 16], sizes = [64, 16], strides = [1, 1]} : vector<64x32xf32> to vector<64x16xf32>
    %c1 = arith.constant 1 : index
    %c0_69 = arith.constant 0 : index
    %c0_70 = arith.constant 0 : index
    %169 = vector.load %arg9[%c1, %c0_69, %c0_70] : memref<2x16x64xf32, #tpu.memory_space<vmem>>, vector<1x16x64xf32>
    %170 = vector.shape_cast %169 : vector<1x16x64xf32> to vector<16x64xf32>
    %cst_71 = arith.constant dense<0.000000e+00> : vector<64x64xf32>
    %171 = tpu.matmul %168, %170, %cst_71 {dimension_numbers = #tpu.dot_dimension_numbers<[1], [0], [0], [1], [0, 0, 1, 1], [], []>} : vector<64x16xf32>, vector<16x64xf32>, vector<64x64xf32> -> vector<64x64xf32>
    %c1_72 = arith.constant 1 : index
    %c0_73 = arith.constant 0 : index
    %c0_74 = arith.constant 0 : index
    %172 = vector.load %arg10[%c1_72, %c0_73, %c0_74] : memref<2x1x64xf32, #tpu.memory_space<vmem>>, vector<1x1x64xf32>
    %173 = vector.shape_cast %172 : vector<1x1x64xf32> to vector<1x64xf32>
    %174 = vector.broadcast %173 : vector<1x64xf32> to vector<64x64xf32>
    %175 = arith.mulf %171, %174 : vector<64x64xf32>
    %c1_75 = arith.constant 1 : index
    %c0_76 = arith.constant 0 : index
    %c0_77 = arith.constant 0 : index
    %176 = vector.load %arg11[%c1_75, %c0_76, %c0_77] : memref<2x1x64xf32, #tpu.memory_space<vmem>>, vector<1x1x64xf32>
    %177 = vector.shape_cast %176 : vector<1x1x64xf32> to vector<1x64xf32>
    %178 = vector.broadcast %177 : vector<1x64xf32> to vector<64x64xf32>
    %179 = arith.addf %175, %178 : vector<64x64xf32>
    %cst_78 = arith.constant 0.000000e+00 : f32
    %180 = vector.broadcast %cst_78 : f32 to vector<64x64xf32>
    %181 = arith.subf %180, %179 : vector<64x64xf32>
    %182 = math.exp %181 : vector<64x64xf32>
    %cst_79 = arith.constant 1.000000e+00 : f32
    %183 = vector.broadcast %cst_79 : f32 to vector<64x64xf32>
    %184 = arith.addf %183, %182 : vector<64x64xf32>
    %185 = tpu.reciprocal %184 {approx = true} : vector<64x64xf32> -> vector<64x64xf32>
    %186 = arith.mulf %179, %185 : vector<64x64xf32>
    %187 = vector.shape_cast %186 : vector<64x64xf32> to vector<8x8x64xf32>
    %c1_80 = arith.constant 1 : index
    %c0_81 = arith.constant 0 : index
    %c0_82 = arith.constant 0 : index
    %188 = vector.load %arg12[%c1_80, %c0_81, %c0_82] : memref<2x9x64xf32, #tpu.memory_space<vmem>>, vector<1x9x64xf32>
    %189 = vector.shape_cast %188 : vector<1x9x64xf32> to vector<9x64xf32>
    %cst_83 = arith.constant 0.000000e+00 : f32
    %190 = vector.broadcast %cst_83 : f32 to vector<8x8x64xf32>
    %191 = vector.extract_strided_slice %187 {offsets = [0, 0, 0], sizes = [7, 8, 64], strides = [1, 1, 1]} : vector<8x8x64xf32> to vector<7x8x64xf32>
    %192 = tpu.concatenate %33, %191 in 0 : vector<1x8x64xf32>, vector<7x8x64xf32> -> vector<8x8x64xf32>
    %c1_i32_84 = arith.constant 1 : i32
    %193 = tpu.dynamic_rotate %192 by %c1_i32_84 dim 1 : vector<8x8x64xf32>, i32 -> vector<8x8x64xf32>
    %cst_85 = arith.constant 0.000000e+00 : f32
    %194 = vector.broadcast %cst_85 : f32 to vector<8x8x64xf32>
    %195 = arith.select %30, %193, %194 : vector<8x8x64xi1>, vector<8x8x64xf32>
    %196 = vector.extract_strided_slice %189 {offsets = [0, 0], sizes = [1, 64], strides = [1, 1]} : vector<9x64xf32> to vector<1x64xf32>
    %197 = vector.shape_cast %196 : vector<1x64xf32> to vector<64xf32>
    %198 = vector.shape_cast %197 : vector<64xf32> to vector<1x1x64xf32>
    %199 = vector.broadcast %198 : vector<1x1x64xf32> to vector<8x8x64xf32>
    %200 = arith.mulf %195, %199 : vector<8x8x64xf32>
    %201 = arith.addf %190, %200 : vector<8x8x64xf32>
    %202 = vector.extract_strided_slice %189 {offsets = [1, 0], sizes = [1, 64], strides = [1, 1]} : vector<9x64xf32> to vector<1x64xf32>
    %203 = vector.shape_cast %202 : vector<1x64xf32> to vector<64xf32>
    %204 = vector.shape_cast %203 : vector<64xf32> to vector<1x1x64xf32>
    %205 = vector.broadcast %204 : vector<1x1x64xf32> to vector<8x8x64xf32>
    %206 = arith.mulf %192, %205 : vector<8x8x64xf32>
    %207 = arith.addf %201, %206 : vector<8x8x64xf32>
    %c7_i32_86 = arith.constant 7 : i32
    %208 = tpu.dynamic_rotate %192 by %c7_i32_86 dim 1 : vector<8x8x64xf32>, i32 -> vector<8x8x64xf32>
    %cst_87 = arith.constant 0.000000e+00 : f32
    %209 = vector.broadcast %cst_87 : f32 to vector<8x8x64xf32>
    %210 = arith.select %32, %208, %209 : vector<8x8x64xi1>, vector<8x8x64xf32>
    %211 = vector.extract_strided_slice %189 {offsets = [2, 0], sizes = [1, 64], strides = [1, 1]} : vector<9x64xf32> to vector<1x64xf32>
    %212 = vector.shape_cast %211 : vector<1x64xf32> to vector<64xf32>
    %213 = vector.shape_cast %212 : vector<64xf32> to vector<1x1x64xf32>
    %214 = vector.broadcast %213 : vector<1x1x64xf32> to vector<8x8x64xf32>
    %215 = arith.mulf %210, %214 : vector<8x8x64xf32>
    %216 = arith.addf %207, %215 : vector<8x8x64xf32>
    %c1_i32_88 = arith.constant 1 : i32
    %217 = tpu.dynamic_rotate %187 by %c1_i32_88 dim 1 : vector<8x8x64xf32>, i32 -> vector<8x8x64xf32>
    %cst_89 = arith.constant 0.000000e+00 : f32
    %218 = vector.broadcast %cst_89 : f32 to vector<8x8x64xf32>
    %219 = arith.select %30, %217, %218 : vector<8x8x64xi1>, vector<8x8x64xf32>
    %220 = vector.extract_strided_slice %189 {offsets = [3, 0], sizes = [1, 64], strides = [1, 1]} : vector<9x64xf32> to vector<1x64xf32>
    %221 = vector.shape_cast %220 : vector<1x64xf32> to vector<64xf32>
    %222 = vector.shape_cast %221 : vector<64xf32> to vector<1x1x64xf32>
    %223 = vector.broadcast %222 : vector<1x1x64xf32> to vector<8x8x64xf32>
    %224 = arith.mulf %219, %223 : vector<8x8x64xf32>
    %225 = arith.addf %216, %224 : vector<8x8x64xf32>
    %226 = vector.extract_strided_slice %189 {offsets = [4, 0], sizes = [1, 64], strides = [1, 1]} : vector<9x64xf32> to vector<1x64xf32>
    %227 = vector.shape_cast %226 : vector<1x64xf32> to vector<64xf32>
    %228 = vector.shape_cast %227 : vector<64xf32> to vector<1x1x64xf32>
    %229 = vector.broadcast %228 : vector<1x1x64xf32> to vector<8x8x64xf32>
    %230 = arith.mulf %187, %229 : vector<8x8x64xf32>
    %231 = arith.addf %225, %230 : vector<8x8x64xf32>
    %c7_i32_90 = arith.constant 7 : i32
    %232 = tpu.dynamic_rotate %187 by %c7_i32_90 dim 1 : vector<8x8x64xf32>, i32 -> vector<8x8x64xf32>
    %cst_91 = arith.constant 0.000000e+00 : f32
    %233 = vector.broadcast %cst_91 : f32 to vector<8x8x64xf32>
    %234 = arith.select %32, %232, %233 : vector<8x8x64xi1>, vector<8x8x64xf32>
    %235 = vector.extract_strided_slice %189 {offsets = [5, 0], sizes = [1, 64], strides = [1, 1]} : vector<9x64xf32> to vector<1x64xf32>
    %236 = vector.shape_cast %235 : vector<1x64xf32> to vector<64xf32>
    %237 = vector.shape_cast %236 : vector<64xf32> to vector<1x1x64xf32>
    %238 = vector.broadcast %237 : vector<1x1x64xf32> to vector<8x8x64xf32>
    %239 = arith.mulf %234, %238 : vector<8x8x64xf32>
    %240 = arith.addf %231, %239 : vector<8x8x64xf32>
    %241 = vector.extract_strided_slice %187 {offsets = [1, 0, 0], sizes = [7, 8, 64], strides = [1, 1, 1]} : vector<8x8x64xf32> to vector<7x8x64xf32>
    %242 = tpu.concatenate %241, %33 in 0 : vector<7x8x64xf32>, vector<1x8x64xf32> -> vector<8x8x64xf32>
    %c1_i32_92 = arith.constant 1 : i32
    %243 = tpu.dynamic_rotate %242 by %c1_i32_92 dim 1 : vector<8x8x64xf32>, i32 -> vector<8x8x64xf32>
    %cst_93 = arith.constant 0.000000e+00 : f32
    %244 = vector.broadcast %cst_93 : f32 to vector<8x8x64xf32>
    %245 = arith.select %30, %243, %244 : vector<8x8x64xi1>, vector<8x8x64xf32>
    %246 = vector.extract_strided_slice %189 {offsets = [6, 0], sizes = [1, 64], strides = [1, 1]} : vector<9x64xf32> to vector<1x64xf32>
    %247 = vector.shape_cast %246 : vector<1x64xf32> to vector<64xf32>
    %248 = vector.shape_cast %247 : vector<64xf32> to vector<1x1x64xf32>
    %249 = vector.broadcast %248 : vector<1x1x64xf32> to vector<8x8x64xf32>
    %250 = arith.mulf %245, %249 : vector<8x8x64xf32>
    %251 = arith.addf %240, %250 : vector<8x8x64xf32>
    %252 = vector.extract_strided_slice %189 {offsets = [7, 0], sizes = [1, 64], strides = [1, 1]} : vector<9x64xf32> to vector<1x64xf32>
    %253 = vector.shape_cast %252 : vector<1x64xf32> to vector<64xf32>
    %254 = vector.shape_cast %253 : vector<64xf32> to vector<1x1x64xf32>
    %255 = vector.broadcast %254 : vector<1x1x64xf32> to vector<8x8x64xf32>
    %256 = arith.mulf %242, %255 : vector<8x8x64xf32>
    %257 = arith.addf %251, %256 : vector<8x8x64xf32>
    %c7_i32_94 = arith.constant 7 : i32
    %258 = tpu.dynamic_rotate %242 by %c7_i32_94 dim 1 : vector<8x8x64xf32>, i32 -> vector<8x8x64xf32>
    %cst_95 = arith.constant 0.000000e+00 : f32
    %259 = vector.broadcast %cst_95 : f32 to vector<8x8x64xf32>
    %260 = arith.select %32, %258, %259 : vector<8x8x64xi1>, vector<8x8x64xf32>
    %261 = vector.extract_strided_slice %189 {offsets = [8, 0], sizes = [1, 64], strides = [1, 1]} : vector<9x64xf32> to vector<1x64xf32>
    %262 = vector.shape_cast %261 : vector<1x64xf32> to vector<64xf32>
    %263 = vector.shape_cast %262 : vector<64xf32> to vector<1x1x64xf32>
    %264 = vector.broadcast %263 : vector<1x1x64xf32> to vector<8x8x64xf32>
    %265 = arith.mulf %260, %264 : vector<8x8x64xf32>
    %266 = arith.addf %257, %265 : vector<8x8x64xf32>
    %267 = vector.shape_cast %266 : vector<8x8x64xf32> to vector<64x64xf32>
    %c1_96 = arith.constant 1 : index
    %c0_97 = arith.constant 0 : index
    %c0_98 = arith.constant 0 : index
    %268 = vector.load %arg13[%c1_96, %c0_97, %c0_98] : memref<2x1x64xf32, #tpu.memory_space<vmem>>, vector<1x1x64xf32>
    %269 = vector.shape_cast %268 : vector<1x1x64xf32> to vector<1x64xf32>
    %270 = vector.broadcast %269 : vector<1x64xf32> to vector<64x64xf32>
    %271 = arith.mulf %267, %270 : vector<64x64xf32>
    %c1_99 = arith.constant 1 : index
    %c0_100 = arith.constant 0 : index
    %c0_101 = arith.constant 0 : index
    %272 = vector.load %arg14[%c1_99, %c0_100, %c0_101] : memref<2x1x64xf32, #tpu.memory_space<vmem>>, vector<1x1x64xf32>
    %273 = vector.shape_cast %272 : vector<1x1x64xf32> to vector<1x64xf32>
    %274 = vector.broadcast %273 : vector<1x64xf32> to vector<64x64xf32>
    %275 = arith.addf %271, %274 : vector<64x64xf32>
    %c1_102 = arith.constant 1 : index
    %c0_103 = arith.constant 0 : index
    %c0_104 = arith.constant 0 : index
    %276 = vector.load %arg15[%c1_102, %c0_103, %c0_104] : memref<2x64x16xf32, #tpu.memory_space<vmem>>, vector<1x64x16xf32>
    %277 = vector.shape_cast %276 : vector<1x64x16xf32> to vector<64x16xf32>
    %cst_105 = arith.constant dense<0.000000e+00> : vector<64x16xf32>
    %278 = tpu.matmul %275, %277, %cst_105 {dimension_numbers = #tpu.dot_dimension_numbers<[1], [0], [0], [1], [0, 0, 1, 1], [], []>} : vector<64x64xf32>, vector<64x16xf32>, vector<64x16xf32> -> vector<64x16xf32>
    %c1_106 = arith.constant 1 : index
    %c0_107 = arith.constant 0 : index
    %c0_108 = arith.constant 0 : index
    %279 = vector.load %arg16[%c1_106, %c0_107, %c0_108] : memref<2x1x16xf32, #tpu.memory_space<vmem>>, vector<1x1x16xf32>
    %280 = vector.shape_cast %279 : vector<1x1x16xf32> to vector<1x16xf32>
    %281 = vector.broadcast %280 : vector<1x16xf32> to vector<64x16xf32>
    %282 = arith.mulf %278, %281 : vector<64x16xf32>
    %c1_109 = arith.constant 1 : index
    %c0_110 = arith.constant 0 : index
    %c0_111 = arith.constant 0 : index
    %283 = vector.load %arg17[%c1_109, %c0_110, %c0_111] : memref<2x1x16xf32, #tpu.memory_space<vmem>>, vector<1x1x16xf32>
    %284 = vector.shape_cast %283 : vector<1x1x16xf32> to vector<1x16xf32>
    %285 = vector.broadcast %284 : vector<1x16xf32> to vector<64x16xf32>
    %286 = arith.addf %282, %285 : vector<64x16xf32>
    %cst_112 = arith.constant 0.000000e+00 : f32
    %287 = vector.broadcast %cst_112 : f32 to vector<64x16xf32>
    %288 = arith.subf %287, %286 : vector<64x16xf32>
    %289 = math.exp %288 : vector<64x16xf32>
    %cst_113 = arith.constant 1.000000e+00 : f32
    %290 = vector.broadcast %cst_113 : f32 to vector<64x16xf32>
    %291 = arith.addf %290, %289 : vector<64x16xf32>
    %292 = tpu.reciprocal %291 {approx = true} : vector<64x16xf32> -> vector<64x16xf32>
    %293 = arith.mulf %286, %292 : vector<64x16xf32>
    %cst_114 = arith.constant dense<0.000000e+00> : vector<64x32xf32>
    %294 = tpu.matmul %167, %35, %cst_114 {dimension_numbers = #tpu.dot_dimension_numbers<[1], [0], [0], [1], [0, 0, 1, 1], [], []>} : vector<64x16xf32>, vector<16x32xf32>, vector<64x32xf32> -> vector<64x32xf32>
    %cst_115 = arith.constant dense<0.000000e+00> : vector<64x32xf32>
    %295 = tpu.matmul %293, %36, %cst_115 {dimension_numbers = #tpu.dot_dimension_numbers<[1], [0], [0], [1], [0, 0, 1, 1], [], []>} : vector<64x16xf32>, vector<16x32xf32>, vector<64x32xf32> -> vector<64x32xf32>
    %296 = arith.addf %294, %295 : vector<64x32xf32>
    %c0_116 = arith.constant 0 : index
    %c0_117 = arith.constant 0 : index
    %297 = vector.load %arg19[%c0_116, %c0_117] : memref<32x32xf32, #tpu.memory_space<vmem>>, vector<32x32xf32>
    %cst_118 = arith.constant dense<0.000000e+00> : vector<64x32xf32>
    %298 = tpu.matmul %296, %297, %cst_118 {dimension_numbers = #tpu.dot_dimension_numbers<[1], [0], [0], [1], [0, 0, 1, 1], [], []>} : vector<64x32xf32>, vector<32x32xf32>, vector<64x32xf32> -> vector<64x32xf32>
    %c0_119 = arith.constant 0 : index
    %c0_120 = arith.constant 0 : index
    %299 = vector.load %arg20[%c0_119, %c0_120] : memref<1x32xf32, #tpu.memory_space<vmem>>, vector<1x32xf32>
    %300 = vector.broadcast %299 : vector<1x32xf32> to vector<64x32xf32>
    %301 = arith.mulf %298, %300 : vector<64x32xf32>
    %c0_121 = arith.constant 0 : index
    %c0_122 = arith.constant 0 : index
    %302 = vector.load %arg21[%c0_121, %c0_122] : memref<1x32xf32, #tpu.memory_space<vmem>>, vector<1x32xf32>
    %303 = vector.broadcast %302 : vector<1x32xf32> to vector<64x32xf32>
    %304 = arith.addf %301, %303 : vector<64x32xf32>
    %cst_123 = arith.constant 0.000000e+00 : f32
    %305 = vector.broadcast %cst_123 : f32 to vector<64x32xf32>
    %306 = arith.subf %305, %304 : vector<64x32xf32>
    %307 = math.exp %306 : vector<64x32xf32>
    %cst_124 = arith.constant 1.000000e+00 : f32
    %308 = vector.broadcast %cst_124 : f32 to vector<64x32xf32>
    %309 = arith.addf %308, %307 : vector<64x32xf32>
    %310 = tpu.reciprocal %309 {approx = true} : vector<64x32xf32> -> vector<64x32xf32>
    %311 = arith.mulf %304, %310 : vector<64x32xf32>
    %cst_125 = arith.constant dense<0.000000e+00> : vector<32xf32>
    %312 = vector.multi_reduction <add>, %311, %cst_125 [0] : vector<64x32xf32> to vector<32xf32>
    %313 = vector.shape_cast %312 : vector<32xf32> to vector<1x32xf32>
    %cst_126 = arith.constant 6.400000e+01 : f32
    %314 = vector.broadcast %cst_126 : f32 to vector<1x32xf32>
    %315 = arith.divf %313, %314 : vector<1x32xf32>
    %c0_127 = arith.constant 0 : index
    %c0_128 = arith.constant 0 : index
    %316 = vector.load %arg24[%c0_127, %c0_128] : memref<32x32xf32, #tpu.memory_space<vmem>>, vector<32x32xf32>
    %cst_129 = arith.constant dense<0.000000e+00> : vector<1x32xf32>
    %317 = tpu.matmul %315, %316, %cst_129 {dimension_numbers = #tpu.dot_dimension_numbers<[1], [0], [0], [1], [0, 0, 1, 1], [], []>} : vector<1x32xf32>, vector<32x32xf32>, vector<1x32xf32> -> vector<1x32xf32>
    %c0_130 = arith.constant 0 : index
    %c0_131 = arith.constant 0 : index
    %318 = vector.load %arg25[%c0_130, %c0_131] : memref<1x32xf32, #tpu.memory_space<vmem>>, vector<1x32xf32>
    %319 = arith.addf %317, %318 : vector<1x32xf32>
    %cst_132 = arith.constant 0.000000e+00 : f32
    %320 = vector.broadcast %cst_132 : f32 to vector<1x32xf32>
    %321 = arith.subf %320, %319 : vector<1x32xf32>
    %322 = math.exp %321 : vector<1x32xf32>
    %cst_133 = arith.constant 1.000000e+00 : f32
    %323 = vector.broadcast %cst_133 : f32 to vector<1x32xf32>
    %324 = arith.addf %323, %322 : vector<1x32xf32>
    %325 = tpu.reciprocal %324 {approx = true} : vector<1x32xf32> -> vector<1x32xf32>
    %326 = arith.mulf %319, %325 : vector<1x32xf32>
    %c0_134 = arith.constant 0 : index
    %c0_135 = arith.constant 0 : index
    %327 = vector.load %arg26[%c0_134, %c0_135] : memref<32x2xf32, #tpu.memory_space<vmem>>, vector<32x2xf32>
    %cst_136 = arith.constant dense<0.000000e+00> : vector<1x2xf32>
    %328 = tpu.matmul %326, %327, %cst_136 {dimension_numbers = #tpu.dot_dimension_numbers<[1], [0], [0], [1], [0, 0, 1, 1], [], []>} : vector<1x32xf32>, vector<32x2xf32>, vector<1x2xf32> -> vector<1x2xf32>
    %c0_137 = arith.constant 0 : index
    %c0_138 = arith.constant 0 : index
    %329 = vector.load %arg27[%c0_137, %c0_138] : memref<1x2xf32, #tpu.memory_space<vmem>>, vector<1x2xf32>
    %330 = arith.addf %328, %329 : vector<1x2xf32>
    %c0_139 = arith.constant 0 : index
    %c0_140 = arith.constant 0 : index
    %331 = vector.load %arg22[%c0_139, %c0_140] : memref<1x32xf32, #tpu.memory_space<vmem>>, vector<1x32xf32>
    %332 = tpu.transpose %311, [1, 0] : vector<64x32xf32> -> vector<32x64xf32>
    %cst_141 = arith.constant dense<0.000000e+00> : vector<1x64xf32>
    %333 = tpu.matmul %331, %332, %cst_141 {dimension_numbers = #tpu.dot_dimension_numbers<[1], [0], [0], [1], [0, 0, 1, 1], [], []>} : vector<1x32xf32>, vector<32x64xf32>, vector<1x64xf32> -> vector<1x64xf32>
    %c0_142 = arith.constant 0 : index
    %c0_143 = arith.constant 0 : index
    %334 = vector.load %arg23[%c0_142, %c0_143] : memref<1x1xf32, #tpu.memory_space<vmem>>, vector<1x1xf32>
    %335 = vector.broadcast %334 : vector<1x1xf32> to vector<1x64xf32>
    %336 = arith.addf %333, %335 : vector<1x64xf32>
    %c0_144 = arith.constant 0 : index
    %c0_145 = arith.constant 0 : index
    %c0_146 = arith.constant 0 : index
    %337 = vector.load %arg3[%c0_144, %c0_145, %c0_146] : memref<1x1x64xf32, #tpu.memory_space<vmem>>, vector<1x1x64xf32>
    %338 = vector.shape_cast %337 : vector<1x1x64xf32> to vector<1x64xf32>
    %cst_147 = arith.constant 1.000000e+00 : f32
    %339 = vector.broadcast %cst_147 : f32 to vector<1x64xf32>
    %340 = arith.cmpf oeq, %338, %339 : vector<1x64xf32>
    %cst_148 = arith.constant 0xFF800000 : f32
    %341 = vector.broadcast %cst_148 : f32 to vector<1x64xf32>
    %342 = arith.select %340, %336, %341 : vector<1x64xi1>, vector<1x64xf32>
    %343 = tpu.concatenate %342, %330 in 1 : vector<1x64xf32>, vector<1x2xf32> -> vector<1x66xf32>
    %c0_149 = arith.constant 0 : index
    %c0_150 = arith.constant 0 : index
    %c0_151 = arith.constant 0 : index
    %344 = vector.load %arg28[%c0_149, %c0_150, %c0_151] : memref<1x1x66xf32, #tpu.memory_space<vmem>>, vector<1x1x66xf32>
    %345 = vector.shape_cast %344 : vector<1x1x66xf32> to vector<1x66xf32>
    %346 = vector.shape_cast %343 : vector<1x66xf32> to vector<1x1x66xf32>
    tpu.vector_store %arg28[%c0_149, %c0_150, %c0_151], %346 {strides = array<i32>} : memref<1x1x66xf32, #tpu.memory_space<vmem>>, vector<1x1x66xf32>,
    return
  }
  func.func @transform_0(%arg0: i32) -> (i32, i32, i32) {
    %c0_i32 = arith.constant 0 : i32
    %c0_i32_0 = arith.constant 0 : i32
    %c0_i32_1 = arith.constant 0 : i32
    return %arg0, %c0_i32, %c0_i32_0 : i32, i32, i32
  }
  func.func @transform_1(%arg0: i32) -> (i32, i32, i32) {
    %c0_i32 = arith.constant 0 : i32
    %c0_i32_0 = arith.constant 0 : i32
    %c0_i32_1 = arith.constant 0 : i32
    return %arg0, %c0_i32, %c0_i32_0 : i32, i32, i32
  }
  func.func @transform_2(%arg0: i32) -> (i32, i32, i32) {
    %c0_i32 = arith.constant 0 : i32
    %c0_i32_0 = arith.constant 0 : i32
    %c0_i32_1 = arith.constant 0 : i32
    return %arg0, %c0_i32, %c0_i32_0 : i32, i32, i32
  }
  func.func @transform_3(%arg0: i32) -> (i32, i32) {
    %c0_i32 = arith.constant 0 : i32
    %c0_i32_0 = arith.constant 0 : i32
    %c0_i32_1 = arith.constant 0 : i32
    return %c0_i32, %c0_i32_0 : i32, i32
  }
  func.func @transform_4(%arg0: i32) -> (i32, i32) {
    %c0_i32 = arith.constant 0 : i32
    %c0_i32_0 = arith.constant 0 : i32
    %c0_i32_1 = arith.constant 0 : i32
    return %c0_i32, %c0_i32_0 : i32, i32
  }
  func.func @transform_5(%arg0: i32) -> (i32, i32) {
    %c0_i32 = arith.constant 0 : i32
    %c0_i32_0 = arith.constant 0 : i32
    %c0_i32_1 = arith.constant 0 : i32
    return %c0_i32, %c0_i32_0 : i32, i32
  }
  func.func @transform_6(%arg0: i32) -> (i32, i32) {
    %c0_i32 = arith.constant 0 : i32
    %c0_i32_0 = arith.constant 0 : i32
    %c0_i32_1 = arith.constant 0 : i32
    return %c0_i32, %c0_i32_0 : i32, i32
  }
  func.func @transform_7(%arg0: i32) -> (i32, i32) {
    %c0_i32 = arith.constant 0 : i32
    %c0_i32_0 = arith.constant 0 : i32
    %c0_i32_1 = arith.constant 0 : i32
    return %c0_i32, %c0_i32_0 : i32, i32
  }
  func.func @transform_8(%arg0: i32) -> (i32, i32, i32) {
    %c0_i32 = arith.constant 0 : i32
    %c0_i32_0 = arith.constant 0 : i32
    %c0_i32_1 = arith.constant 0 : i32
    %c0_i32_2 = arith.constant 0 : i32
    return %c0_i32, %c0_i32_0, %c0_i32_1 : i32, i32, i32
  }
  func.func @transform_9(%arg0: i32) -> (i32, i32, i32) {
    %c0_i32 = arith.constant 0 : i32
    %c0_i32_0 = arith.constant 0 : i32
    %c0_i32_1 = arith.constant 0 : i32
    %c0_i32_2 = arith.constant 0 : i32
    return %c0_i32, %c0_i32_0, %c0_i32_1 : i32, i32, i32
  }
  func.func @transform_10(%arg0: i32) -> (i32, i32, i32) {
    %c0_i32 = arith.constant 0 : i32
    %c0_i32_0 = arith.constant 0 : i32
    %c0_i32_1 = arith.constant 0 : i32
    %c0_i32_2 = arith.constant 0 : i32
    return %c0_i32, %c0_i32_0, %c0_i32_1 : i32, i32, i32
  }
  func.func @transform_11(%arg0: i32) -> (i32, i32, i32) {
    %c0_i32 = arith.constant 0 : i32
    %c0_i32_0 = arith.constant 0 : i32
    %c0_i32_1 = arith.constant 0 : i32
    %c0_i32_2 = arith.constant 0 : i32
    return %c0_i32, %c0_i32_0, %c0_i32_1 : i32, i32, i32
  }
  func.func @transform_12(%arg0: i32) -> (i32, i32, i32) {
    %c0_i32 = arith.constant 0 : i32
    %c0_i32_0 = arith.constant 0 : i32
    %c0_i32_1 = arith.constant 0 : i32
    %c0_i32_2 = arith.constant 0 : i32
    return %c0_i32, %c0_i32_0, %c0_i32_1 : i32, i32, i32
  }
  func.func @transform_13(%arg0: i32) -> (i32, i32, i32) {
    %c0_i32 = arith.constant 0 : i32
    %c0_i32_0 = arith.constant 0 : i32
    %c0_i32_1 = arith.constant 0 : i32
    %c0_i32_2 = arith.constant 0 : i32
    return %c0_i32, %c0_i32_0, %c0_i32_1 : i32, i32, i32
  }
  func.func @transform_14(%arg0: i32) -> (i32, i32, i32) {
    %c0_i32 = arith.constant 0 : i32
    %c0_i32_0 = arith.constant 0 : i32
    %c0_i32_1 = arith.constant 0 : i32
    %c0_i32_2 = arith.constant 0 : i32
    return %c0_i32, %c0_i32_0, %c0_i32_1 : i32, i32, i32
  }
  func.func @transform_15(%arg0: i32) -> (i32, i32, i32) {
    %c0_i32 = arith.constant 0 : i32
    %c0_i32_0 = arith.constant 0 : i32
    %c0_i32_1 = arith.constant 0 : i32
    %c0_i32_2 = arith.constant 0 : i32
    return %c0_i32, %c0_i32_0, %c0_i32_1 : i32, i32, i32
  }
  func.func @transform_16(%arg0: i32) -> (i32, i32, i32) {
    %c0_i32 = arith.constant 0 : i32
    %c0_i32_0 = arith.constant 0 : i32
    %c0_i32_1 = arith.constant 0 : i32
    %c0_i32_2 = arith.constant 0 : i32
    return %c0_i32, %c0_i32_0, %c0_i32_1 : i32, i32, i32
  }
  func.func @transform_17(%arg0: i32) -> (i32, i32) {
    %c0_i32 = arith.constant 0 : i32
    %c0_i32_0 = arith.constant 0 : i32
    %c0_i32_1 = arith.constant 0 : i32
    return %c0_i32, %c0_i32_0 : i32, i32
  }
  func.func @transform_18(%arg0: i32) -> (i32, i32) {
    %c0_i32 = arith.constant 0 : i32
    %c0_i32_0 = arith.constant 0 : i32
    %c0_i32_1 = arith.constant 0 : i32
    return %c0_i32, %c0_i32_0 : i32, i32
  }
  func.func @transform_19(%arg0: i32) -> (i32, i32) {
    %c0_i32 = arith.constant 0 : i32
    %c0_i32_0 = arith.constant 0 : i32
    %c0_i32_1 = arith.constant 0 : i32
    return %c0_i32, %c0_i32_0 : i32, i32
  }
  func.func @transform_20(%arg0: i32) -> (i32, i32) {
    %c0_i32 = arith.constant 0 : i32
    %c0_i32_0 = arith.constant 0 : i32
    %c0_i32_1 = arith.constant 0 : i32
    return %c0_i32, %c0_i32_0 : i32, i32
  }
  func.func @transform_21(%arg0: i32) -> (i32, i32) {
    %c0_i32 = arith.constant 0 : i32
    %c0_i32_0 = arith.constant 0 : i32
    %c0_i32_1 = arith.constant 0 : i32
    return %c0_i32, %c0_i32_0 : i32, i32
  }
  func.func @transform_22(%arg0: i32) -> (i32, i32) {
    %c0_i32 = arith.constant 0 : i32
    %c0_i32_0 = arith.constant 0 : i32
    %c0_i32_1 = arith.constant 0 : i32
    return %c0_i32, %c0_i32_0 : i32, i32
  }
  func.func @transform_23(%arg0: i32) -> (i32, i32) {
    %c0_i32 = arith.constant 0 : i32
    %c0_i32_0 = arith.constant 0 : i32
    %c0_i32_1 = arith.constant 0 : i32
    return %c0_i32, %c0_i32_0 : i32, i32
  }
  func.func @transform_24(%arg0: i32) -> (i32, i32) {
    %c0_i32 = arith.constant 0 : i32
    %c0_i32_0 = arith.constant 0 : i32
    %c0_i32_1 = arith.constant 0 : i32
    return %c0_i32, %c0_i32_0 : i32, i32
  }
  func.func @transform_25(%arg0: i32) -> (i32, i32) {
    %c0_i32 = arith.constant 0 : i32
    %c0_i32_0 = arith.constant 0 : i32
    %c0_i32_1 = arith.constant 0 : i32
    return %c0_i32, %c0_i32_0 : i32, i32
  }
  func.func @transform_26(%arg0: i32) -> (i32, i32) {
    %c0_i32 = arith.constant 0 : i32
    %c0_i32_0 = arith.constant 0 : i32
    %c0_i32_1 = arith.constant 0 : i32
    return %c0_i32, %c0_i32_0 : i32, i32
  }
  func.func @transform_27(%arg0: i32) -> (i32, i32, i32) {
    %c0_i32 = arith.constant 0 : i32
    %c0_i32_0 = arith.constant 0 : i32
    %c0_i32_1 = arith.constant 0 : i32
    return %arg0, %c0_i32, %c0_i32_0 : i32, i32, i32
  }
}

</mosaic_0001>

<bundles_post_ra>
// kernel: tpu_custom_call.1
= control target key start
LH: loop header
LB: loop body
LE: loop exit
PB: predicated region body
PF: predicated region fallthrough
CT: control target
= control target key end

     0   :  { %s5670_s0 = inlined_call_operand.vmem [shape: f32[2,64,4], index: 0, kind: input, shape index: {}]   ;;  %s5671_s1 = inlined_call_operand.vmem [shape: f32[2,8,1], index: 1, kind: input, shape index: {}]   ;;  %s5672_s2 = inlined_call_operand.vmem [shape: f32[2,1,64], index: 2, kind: input, shape index: {}]   ;;  %s5673_s3 = inlined_call_operand.vmem [shape: f32[4,32], index: 3, kind: input, shape index: {}]   ;;  %s5674_s4 = inlined_call_operand.vmem [shape: f32[8,32], index: 4, kind: input, shape index: {}]   ;;  %s5675_s5 = inlined_call_operand.vmem [shape: f32[1,32], index: 5, kind: input, shape index: {}]   ;;  %s5676_s6 = inlined_call_operand.vmem [shape: f32[1,32], index: 6, kind: input, shape index: {}]   ;;  %s5677_s7 = inlined_call_operand.vmem [shape: f32[1,32], index: 7, kind: input, shape index: {}]   ;;  %s5678_s8 = inlined_call_operand.vmem [shape: f32[2,16,64], index: 8, kind: input, shape index: {}]   ;;  %s5679_s9 = inlined_call_operand.vmem [shape: f32[2,1,64], index: 9, kind: input, shape index: {}]   ;;  %s5680_s10 = inlined_call_operand.vmem [shape: f32[2,1,64], index: 10, kind: input, shape index: {}]   ;;  %s5681_s11 = inlined_call_operand.vmem [shape: f32[2,9,64], index: 11, kind: input, shape index: {}]   ;;  %s5682_s12 = inlined_call_operand.vmem [shape: f32[2,1,64], index: 12, kind: input, shape index: {}]   ;;  %s5683_s13 = inlined_call_operand.vmem [shape: f32[2,1,64], index: 13, kind: input, shape index: {}]   ;;  %s5684_s14 = inlined_call_operand.vmem [shape: f32[2,64,16], index: 14, kind: input, shape index: {}]   ;;  %s5685_s15 = inlined_call_operand.vmem [shape: f32[2,1,16], index: 15, kind: input, shape index: {}]   ;;  %s5686_s16 = inlined_call_operand.vmem [shape: f32[2,1,16], index: 16, kind: input, shape index: {}]   ;;  %s5687_s17 = inlined_call_operand.vmem [shape: f32[32,32], index: 17, kind: input, shape index: {}]   ;;  %s5688_s18 = inlined_call_operand.vmem [shape: f32[32,32], index: 18, kind: input, shape index: {}]   ;;  %s5689_s19 = inlined_call_operand.vmem [shape: f32[1,32], index: 19, kind: input, shape index: {}]   ;;  %s5690_s20 = inlined_call_operand.vmem [shape: f32[1,32], index: 20, kind: input, shape index: {}]   ;;  %s5691_s21 = inlined_call_operand.vmem [shape: f32[1,32], index: 21, kind: input, shape index: {}]   ;;  %s5692_s22 = inlined_call_operand.<no memory space> [shape: f32[1,1], index: 22, kind: input, shape index: {}]   ;;  %s5693_s23 = inlined_call_operand.vmem [shape: f32[32,32], index: 23, kind: input, shape index: {}]   ;;  %s5694_s24 = inlined_call_operand.vmem [shape: f32[1,32], index: 24, kind: input, shape index: {}]   ;;  %s5695_s25 = inlined_call_operand.vmem [shape: f32[32,2], index: 25, kind: input, shape index: {}]   ;;  %s5696_s26 = inlined_call_operand.vmem [shape: f32[1,2], index: 26, kind: input, shape index: {}]   ;;  %s5697_s27 = inlined_call_operand.hbm [shape: f32[2,1,66], index: 27, kind: output, shape index: {}]  }
   0x1   :  { %5724 = sst [smem:[#allocation16_spill]] %s5670_s0  ;;  %v32_v0 = vstv %s5692_s22 }
   0x2   :  { %5725 = sst [smem:[#allocation17_spill]] %s5671_s1  ;;  %33 = vst [vmem:[#allocation2] sm:$0x1] %v32_v0 }
   0x3   :  { %5726 = sst [smem:[#allocation18_spill]] %s5672_s2 }
   0x4   :  { %5727 = sst [smem:[#allocation19_spill]] %s5673_s3 }
   0x5   :  { %5728 = sst [smem:[#allocation20_spill]] %s5674_s4 }
   0x6   :  { %5729 = sst [smem:[#allocation21_spill]] %s5675_s5 }
   0x7   :  { %5730 = sst [smem:[#allocation22_spill]] %s5676_s6 }
   0x8   :  { %5731 = sst [smem:[#allocation23_spill]] %s5677_s7 }
   0x9   :  { %5732 = sst [smem:[#allocation24_spill]] %s5678_s8 }
   0xa   :  { %5733 = sst [smem:[#allocation25_spill]] %s5679_s9 }
   0xb   :  { %5734 = sst [smem:[#allocation26_spill]] %s5680_s10 }
   0xc   :  { %5735 = sst [smem:[#allocation27_spill]] %s5681_s11 }
   0xd   :  { %5736 = sst [smem:[#allocation28_spill]] %s5682_s12 }
   0xe   :  { %5737 = sst [smem:[#allocation29_spill]] %s5683_s13 }
   0xf   :  { %5738 = sst [smem:[#allocation30_spill]] %s5684_s14 }
  0x10   :  { %5739 = sst [smem:[#allocation31_spill]] %s5697_s27 }
  0x11   :  { %34 = vsyncpa [#allocation4], 0 }
  0x12   :  { %36 = vsyncpa [#allocation4 + $0x1], 0  ;;  %s4536_s8 = smov 0   ;;  %s4538_s30 = smov 0  }
  0x13   :  { %s4540_s9 = smov 0   ;;  %s4542_s5 = smov 0  }
  0x14 LB: > { %5740 = sst [smem:[#allocation6_spill]] %s4373_s8  ;;  %s4557_s22 = sadd.s32 4294967295, %s4385_s5   ;;  %s4385_s5 = sphi %s4542_s5, %s5785_s5   ;;  %s4381_s9 = sphi %s4540_s9, %s5787_s9   ;;  %s4377_s30 = sphi %s4538_s30, %s5789_s30   ;;  %s4373_s8 = sphi %s4536_s8, %s5788_s8  }
  0x15   : > { %5741 = sst [smem:[#allocation7_spill]] %s4381_s9  ;;  %s3584_s28 = sadd.s32 4294967294, %s4385_s5  }
  0x16   : > { %s4561_s0 = sadd.s32 1, %s4385_s5   ;;  %s631_s10 = sadd.s32 1, %s4381_s9 }
  0x17   : > { %5742 = sst [smem:[#allocation8_spill]] %s4561_s0  ;;  %s628_s29 = ssub.s32 %s4385_s5, %s4561_s0 }
  0x18   : > { %p641_p0 = scmp.ne.s32.totalorder %s4381_s9, %s4377_s30  ;;  %p629_p1 = scmp.eq.s32.totalorder %s628_s29, 0 }
  0x19   : > { %p642_p2 = scmp.eq.s32.totalorder %s4557_s22, 1  ;;  %p647_p3 = scmp.ne.s32.totalorder %s4377_s30, %s4373_s8 }
  0x1a   : > { %p648_p4 = scmp.eq.s32.totalorder %s3584_s28, 1  ;;  %p3587_p7 = scmp.ge.s32.totalorder %s4385_s5, 1 }
  0x1b   : > { %s4572_s1 = scalar_select %p629_p1, %s4381_s9, %s631_s10  }
  0x1c   : > { %p4574_p5 = por %p642_p2, %p641_p0  ;;  %p4578_p6 = por %p648_p4, %p647_p3 }
  0x1d   : > { %5743 = sst [smem:[#allocation9_spill]] %s4572_s1  ;;  %p759_p8 = scmp.lt.s32.totalorder %s4385_s5, 3 }
  0x1e   : > { %s5745_s11 = scalar_select %p4578_p6, 1, 0 }
  0x1f   : > { %p760_p9 = pnand %p3587_p7, %p759_p8 }
  0x20   : > { %5746 = sst [smem:[#allocation10_spill]] %s5745_s11 }
  0x21   : > { %763 = sbr.rel (%p760_p9) target bundleno = 2750 (0xabe), region = 128 }
  0x26   : > { %s5747_s7 = sld [smem:[#allocation19_spill]]  ;;  %vm905_vm0 = vcmask 1043456   ;;  %p837_p10 = scmp.lt.s32.totalorder %s4557_s22, 1  ;;  %v4387_v2 = vmov 0   ;;  %vm880_vm1 = vcmask 31744   ;;  %vm866_vm2 = vcmask 261120  }
  0x27   : > { %4126 = vset.pattern.permute.xlu0 %v4387_v2  ;;  %4127 = vset.pattern.permute.xlu1 %v4387_v2  ;;  %s5748_s2 = sld [smem:[#allocation16_spill]]  ;;  %v876_v21 = vlaneseq  ;;  %vm1126_vm3 = vcmask 130048   ;;  %vm1580_vm6 = vcmask 523264   ;;  %vm4390_vm7 = vmmov 0  }
  0x28   : > { %s4589_s4 = scalar_select %p837_p10, %s4557_s22, 1  ;;  %vm3493_vm9 = vcmask 532480  }
  0x29   : > { %s5749_s0 = sld [smem:[#allocation17_spill]]  ;;  %v4614_v23 = vshrl.u32 %v876_v21, 7 }
  0x2a   : > { %s3722_s28 = sshll.u32 %s4589_s4, 6  ;;  %s3590_s10 = sshll.u32 %s4589_s4, 3 }
  0x2b   : > { %s5750_s1 = sld [smem:[#allocation24_spill]]  ;;  %v4620_v26 = vsub.s32 0, %v4614_v23  ;;  %vm1094_vm4 = vcmp.ge.s32.totalorder %v4614_v23, 1  ;;  %vm1095_vm5 = vcmp.lt.s32.totalorder %v4614_v23, 7 }
  0x2c   : > { %v857_v1 = vld [vmem:[%s5747_s7] sm:$0xf]  ;;  %s5760_s14 = sld [smem:[#allocation30_spill]]  ;;  %s4391_s7 = smov 64  }
  0x2d   : > { %3855 = vmatprep.subr.msk.mxu0 %vm905_vm0, %v857_v1  ;;  %s841_s3 = scalar_lea.vmem %s5748_s2, %s3722_s28  ;;  %5753 = vst [vmem:[#allocation11_spill] sm:$0xff] %v4620_v26  ;;  %s5761_s28 = sld [smem:[#allocation25_spill]] }
  0x2e   : > { %3856 = vmatpush3.msk.msra.mxu0 %vm905_vm0, %v857_v1  ;;  %v849_v3 = vld [vmem:[%s841_s3] sm:$0xff]  ;;  %v850_v4 = vld [vmem:[%s841_s3 + $0x8] sm:$0xff]  ;;  %v851_v5 = vld [vmem:[%s841_s3 + $0x10] sm:$0xff]  ;;  %s5762_s8 = sld [smem:[#allocation26_spill]] }
  0x2f   : > { %s845_s11 = scalar_lea.vmem %s5749_s0, %s3590_s10  ;;  %3857 = vmatprep.mubr.msk.f32.mxu0 %vm880_vm1, %v849_v3  ;;  %v852_v7 = vld [vmem:[%s841_s3 + $0x18] sm:$0xff]  ;;  %v853_v8 = vld [vmem:[%s841_s3 + $0x20] sm:$0xff]  ;;  %v854_v9 = vld [vmem:[%s841_s3 + $0x28] sm:$0xff]  ;;  %s5751_s10 = sld [smem:[#allocation20_spill]] }
  0x30   : > { %3858 = vmatmul.mubr.msk.f32.vlgmr.msra.gmra.mxu0 %vm880_vm1, %v850_v4  ;;  %v858_v6 = vld [vmem:[%s845_s11] sm:$0xff]  ;;  %v855_v10 = vld [vmem:[%s841_s3 + $0x30] sm:$0xff]  ;;  %v856_v11 = vld [vmem:[%s841_s3 + $0x38] sm:$0xff]  ;;  %s5752_s3 = sld [smem:[#allocation21_spill]]  ;;  %s5772_s11 = smov 112  }
  0x31   : > { %3860 = vmatprep.mubr.msk.f32.mxu0 %vm880_vm1, %v851_v5  ;;  %862 = vperm.xlu0 %4126, %v858_v6   ;;  %v1101_v12 = vld [vmem:[%s5750_s1 + $0x8] sm:$0xff]  ;;  %s5754_s0 = sld [smem:[#allocation22_spill]] }
  0x32   : > { %3869 = vmatprep.subr.mxu1 %v1101_v12  ;;  %s5764_s29 = sld [smem:[#allocation27_spill]] }
  0x33   : > { %3870 = vmatpush3.msra.mxu1 %v1101_v12  ;;  %s5765_s12 = sld [smem:[#allocation28_spill]] }
  0x34   : > { %3861 = vmatmul.mubr.msk.f32.gmra.mxu0 %vm880_vm1, %v852_v7  ;;  %s5763_s27 = smov %s5762_s8  ;;  %s5766_s13 = sld [smem:[#allocation29_spill]] }
  0x35   : > { %3863 = vmatprep.mubr.msk.f32.mxu0 %vm880_vm1, %v853_v8  ;;  %v859_v13 = vld [vmem:[%s5751_s10] sm:$0xff]  ;;  %s5755_s10 = sld [smem:[#allocation23_spill]] }
  0x36   : > { %v874_v25 = vld [vmem:[%s5752_s3] sm:$0x1]  ;;  %s5706_s3 = smov 112  }
  0x37   : > { %v3600_v30 = vld [vmem:[%s5754_s0] ss:$0 sm:$0xff] }
  0x38   : > { %3864 = vmatmul.mubr.msk.f32.gmra.mxu0 %vm880_vm1, %v854_v9 }
  0x39   : > { %3866 = vmatprep.mubr.msk.f32.mxu0 %vm880_vm1, %v855_v10 }
  0x3b   : > { %v3601_v33 = vld [vmem:[%s5755_s10] ss:$0 sm:$0xff] }
  0x3c   : > { %3867 = vmatmul.mubr.msk.f32.gmra.mxu0 %vm880_vm1, %v856_v11 }
  0xac   : > { %v863_v14 = vpop.permute.xlu0 %862 }
  0xad   : > { %v865_v15 = vmul.f32 %v863_v14, %v859_v13 }
  0xaf   : > { %v867_v16 = vsel %vm866_vm2, %v865_v15, 0.0 }
  0xb0   : > { %v868_v17 = vrot.slane %v867_v16, 4 }
  0xb2   : > { %v869_v18 = vadd.f32 %v868_v17, %v867_v16 }
  0xb4   : > { %v870_v19 = vrot.slane %v869_v18, 2 }
  0xb6   : > { %v871_v20 = vadd.f32 %v870_v19, %v869_v18 }
  0xb8   : > { %v872_v22 = vrot.slane %v871_v20, 1 }
  0xba   : > { %v873_v24 = vadd.f32 %v872_v22, %v871_v20  ;;  %v1100_v22 = vld [vmem:[%s5750_s1] sm:$0xff] }
  0xbb   : > { %3871 = vmatprep.subr.mxu1 %v1100_v22 }
  0xbc   : > { %v875_v27 = vadd.f32 %v874_v25, %v873_v24  ;;  %3872 = vmatpush3.msra.mxu1 %v1100_v22 }
  0xbe   : > { %v879_v28 = vrot.slane %v875_v27, %v4620_v26 }
  0xf0   : > { %v3859_v29 = vpop.f32.mrf.mxu0 }
  0xf1   : > { %v981_v31 = vadd.f32 %v3859_v29, %v879_v28 }
  0xf2   : > { %v975_v32 = vpop.f32.mrf.mxu0 }
  0xf3   : > { %v1022_v34 = vmul.f32 %v3600_v30, %v981_v31  ;;  %v976_v35 = vadd.f32 %v975_v32, %v879_v28 }
  0xf4   : > { %v3862_v36 = vpop.f32.mrf.mxu0 }
  0xf5   : > { %v1021_v37 = vmul.f32 %v3600_v30, %v976_v35  ;;  %v991_v38 = vadd.f32 %v3862_v36, %v879_v28  ;;  %v4629_v39 = vadd.f32 %v3601_v33, %v1022_v34 }
  0xf6   : > { %v985_v40 = vpop.f32.mrf.mxu0 }
  0xf7   : > { %v4631_v41 = vadd.f32 %v3601_v33, %v1021_v37  ;;  %v1024_v42 = vmul.f32 %v3600_v30, %v991_v38  ;;  %v986_v43 = vadd.f32 %v985_v40, %v879_v28  ;;  %v1045_v44 = vsub.f32 0.0, %v4629_v39 }
  0xf8   : > { %v3865_v45 = vpop.f32.mrf.mxu0 }
  0xf9   : > { %v1044_v46 = vsub.f32 0.0, %v4631_v41  ;;  %v4635_v47 = vadd.f32 %v3601_v33, %v1024_v42  ;;  %v1023_v48 = vmul.f32 %v3600_v30, %v986_v43  ;;  %v1001_v49 = vadd.f32 %v3865_v45, %v879_v28 }
  0xfa   : > { %v995_v50 = vpop.f32.mrf.mxu0  ;;  %v1054_v51 = vmul.f32 1.442695, %v1045_v44 }
  0xfb   : > { %v1052_v52 = vmul.f32 1.442695, %v1044_v46  ;;  %v1047_v53 = vsub.f32 0.0, %v4635_v47  ;;  %v4638_v54 = vadd.f32 %v3601_v33, %v1023_v48  ;;  %v1026_v55 = vmul.f32 %v3600_v30, %v1001_v49 }
  0xfc   : > { %v996_v56 = vadd.f32 %v995_v50, %v879_v28  ;;  %v3868_v57 = vpop.f32.mrf.mxu0  ;;  %4128 = vpow2.f32 %v1054_v51 }
  0xfd   : > { %4130 = vpow2.f32 %v1052_v52  ;;  %v1058_v58 = vmul.f32 1.442695, %v1047_v53  ;;  %v1046_v59 = vsub.f32 0.0, %v4638_v54  ;;  %v4641_v60 = vadd.f32 %v3601_v33, %v1026_v55 }
  0xfe   : > { %v1025_v61 = vmul.f32 %v3600_v30, %v996_v56  ;;  %v1011_v62 = vadd.f32 %v3868_v57, %v879_v28  ;;  %v1005_v63 = vpop.f32.mrf.mxu0 }
  0xff   : > { %4132 = vpow2.f32 %v1058_v58  ;;  %v1056_v0 = vmul.f32 1.442695, %v1046_v59  ;;  %v1049_v1 = vsub.f32 0.0, %v4641_v60  ;;  %v1006_v2 = vadd.f32 %v1005_v63, %v879_v28  ;;  %v1579_v58 = vld [vmem:[%s5760_s14 + $0x38] sm:$0xff]  ;;  %v1578_v59 = vld [vmem:[%s5760_s14 + $0x30] sm:$0xff] }
 0x100   : > { %v1040_v3 = vadd.f32 %v3601_v33, %v1025_v61  ;;  %v1028_v4 = vmul.f32 %v3600_v30, %v1011_v62  ;;  %3885 = vmatprep.subr.mxu0 %v1579_v58  ;;  %v1576_v61 = vld [vmem:[%s5760_s14 + $0x20] sm:$0xff]  ;;  %v1575_v62 = vld [vmem:[%s5760_s14 + $0x18] sm:$0xff]  ;;  %v1574_v63 = vld [vmem:[%s5760_s14 + $0x10] sm:$0xff] }
 0x101   : > { %4134 = vpow2.f32 %v1056_v0  ;;  %v1062_v5 = vmul.f32 1.442695, %v1049_v1  ;;  %v1027_v6 = vmul.f32 %v3600_v30, %v1006_v2  ;;  %3886 = vmatpush3.msra.mxu0 %v1579_v58  ;;  %v1573_v0 = vld [vmem:[%s5760_s14 + $0x8] sm:$0xff]  ;;  %v1572_v1 = vld [vmem:[%s5760_s14] sm:$0xff] }
 0x102   : > { %v1048_v7 = vsub.f32 0.0, %v1040_v3  ;;  %v1043_v8 = vadd.f32 %v3601_v33, %v1028_v4  ;;  %3887 = vmatprep.subr.mxu0 %v1578_v59  ;;  %v4719_v2 = vld [vmem:[%s5687_s17 + $0x8] sm:$0xff] }
 0x103   : > { %4136 = vpow2.f32 %v1062_v5  ;;  %v1042_v9 = vadd.f32 %v3601_v33, %v1027_v6  ;;  %3888 = vmatpush3.msra.mxu0 %v1578_v59  ;;  %v3611_v5 = vld [vmem:[%s5762_s8] ss:$0 sm:$0xff]  ;;  %s835_s8 = sand.u32 1, %s4377_s30  }
 0x104   : > { %v1060_v10 = vmul.f32 1.442695, %v1048_v7  ;;  %v1051_v11 = vsub.f32 0.0, %v1043_v8 }
 0x105   : > { %v1050_v12 = vsub.f32 0.0, %v1042_v9 }
 0x106   : > { %4138 = vpow2.f32 %v1060_v10  ;;  %v1066_v13 = vmul.f32 1.442695, %v1051_v11 }
 0x107   : > { %v1064_v14 = vmul.f32 1.442695, %v1050_v12 }
 0x108   : > { %4140 = vpow2.f32 %v1066_v13 }
 0x109   : > { %v4129_v15 = vpop.eup %4128  ;;  %4142 = vpow2.f32 %v1064_v14 }
 0x10a   : > { %v4131_v16 = vpop.eup %4130  ;;  %v1069_v17 = vadd.f32 1.0, %v4129_v15 }
 0x10b   : > { %v1068_v18 = vadd.f32 1.0, %v4131_v16 }
 0x10c   : > { %v4133_v19 = vpop.eup %4132  ;;  %4144 = vrcp.f32 %v1069_v17 }
 0x10d   : > { %4146 = vrcp.f32 %v1068_v18  ;;  %v1071_v20 = vadd.f32 1.0, %v4133_v19 }
 0x10e   : > { %v4135_v21 = vpop.eup %4134 }
 0x10f   : > { %4148 = vrcp.f32 %v1071_v20  ;;  %v1070_v24 = vadd.f32 1.0, %v4135_v21 }
 0x110   : > { %v4137_v25 = vpop.eup %4136 }
 0x111   : > { %4150 = vrcp.f32 %v1070_v24  ;;  %v1073_v27 = vadd.f32 1.0, %v4137_v25 }
 0x113   : > { %v4139_v28 = vpop.eup %4138  ;;  %4152 = vrcp.f32 %v1073_v27 }
 0x114   : > { %v1072_v29 = vadd.f32 1.0, %v4139_v28 }
 0x115   : > { %v4141_v30 = vpop.eup %4140 }
 0x116   : > { %v4143_v31 = vpop.eup %4142  ;;  %4154 = vrcp.f32 %v1072_v29  ;;  %v1075_v32 = vadd.f32 1.0, %v4141_v30 }
 0x117   : > { %v1074_v33 = vadd.f32 1.0, %v4143_v31 }
 0x118   : > { %4156 = vrcp.f32 %v1075_v32 }
 0x119   : > { %v4145_v34 = vpop.eup %4144  ;;  %4158 = vrcp.f32 %v1074_v33 }
 0x11a   : > { %v4147_v35 = vpop.eup %4146  ;;  %v4648_v36 = vmul.f32 %v4145_v34, %v4629_v39 }
 0x11b   : > { %v4651_v37 = vmul.f32 %v4147_v35, %v4631_v41 }
 0x11c   : > { %v4149_v38 = vpop.eup %4148  ;;  %1112 = vrot.lane.b32.xlu1 %v4648_v36, %s5706_s3 }
 0x11d   : > { %1110 = vrot.lane.b32.xlu0 %v4651_v37, %s5706_s3  ;;  %v4661_v43 = vmul.f32 %v4149_v38, %v4635_v47 }
 0x11e   : > { %v4151_v40 = vpop.eup %4150 }
 0x11f   : > { %v4658_v42 = vmul.f32 %v4151_v40, %v4638_v54 }
 0x120   : > { %v4153_v39 = vpop.eup %4152 }
 0x121   : > { %1114 = vrot.lane.b32.xlu1 %v4658_v42, %s5706_s3  ;;  %1116 = vrot.lane.b32.xlu0 %v4661_v43, %s5706_s3  ;;  %v4668_v44 = vmul.f32 %v4153_v39, %v4641_v60  ;;  %v1577_v60 = vld [vmem:[%s5760_s14 + $0x28] sm:$0xff] }
 0x122   : > { %3889 = vmatprep.subr.mxu0 %v1577_v60 }
 0x123   : > { %v4155_v41 = vpop.eup %4154  ;;  %5756 = vst [vmem:[#allocation12_spill] sm:$0xff] %v4668_v44  ;;  %3890 = vmatpush3.msra.mxu0 %v1577_v60 }
 0x124   : > { %v4670_v45 = vmul.f32 %v4155_v41, %v1040_v3  ;;  %3891 = vmatprep.subr.mxu0 %v1576_v61  ;;  %v3610_v3 = vld [vmem:[%s5761_s28] ss:$0 sm:$0xff] }
 0x125   : > { %v4157_v46 = vpop.eup %4156  ;;  %1120 = vrot.lane.b32.xlu0 %v4668_v44, %s5706_s3  ;;  %3892 = vmatpush3.msra.mxu0 %v1576_v61 }
 0x126   : > { %5757 = vst [vmem:[#allocation13_spill] sm:$0xff] %v4670_v45  ;;  %v4159_v48 = vpop.eup %4158  ;;  %1118 = vrot.lane.b32.xlu1 %v4670_v45, %s5706_s3  ;;  %v4678_v49 = vmul.f32 %v4157_v46, %v1043_v8  ;;  %3893 = vmatprep.subr.mxu0 %v1575_v62 }
 0x127   : > { %v4676_v47 = vmul.f32 %v4159_v48, %v1042_v9  ;;  %3894 = vmatpush3.msra.mxu0 %v1575_v62  ;;  %v1326_v62 = vld [vmem:[%s5764_s29] sm:$0xff] }
 0x128   : > { %5759 = vst [vmem:[#allocation15_spill] sm:$0xff] %v4678_v49  ;;  %3895 = vmatprep.subr.mxu0 %v1574_v63 }
 0x129   : > { %5758 = vst [vmem:[#allocation14_spill] sm:$0xff] %v4676_v47  ;;  %1124 = vrot.lane.b32.xlu0 %v4678_v49, %s5706_s3  ;;  %3896 = vmatpush3.msra.mxu0 %v1574_v63  ;;  %v5716_v63 = vsub.s32 1, %v4614_v23 }
 0x12a   : > { %1122 = vrot.lane.b32.xlu1 %v4676_v47, %s5706_s3  ;;  %3897 = vmatprep.subr.mxu0 %v1573_v0  ;;  %s836_s3 = scalar_lea.vmem [#allocation3], %s835_s8 }
 0x12b   : > { %3898 = vmatpush3.msra.mxu0 %v1573_v0  ;;  %s3508_s2 = sshll.u32 %s836_s3, 4  ;;  %s3509_s2 = int_to_ptr.vmem [resolvable:$true] %s3508_s2 }
 0x12c   : > { %3899 = vmatprep.subr.mxu0 %v1572_v1  ;;  %s4325_s9 = scalar_lea.vmem %s3509_s2, 16 }
 0x12d   : > { %3900 = vmatpush3.msra.mxu0 %v1572_v1  ;;  %p4326_p11 = scmp.ne.s32.totalorder %s3509_s2, %s4325_s9 }
 0x12e   : > { %3929 = vmatprep.subr.mxu0 %v4719_v2 }
 0x12f   : > { %p4327_p12 = pnand %p4326_p11, %p4574_p5 }
 0x131   : > { %p4328_p13 = pneg %p4327_p12 }
 0x18e   : > { %v1113_v50 = vpop.permute.xlu1 %1112 }
 0x18f   : > { %v1111_v51 = vpop.permute.xlu0 %1110 }
 0x190   : > { %3873 = vmatprep.mubr.msk.f32.mxu1 %vm1126_vm3, %v1111_v51 }
 0x191   : > { %3874 = vmatmul.mubr.msk.f32.vlgmr.msra.gmra.mxu1 %vm1126_vm3, %v1113_v50 }
 0x193   : > { %v1115_v52 = vpop.permute.xlu1 %1114  ;;  %v1117_v53 = vpop.permute.xlu0 %1116 }
 0x194   : > { %3876 = vmatprep.mubr.msk.f32.mxu1 %vm1126_vm3, %v1115_v52 }
 0x195   : > { %3877 = vmatmul.mubr.msk.f32.gmra.mxu1 %vm1126_vm3, %v1117_v53 }
 0x197   : > { %v1121_v54 = vpop.permute.xlu0 %1120 }
 0x198   : > { %v1119_v55 = vpop.permute.xlu1 %1118 }
 0x199   : > { %3879 = vmatprep.mubr.msk.f32.mxu1 %vm1126_vm3, %v1119_v55 }
 0x19a   : > { %3880 = vmatmul.mubr.msk.f32.gmra.mxu1 %vm1126_vm3, %v1121_v54 }
 0x19b   : > { %v1125_v56 = vpop.permute.xlu0 %1124 }
 0x19c   : > { %v1123_v57 = vpop.permute.xlu1 %1122 }
 0x19d   : > { %3882 = vmatprep.mubr.msk.f32.mxu1 %vm1126_vm3, %v1123_v57 }
 0x19e   : > { %3883 = vmatmul.mubr.msk.f32.gmra.mxu1 %vm1126_vm3, %v1125_v56 }
 0x251   : > { %v3875_v4 = vpop.f32.mrf.mxu1 }
 0x252   : > { %v1256_v6 = vmul.f32 %v3875_v4, %v3610_v3  ;;  %v4761_v4 = vrot.slane %v1326_v62, %v5716_v63 }
 0x253   : > { %v1209_v7 = vpop.f32.mrf.mxu1 }
 0x254   : > { %v4728_v8 = vadd.f32 %v3611_v5, %v1256_v6  ;;  %v1255_v9 = vmul.f32 %v3610_v3, %v1209_v7 }
 0x255   : > { %v3878_v10 = vpop.f32.mrf.mxu1 }
 0x256   : > { %v1279_v11 = vsub.f32 0.0, %v4728_v8  ;;  %v4731_v12 = vadd.f32 %v3611_v5, %v1255_v9  ;;  %v1258_v13 = vmul.f32 %v3878_v10, %v3610_v3 }
 0x257   : > { %v1219_v14 = vpop.f32.mrf.mxu1 }
 0x258   : > { %v1288_v15 = vmul.f32 1.442695, %v1279_v11  ;;  %v1278_v16 = vsub.f32 0.0, %v4731_v12  ;;  %v4734_v17 = vadd.f32 %v3611_v5, %v1258_v13  ;;  %v1257_v18 = vmul.f32 %v3610_v3, %v1219_v14 }
 0x259   : > { %v1367_v13 = vmul.f32 0.0, %v4761_v4 }
 0x25a   : > { %4160 = vpow2.f32 %v1288_v15  ;;  %v1286_v19 = vmul.f32 1.442695, %v1278_v16  ;;  %v1281_v20 = vsub.f32 0.0, %v4734_v17  ;;  %v4737_v21 = vadd.f32 %v3611_v5, %v1257_v18  ;;  %v3881_v22 = vpop.f32.mrf.mxu1 }
 0x25b   : > { %v1260_v24 = vmul.f32 %v3881_v22, %v3610_v3  ;;  %v5714_v18 = vsub.s32 4, %v4614_v23 }
 0x25c   : > { %4162 = vpow2.f32 %v1286_v19  ;;  %v1292_v25 = vmul.f32 1.442695, %v1281_v20  ;;  %v1280_v27 = vsub.f32 0.0, %v4737_v21  ;;  %v1229_v28 = vpop.f32.mrf.mxu1  ;;  %v5712_v19 = vsub.s32 7, %v4614_v23 }
 0x25d   : > { %v4740_v29 = vadd.f32 %v3611_v5, %v1260_v24  ;;  %v1259_v30 = vmul.f32 %v3610_v3, %v1229_v28 }
 0x25e   : > { %4164 = vpow2.f32 %v1292_v25  ;;  %v1290_v31 = vmul.f32 1.442695, %v1280_v27  ;;  %v3884_v32 = vpop.f32.mrf.mxu1  ;;  %v5713_v25 = vsub.s32 3, %v4614_v23  ;;  %v5711_v27 = vsub.s32 5, %v4614_v23 }
 0x25f   : > { %v1283_v33 = vsub.f32 0.0, %v4740_v29  ;;  %v4743_v34 = vadd.f32 %v3611_v5, %v1259_v30  ;;  %v1262_v35 = vmul.f32 %v3884_v32, %v3610_v3  ;;  %v5710_v32 = vsub.s32 6, %v4614_v23 }
 0x260   : > { %4166 = vpow2.f32 %v1290_v31  ;;  %v1239_v38 = vpop.f32.mrf.mxu1 }
 0x261   : > { %v1296_v40 = vmul.f32 1.442695, %v1283_v33  ;;  %v1282_v39 = vsub.f32 0.0, %v4743_v34  ;;  %v4746_v41 = vadd.f32 %v3611_v5, %v1262_v35  ;;  %v1261_v46 = vmul.f32 %v3610_v3, %v1239_v38 }
 0x262   : > { %v4757_v3 = vrot.slane %v1326_v62, %v4620_v26  ;;  %v4780_v35 = vrot.slane %v1326_v62, %v5714_v18 }
 0x263   : > { %4168 = vpow2.f32 %v1296_v40  ;;  %v1294_v48 = vmul.f32 1.442695, %v1282_v39  ;;  %v1285_v50 = vsub.f32 0.0, %v4746_v41  ;;  %v4749_v51 = vadd.f32 %v3611_v5, %v1261_v46 }
 0x264   : > { %v5715_v5 = vsub.s32 2, %v4614_v23  ;;  %v1347_v11 = vmul.f32 0.0, %v4757_v3 }
 0x265   : > { %4170 = vpow2.f32 %v1294_v48  ;;  %v1300_v52 = vmul.f32 1.442695, %v1285_v50  ;;  %v1284_v53 = vsub.f32 0.0, %v4749_v51  ;;  %v4794_v48 = vrot.slane %v1326_v62, %v5713_v25 }
 0x266   : > { %v4768_v14 = vrot.slane %v1326_v62, %v5715_v5  ;;  %v1375_v30 = vadd.f32 %v1367_v13, %v1347_v11  ;;  %v4798_v50 = vrot.slane %v1326_v62, %v5711_v27 }
 0x267   : > { %v4161_v54 = vpop.eup %4160  ;;  %4172 = vpow2.f32 %v1300_v52  ;;  %v1298_v55 = vmul.f32 1.442695, %v1284_v53 }
 0x268   : > { %v1303_v56 = vadd.f32 1.0, %v4161_v54  ;;  %v1402_v31 = vmul.f32 0.0, %v4768_v14 }
 0x269   : > { %v4163_v57 = vpop.eup %4162  ;;  %4174 = vpow2.f32 %v1298_v55 }
 0x26a   : > { %4176 = vrcp.f32 %v1303_v56  ;;  %v1302_v58 = vadd.f32 1.0, %v4163_v57  ;;  %v1410_v55 = vadd.f32 %v1402_v31, %v1375_v30 }
 0x26b   : > { %v4165_v59 = vpop.eup %4164 }
 0x26c   : > { %4178 = vrcp.f32 %v1302_v58  ;;  %v1305_v60 = vadd.f32 1.0, %v4165_v59 }
 0x26d   : > { %v4167_v61 = vpop.eup %4166 }
 0x26e   : > { %4180 = vrcp.f32 %v1305_v60  ;;  %v1304_v0 = vadd.f32 1.0, %v4167_v61 }
 0x270   : > { %v4169_v1 = vpop.eup %4168  ;;  %4182 = vrcp.f32 %v1304_v0 }
 0x271   : > { %v1307_v6 = vadd.f32 1.0, %v4169_v1 }
 0x272   : > { %v4171_v7 = vpop.eup %4170 }
 0x273   : > { %4184 = vrcp.f32 %v1307_v6  ;;  %v1306_v10 = vadd.f32 1.0, %v4171_v7 }
 0x274   : > { %v4173_v9 = vpop.eup %4172 }
 0x275   : > { %v1309_v15 = vadd.f32 1.0, %v4173_v9  ;;  %4186 = vrcp.f32 %v1306_v10 }
 0x276   : > { %v4175_v16 = vpop.eup %4174 }
 0x277   : > { %v4177_v20 = vpop.eup %4176  ;;  %v1308_v22 = vadd.f32 1.0, %v4175_v16  ;;  %4188 = vrcp.f32 %v1309_v15 }
 0x278   : > { %v1319_v24 = vmul.f32 %v4177_v20, %v4728_v8  ;;  %v4784_v8 = vrot.slane %v1326_v62, %v5712_v19 }
 0x279   : > { %v4179_v28 = vpop.eup %4178  ;;  %4190 = vrcp.f32 %v1308_v22 }
 0x27a   : > { %v1329_v33 = vrot.slane %v1319_v24, 7  ;;  %v1384_v40 = vrot.slane %v1319_v24, 1  ;;  %v1318_v39 = vmul.f32 %v4179_v28, %v4731_v12  ;;  %v4805_v12 = vrot.slane %v1326_v62, %v5710_v32 }
 0x27b   : > { %v4181_v38 = vpop.eup %4180  ;;  %v1369_v57 = vmul.f32 %v4761_v4, %v1319_v24  ;;  %v1445_v58 = vmul.f32 %v4780_v35, %v1319_v24  ;;  %v4811_v60 = vmul.f32 %v4784_v8, %v1319_v24 }
 0x27c   : > { %v4790_v46 = vsel %vm1094_vm4, %v1329_v33, 0.0  ;;  %v4801_v52 = vmul.f32 %v4181_v38, %v4734_v17  ;;  %v1328_v53 = vrot.slane %v1318_v39, 7  ;;  %v1383_v54 = vrot.slane %v1318_v39, 1 }
 0x27d   : > { %v4183_v56 = vpop.eup %4182  ;;  %v1349_v17 = vmul.f32 %v4757_v3, %v4790_v46  ;;  %v4821_v0 = vsel %vm1095_vm5, %v1384_v40, 0.0  ;;  %v1368_v7 = vmul.f32 %v4761_v4, %v1318_v39  ;;  %v1425_v10 = vmul.f32 %v4794_v48, %v4790_v46 }
 0x27e   : > { %v1331_v59 = vrot.slane %v4801_v52, 7  ;;  %v1336_v61 = vsel %vm1094_vm4, %v1328_v53, 0.0  ;;  %v1391_v62 = vsel %vm1095_vm5, %v1383_v54, 0.0  ;;  %v1444_v11 = vmul.f32 %v4780_v35, %v1318_v39 }
 0x27f   : > { %v1348_v6 = vmul.f32 %v4757_v3, %v1336_v61  ;;  %v1424_v9 = vmul.f32 %v4794_v48, %v1336_v61  ;;  %v1320_v15 = vmul.f32 %v4183_v56, %v4737_v21  ;;  %v1403_v22 = vmul.f32 %v4768_v14, %v1391_v62 }
 0x280   : > { %v4185_v1 = vpop.eup %4184  ;;  %v4831_v13 = vsel %vm1094_vm4, %v1331_v59, 0.0  ;;  %v1371_v28 = vmul.f32 %v4761_v4, %v4801_v52  ;;  %v1377_v30 = vadd.f32 %v1369_v57, %v1349_v17  ;;  %v1466_v21 = vmul.f32 %v4798_v50, %v1391_v62 }
 0x281   : > { %v4835_v16 = vmul.f32 %v4185_v1, %v4740_v29  ;;  %v1376_v20 = vadd.f32 %v1368_v7, %v1348_v6  ;;  %v1432_v24 = vadd.f32 %v1424_v9, %v1410_v55  ;;  %v1351_v31 = vmul.f32 %v4757_v3, %v4831_v13 }
 0x282   : > { %v1330_v33 = vrot.slane %v1320_v15, 7  ;;  %v1385_v38 = vrot.slane %v1320_v15, 1  ;;  %v1386_v29 = vrot.slane %v4801_v52, 1  ;;  %v4187_v53 = vpop.eup %4186  ;;  %v4846_v54 = vmul.f32 %v4794_v48, %v4831_v13 }
 0x283   : > { %v1411_v40 = vadd.f32 %v1403_v22, %v1376_v20  ;;  %v1452_v39 = vadd.f32 %v1444_v11, %v1432_v24  ;;  %v4850_v55 = vmul.f32 %v4780_v35, %v4801_v52  ;;  %v1333_v57 = vrot.slane %v4835_v16, 7 }
 0x284   : > { %v1338_v56 = vsel %vm1094_vm4, %v1330_v33, 0.0  ;;  %v4189_v59 = vpop.eup %4188  ;;  %v1370_v62 = vmul.f32 %v4761_v4, %v1320_v15  ;;  %v1393_v1 = vsel %vm1095_vm5, %v1385_v38, 0.0  ;;  %v4859_v7 = vadd.f32 %v1371_v28, %v1351_v31  ;;  %v4874_v28 = vld [vmem:[%s5764_s29 + $0x8] ss:$0 sm:$0xff] }
 0x285   : > { %v1433_v17 = vadd.f32 %v1425_v10, %v1411_v40  ;;  %v1350_v61 = vmul.f32 %v4757_v3, %v1338_v56  ;;  %v1446_v9 = vmul.f32 %v4780_v35, %v1320_v15  ;;  %v1507_v11 = vmul.f32 %v4784_v8, %v1320_v15 }
 0x286   : > { %v4191_v6 = vpop.eup %4190  ;;  %v4865_v20 = vsel %vm1094_vm4, %v1333_v57, 0.0  ;;  %v1474_v22 = vadd.f32 %v1466_v21, %v1452_v39  ;;  %v1373_v33 = vmul.f32 %v4761_v4, %v4835_v16  ;;  %v1405_v31 = vmul.f32 %v4768_v14, %v1393_v1 }
 0x287   : > { %v1378_v10 = vadd.f32 %v1370_v62, %v1350_v61  ;;  %v1353_v24 = vmul.f32 %v4757_v3, %v4865_v20  ;;  %v1426_v15 = vmul.f32 %v4794_v48, %v1338_v56  ;;  %v4879_v38 = vmul.f32 %v4187_v53, %v4743_v34 }
 0x288   : > { %v4882_v40 = vmul.f32 %v4189_v59, %v4746_v41  ;;  %v1453_v39 = vadd.f32 %v1445_v58, %v1433_v17  ;;  %v1487_v21 = vmul.f32 %v4805_v12, %v1338_v56  ;;  %v1527_v57 = vmul.f32 %v4874_v28, %v1393_v1 }
 0x289   : > { %v4887_v61 = vmul.f32 %v4191_v6, %v4749_v51  ;;  %v1388_v62 = vrot.slane %v4835_v16, 1  ;;  %v4892_v32 = vmul.f32 %v4794_v48, %v4865_v20  ;;  %v4896_v34 = vmul.f32 %v4780_v35, %v4835_v16 }
 0x28a   : > { %v1332_v41 = vrot.slane %v4879_v38, 7  ;;  %v1413_v58 = vadd.f32 %v1405_v31, %v1378_v10  ;;  %v4899_v53 = vadd.f32 %v1373_v33, %v1353_v24  ;;  %v1418_v56 = vrot.slane %v4882_v40, 7 }
 0x28b   : > { %v1404_v51 = vmul.f32 %v4768_v14, %v4821_v0  ;;  %v1372_v17 = vmul.f32 %v4761_v4, %v4879_v38  ;;  %v1387_v6 = vrot.slane %v4879_v38, 1  ;;  %v1334_v27 = vrot.slane %v4887_v61, 7 }
 0x28c   : > { %v1340_v59 = vsel %vm1094_vm4, %v1332_v41, 0.0  ;;  %v1448_v10 = vmul.f32 %v4780_v35, %v4879_v38  ;;  %v4915_v24 = vmul.f32 %v4780_v35, %v4882_v40  ;;  %v4920_v31 = vsel %vm1094_vm4, %v1418_v56, 0.0 }
 0x28d   : > { %v1352_v19 = vmul.f32 %v4757_v3, %v1340_v59  ;;  %v4924_v41 = vsel %vm1094_vm4, %v1334_v27, 0.0  ;;  %v1374_v25 = vmul.f32 %v4761_v4, %v4887_v61  ;;  %v1412_v18 = vadd.f32 %v1404_v51, %v1377_v30 }
 0x28e   : > { %v1428_v5 = vmul.f32 %v4794_v48, %v1340_v59  ;;  %v1354_v63 = vmul.f32 %v4757_v3, %v4924_v41  ;;  %v1389_v26 = vrot.slane %v4887_v61, 1  ;;  %v1467_v33 = vmul.f32 %v4798_v50, %v4821_v0 }
 0x28f   : > { %v4936_v56 = vmul.f32 %v4780_v35, %v4887_v61  ;;  %v1486_v27 = vmul.f32 %v4805_v12, %v4790_v46  ;;  %v1394_v4 = vsel %vm1095_vm5, %v1386_v29, 0.0  ;;  %v1434_v30 = vadd.f32 %v1426_v15, %v1412_v18 }
 0x290   : > { %v1380_v51 = vadd.f32 %v1372_v17, %v1352_v19  ;;  %v4944_v3 = vmul.f32 %v4794_v48, %v4920_v31  ;;  %v4948_v49 = vmul.f32 %v4794_v48, %v4924_v41  ;;  %v1475_v47 = vadd.f32 %v1467_v33, %v1453_v39 }
 0x291   : > { %v1494_v35 = vadd.f32 %v1486_v27, %v1474_v22  ;;  %v1526_v44 = vmul.f32 %v4874_v28, %v4821_v0  ;;  %v1454_v46 = vadd.f32 %v1446_v9, %v1434_v30  ;;  %v1468_v45 = vmul.f32 %v4798_v50, %v1393_v1  ;;  %v4963_v0 = vld [vmem:[%s5765_s12] ss:$0 sm:$0xff] }
 0x292   : > { %v1382_v29 = vadd.f32 %v1374_v25, %v1354_v63  ;;  %v1495_v18 = vadd.f32 %v1487_v21, %v1475_v47  ;;  %v1406_v19 = vmul.f32 %v4768_v14, %v1394_v4  ;;  %v1488_v15 = vmul.f32 %v4805_v12, %v4831_v13 }
 0x293   : > { %v1514_v17 = vadd.f32 %v4811_v60, %v1494_v35  ;;  %v1476_v48 = vadd.f32 %v1468_v45, %v1454_v46  ;;  %v1395_v39 = vsel %vm1095_vm5, %v1387_v6, 0.0  ;;  %v1435_v22 = vadd.f32 %v4846_v54, %v1413_v58  ;;  %v4974_v54 = vld [vmem:[%s5766_s13] ss:$0 sm:$0xff] }
 0x294   : > { %v1515_v63 = vadd.f32 %v1507_v11, %v1495_v18  ;;  %v1414_v47 = vadd.f32 %v1406_v19, %v4859_v7  ;;  %v1469_v25 = vmul.f32 %v4798_v50, %v1394_v4  ;;  %v1407_v13 = vmul.f32 %v4768_v14, %v1395_v39 }
 0x295   : > { %v1534_v1 = vadd.f32 %v1526_v44, %v1514_v17  ;;  %v1496_v60 = vadd.f32 %v1488_v15, %v1476_v48  ;;  %v1508_v45 = vmul.f32 %v4784_v8, %v4801_v52  ;;  %v1455_v9 = vadd.f32 %v4850_v55, %v1435_v22  ;;  %v4998_v48 = vld [vmem:[%s5687_s17] sm:$0xff] }
 0x296   : > { %v1535_v21 = vadd.f32 %v1527_v57, %v1515_v63  ;;  %v1528_v11 = vmul.f32 %v4874_v28, %v1394_v4  ;;  %v1415_v7 = vadd.f32 %v1407_v13, %v1380_v51  ;;  %v1489_v58 = vmul.f32 %v4805_v12, %v1340_v59 }
 0x297   : > { %v1549_v6 = vmul.f32 %v4963_v0, %v1534_v1  ;;  %v1516_v44 = vadd.f32 %v1508_v45, %v1496_v60  ;;  %v1477_v33 = vadd.f32 %v1469_v25, %v1455_v9  ;;  %v1396_v52 = vsel %vm1095_vm5, %v1388_v62, 0.0 }
 0x298   : > { %v1550_v55 = vmul.f32 %v4963_v0, %v1535_v21  ;;  %v1470_v27 = vmul.f32 %v4798_v50, %v1395_v39  ;;  %v1509_v30 = vmul.f32 %v4784_v8, %v4879_v38  ;;  %v1436_v57 = vadd.f32 %v1428_v5, %v1414_v47 }
 0x299   : > { %v1564_v4 = vadd.f32 %v4974_v54, %v1549_v6  ;;  %v1536_v51 = vadd.f32 %v1528_v11, %v1516_v44  ;;  %v1497_v35 = vadd.f32 %v1489_v58, %v1477_v33  ;;  %v1529_v59 = vmul.f32 %v4874_v28, %v1395_v39 }
 0x29a   : > { %v1565_v46 = vadd.f32 %v4974_v54, %v1550_v55  ;;  %v1408_v18 = vmul.f32 %v4768_v14, %v1396_v52  ;;  %v1456_v19 = vadd.f32 %v1448_v10, %v1436_v57  ;;  %v1471_v62 = vmul.f32 %v4798_v50, %v1396_v52 }
 0x29b   : > { %3901 = vmatprep.mubr.msk.f32.mxu0 %vm1580_vm6, %v1564_v4  ;;  %v1551_v15 = vmul.f32 %v4963_v0, %v1536_v51  ;;  %v1517_v17 = vadd.f32 %v1509_v30, %v1497_v35  ;;  %v1397_v5 = vsel %vm1095_vm5, %v1389_v26, 0.0  ;;  %v1437_v38 = vadd.f32 %v4892_v32, %v1415_v7 }
 0x29c   : > { %3902 = vmatmul.mubr.msk.f32.vlgmr.msra.gmra.mxu0 %vm1580_vm6, %v1565_v46  ;;  %v1416_v10 = vadd.f32 %v1408_v18, %v4899_v53  ;;  %v1478_v39 = vadd.f32 %v1470_v27, %v1456_v19  ;;  %v1490_v22 = vmul.f32 %v4805_v12, %v4865_v20  ;;  %v1409_v63 = vmul.f32 %v4768_v14, %v1397_v5 }
 0x29d   : > { %v1566_v47 = vadd.f32 %v4974_v54, %v1551_v15  ;;  %v1537_v26 = vadd.f32 %v1529_v59, %v1517_v17  ;;  %v1510_v32 = vmul.f32 %v4784_v8, %v4835_v16  ;;  %v1457_v25 = vadd.f32 %v4896_v34, %v1437_v38  ;;  %3930 = vmatpush3.msra.mxu0 %v4719_v2  ;;  %v3624_v38 = vld [vmem:[%s5686_s16] ss:$0 sm:$0xff] }
 0x29e   : > { %v1498_v13 = vadd.f32 %v1490_v22, %v1478_v39  ;;  %v1530_v1 = vmul.f32 %v4874_v28, %v1396_v52  ;;  %v1417_v53 = vadd.f32 %v1409_v63, %v1382_v29  ;;  %v1438_v60 = vadd.f32 %v4948_v49, %v1416_v10  ;;  %3931 = vmatprep.subr.mxu0 %v4998_v48 }
 0x29f   : > { %3904 = vmatprep.mubr.msk.f32.mxu0 %vm1580_vm6, %v1566_v47  ;;  %v1552_v14 = vmul.f32 %v4963_v0, %v1537_v26  ;;  %v1479_v20 = vadd.f32 %v1471_v62, %v1457_v25  ;;  %v1491_v16 = vmul.f32 %v4805_v12, %v4924_v41  ;;  %3932 = vmatpush3.msra.mxu0 %v4998_v48  ;;  %v5767_v29 = vrot.slane %v4882_v40, 1 }
 0x2a0   : > { %v1518_v34 = vadd.f32 %v1510_v32, %v1498_v13  ;;  %v1472_v45 = vmul.f32 %v4798_v50, %v1397_v5  ;;  %v1458_v9 = vadd.f32 %v4936_v56, %v1438_v60  ;;  %v1511_v7 = vmul.f32 %v4784_v8, %v4887_v61 }
 0x2a1   : > { %v1461_v49 = vsel %vm1095_vm5, %v5767_v29, 0.0  ;;  %v1567_v21 = vadd.f32 %v4974_v54, %v1552_v14  ;;  %v1499_v11 = vadd.f32 %v1491_v16, %v1479_v20  ;;  %v1439_v41 = vadd.f32 %v4944_v3, %v1417_v53 }
 0x2a2   : > { %v1492_v58 = vmul.f32 %v4805_v12, %v4920_v31  ;;  %v1538_v6 = vadd.f32 %v1530_v1, %v1518_v34  ;;  %v1480_v44 = vadd.f32 %v1472_v45, %v1458_v9  ;;  %v1493_v56 = vmul.f32 0.0, %v4805_v12 }
 0x2a3   : > { %3905 = vmatmul.mubr.msk.f32.gmra.mxu0 %vm1580_vm6, %v1567_v21  ;;  %v1519_v33 = vadd.f32 %v1511_v7, %v1499_v11  ;;  %v1531_v52 = vmul.f32 %v4874_v28, %v1397_v5  ;;  %v1473_v55 = vmul.f32 %v4798_v50, %v1461_v49  ;;  %v1459_v27 = vadd.f32 %v4915_v24, %v1439_v41  ;;  %v5771_v5 = vld [vmem:[#allocation15_spill] sm:$0xff] }
 0x2a4   : > { %v1512_v61 = vmul.f32 %v4784_v8, %v4882_v40  ;;  %v1553_v3 = vmul.f32 %v4963_v0, %v1538_v6  ;;  %v1500_v30 = vadd.f32 %v1492_v58, %v1480_v44  ;;  %v1513_v4 = vmul.f32 0.0, %v4784_v8 }
 0x2a5   : > { %v1539_v31 = vadd.f32 %v1531_v52, %v1519_v33  ;;  %v1481_v57 = vadd.f32 %v1473_v55, %v1459_v27  ;;  %v1532_v35 = vmul.f32 %v4874_v28, %v1461_v49  ;;  %v1533_v24 = vmul.f32 0.0, %v4874_v28  ;;  %v5768_v28 = vld [vmem:[#allocation13_spill] sm:$0xff] }
 0x2a6   : > { %v1568_v12 = vadd.f32 %v4974_v54, %v1553_v3  ;;  %v1520_v51 = vadd.f32 %v1512_v61, %v1500_v30 }
 0x2a7   : > { %v1554_v59 = vmul.f32 %v4963_v0, %v1539_v31  ;;  %v1501_v50 = vadd.f32 %v1493_v56, %v1481_v57 }
 0x2a8   : > { %3907 = vmatprep.mubr.msk.f32.mxu0 %vm1580_vm6, %v1568_v12  ;;  %v1540_v40 = vadd.f32 %v1532_v35, %v1520_v51 }
 0x2a9   : > { %v1569_v46 = vadd.f32 %v4974_v54, %v1554_v59  ;;  %v1521_v18 = vadd.f32 %v1513_v4, %v1501_v50 }
 0x2aa   : > { %v1555_v19 = vmul.f32 %v4963_v0, %v1540_v40 }
 0x2ab   : > { %3908 = vmatmul.mubr.msk.f32.gmra.mxu0 %vm1580_vm6, %v1569_v46  ;;  %v1541_v8 = vadd.f32 %v1533_v24, %v1521_v18 }
 0x2ac   : > { %v1570_v62 = vadd.f32 %v4974_v54, %v1555_v19 }
 0x2ad   : > { %v1556_v15 = vmul.f32 %v4963_v0, %v1541_v8  ;;  %v5769_v0 = vld [vmem:[#allocation12_spill] sm:$0xff] }
 0x2ae   : > { %3910 = vmatprep.mubr.msk.f32.mxu0 %vm1580_vm6, %v1570_v62 }
 0x2af   : > { %v1571_v17 = vadd.f32 %v4974_v54, %v1556_v15  ;;  %v5770_v54 = vld [vmem:[#allocation14_spill] sm:$0xff] }
 0x2b1   : > { %3911 = vmatmul.mubr.msk.f32.gmra.mxu0 %vm1580_vm6, %v1571_v17 }
 0x2b2   : > { %3933 = vmatprep.mubr.msk.f32.mxu0 %vm1126_vm3, %v4651_v37  ;;  %v5078_v37 = vld [vmem:[%s5687_s17 + $0x10] sm:$0xff] }
 0x2b5   : > { %3934 = vmatmul.mubr.msk.f32.vlgmr.msra.gmra.mxu0 %vm1126_vm3, %v4648_v36  ;;  %v5071_v36 = vld [vmem:[%s5687_s17 + $0x18] sm:$0xff] }
 0x2b6   : > { %3936 = vmatprep.mubr.msk.f32.mxu0 %vm1126_vm3, %v4658_v42  ;;  %3913 = vmatprep.subr.mxu1 %v5071_v36  ;;  %v3623_v42 = vld [vmem:[%s5685_s15] ss:$0 sm:$0xff] }
 0x2b7   : > { %3914 = vmatpush3.msra.mxu1 %v5071_v36 }
 0x2b8   : > { %3915 = vmatprep.subr.mxu1 %v5078_v37 }
 0x2b9   : > { %3937 = vmatmul.mubr.msk.f32.gmra.mxu0 %vm1126_vm3, %v4661_v43  ;;  %3916 = vmatpush3.msra.mxu1 %v5078_v37 }
 0x2ba   : > { %3939 = vmatprep.mubr.msk.f32.mxu0 %vm1126_vm3, %v5768_v28 }
 0x2bd   : > { %3940 = vmatmul.mubr.msk.f32.gmra.mxu0 %vm1126_vm3, %v5769_v0 }
 0x2be   : > { %3942 = vmatprep.mubr.msk.f32.mxu0 %vm1126_vm3, %v5770_v54 }
 0x2c1   : > { %3943 = vmatmul.mubr.msk.f32.gmra.mxu0 %vm1126_vm3, %v5771_v5 }
 0x35c   : > { %v3903_v43 = vpop.f32.mrf.mxu0 }
 0x35d   : > { %v1718_v10 = vmul.f32 %v3903_v43, %v3623_v42 }
 0x35e   : > { %v1671_v39 = vpop.f32.mrf.mxu0 }
 0x35f   : > { %v5088_v22 = vadd.f32 %v3624_v38, %v1718_v10  ;;  %v1717_v63 = vmul.f32 %v3623_v42, %v1671_v39 }
 0x361   : > { %v1741_v47 = vsub.f32 0.0, %v5088_v22  ;;  %v1732_v26 = vadd.f32 %v3624_v38, %v1717_v63 }
 0x363   : > { %v1750_v32 = vmul.f32 1.442695, %v1741_v47  ;;  %v1740_v25 = vsub.f32 0.0, %v1732_v26  ;;  %v3906_v13 = vpop.f32.mrf.mxu0 }
 0x364   : > { %v1720_v1 = vmul.f32 %v3906_v13, %v3623_v42 }
 0x365   : > { %4192 = vpow2.f32 %v1750_v32  ;;  %v1748_v53 = vmul.f32 1.442695, %v1740_v25  ;;  %v1681_v60 = vpop.f32.mrf.mxu0 }
 0x366   : > { %v5091_v14 = vadd.f32 %v3624_v38, %v1720_v1  ;;  %v1719_v20 = vmul.f32 %v3623_v42, %v1681_v60 }
 0x367   : > { %4194 = vpow2.f32 %v1748_v53 }
 0x368   : > { %v1743_v16 = vsub.f32 0.0, %v5091_v14  ;;  %v1734_v34 = vadd.f32 %v3624_v38, %v1719_v20  ;;  %v3641_v20 = vld [vmem:[%s5750_s1 + $0x10] sm:$0xff] }
 0x36a   : > { %v1754_v45 = vmul.f32 1.442695, %v1743_v16  ;;  %v1742_v9 = vsub.f32 0.0, %v1734_v34 }
 0x36b   : > { %v3909_v29 = vpop.f32.mrf.mxu0 }
 0x36c   : > { %4196 = vpow2.f32 %v1754_v45  ;;  %v1752_v49 = vmul.f32 1.442695, %v1742_v9  ;;  %v1722_v21 = vmul.f32 %v3909_v29, %v3623_v42 }
 0x36d   : > { %v1691_v11 = vpop.f32.mrf.mxu0 }
 0x36e   : > { %4198 = vpow2.f32 %v1752_v49  ;;  %v1737_v7 = vadd.f32 %v3624_v38, %v1722_v21  ;;  %v1721_v41 = vmul.f32 %v3623_v42, %v1691_v11 }
 0x370   : > { %v1745_v58 = vsub.f32 0.0, %v1737_v7  ;;  %v1736_v6 = vadd.f32 %v3624_v38, %v1721_v41 }
 0x371   : > { %v3912_v44 = vpop.f32.mrf.mxu0 }
 0x372   : > { %v4193_v56 = vpop.eup %4192  ;;  %v1758_v33 = vmul.f32 1.442695, %v1745_v58  ;;  %v1744_v52 = vsub.f32 0.0, %v1736_v6  ;;  %v1724_v55 = vmul.f32 %v3912_v44, %v3623_v42 }
 0x373   : > { %v1765_v27 = vadd.f32 1.0, %v4193_v56  ;;  %v1701_v61 = vpop.f32.mrf.mxu0 }
 0x374   : > { %v4195_v3 = vpop.eup %4194  ;;  %4200 = vpow2.f32 %v1758_v33  ;;  %v1756_v30 = vmul.f32 1.442695, %v1744_v52  ;;  %v1739_v31 = vadd.f32 %v3624_v38, %v1724_v55  ;;  %v1723_v57 = vmul.f32 %v3623_v42, %v1701_v61 }
 0x375   : > { %4202 = vrcp.f32 %v1765_v27  ;;  %v1764_v4 = vadd.f32 1.0, %v4195_v3  ;;  %v3935_v16 = vpop.f32.mrf.mxu0 }
 0x376   : > { %4204 = vpow2.f32 %v1756_v30  ;;  %v1747_v12 = vsub.f32 0.0, %v1739_v31  ;;  %v1738_v51 = vadd.f32 %v3624_v38, %v1723_v57 }
 0x377   : > { %4206 = vrcp.f32 %v1764_v4 }
 0x378   : > { %v1762_v35 = vmul.f32 1.442695, %v1747_v12  ;;  %v1746_v59 = vsub.f32 0.0, %v1738_v51 }
 0x379   : > { %v4197_v50 = vpop.eup %4196 }
 0x37a   : > { %v1767_v24 = vadd.f32 1.0, %v4197_v50  ;;  %4208 = vpow2.f32 %v1762_v35  ;;  %v1760_v40 = vmul.f32 1.442695, %v1746_v59 }
 0x37b   : > { %v4199_v46 = vpop.eup %4198 }
 0x37c   : > { %4210 = vrcp.f32 %v1767_v24  ;;  %v1766_v18 = vadd.f32 1.0, %v4199_v46 }
 0x37d   : > { %4212 = vpow2.f32 %v1760_v40 }
 0x37e   : > { %4214 = vrcp.f32 %v1766_v18  ;;  %v3667_v18 = vld [vmem:[%s5760_s14 + $0x68] sm:$0xff] }
 0x381   : > { %v4201_v19 = vpop.eup %4200 }
 0x382   : > { %v4203_v8 = vpop.eup %4202  ;;  %v1769_v62 = vadd.f32 1.0, %v4201_v19  ;;  %v3666_v19 = vld [vmem:[%s5760_s14 + $0x60] sm:$0xff] }
 0x383   : > { %v4205_v15 = vpop.eup %4204  ;;  %v1781_v54 = vmul.f32 %v4203_v8, %v5088_v22  ;;  %v3665_v8 = vld [vmem:[%s5760_s14 + $0x58] sm:$0xff] }
 0x384   : > { %v4207_v17 = vpop.eup %4206  ;;  %v1768_v28 = vadd.f32 1.0, %v4205_v15  ;;  %4216 = vrcp.f32 %v1769_v62  ;;  %v3664_v62 = vld [vmem:[%s5760_s14 + $0x50] sm:$0xff]  ;;  %v3663_v15 = vld [vmem:[%s5760_s14 + $0x48] sm:$0xff] }
 0x385   : > { %v1780_v0 = vmul.f32 %v4207_v17, %v1732_v26  ;;  %v3662_v17 = vld [vmem:[%s5760_s14 + $0x40] sm:$0xff] }
 0x386   : > { %4218 = vrcp.f32 %v1768_v28  ;;  %v3652_v28 = vld [vmem:[%s5761_s28 + $0x1] ss:$0 sm:$0xff] }
 0x387   : > { %v4209_v5 = vpop.eup %4208  ;;  %3917 = vmatprep.mubr.msk.f32.mxu1 %vm1126_vm3, %v1780_v0 }
 0x388   : > { %v1771_v42 = vadd.f32 1.0, %v4209_v5  ;;  %3918 = vmatmul.mubr.msk.f32.vlgmr.msra.gmra.mxu1 %vm1126_vm3, %v1781_v54  ;;  %v3654_v54 = vld [vmem:[%s5763_s27 + $0x1] ss:$0 sm:$0xff] }
 0x389   : > { %v4211_v43 = vpop.eup %4210 }
 0x38a   : > { %v4213_v38 = vpop.eup %4212  ;;  %4220 = vrcp.f32 %v1771_v42  ;;  %v1783_v47 = vmul.f32 %v4211_v43, %v5091_v14  ;;  %v3642_v14 = vld [vmem:[%s5750_s1 + $0x18] sm:$0xff]  ;;  %s3719_s1 = sshll.u32 %s4557_s22, 4  ;;  %s4392_s22 = smov [#allocation3]  }
 0x38b   : > { %v4215_v10 = vpop.eup %4214  ;;  %v1770_v39 = vadd.f32 1.0, %v4213_v38  ;;  %3945 = vmatprep.subr.mxu1 %v3642_v14  ;;  %s4329_s0 = sshll.u32 %s4392_s22, 4  ;;  %s4330_s0 = int_to_ptr.vmem [resolvable:$false] %s4329_s0 }
 0x38c   : > { %v1782_v63 = vmul.f32 %v4215_v10, %v1734_v34  ;;  %3946 = vmatpush3.msra.mxu1 %v3642_v14  ;;  %v1999_v34 = vpop.f32.mrf.mxu0  ;;  %p4332_p0 = scmp.lt.s32.totalorder %s3509_s2, %s4330_s0 }
 0x38d   : > { %4222 = vrcp.f32 %v1770_v39  ;;  %3947 = vmatprep.subr.mxu1 %v3641_v20 }
 0x38e   : > { %3920 = vmatprep.mubr.msk.f32.mxu1 %vm1126_vm3, %v1782_v63  ;;  %3948 = vmatpush3.msra.mxu1 %v3641_v20  ;;  %v3938_v21 = vpop.f32.mrf.mxu0 }
 0x38f   : > { %3921 = vmatmul.mubr.msk.f32.gmra.mxu1 %vm1126_vm3, %v1783_v47  ;;  %3989 = vmatprep.subr.mxu1 %v5071_v36 }
 0x391   : > { %v4217_v22 = vpop.eup %4216 }
 0x392   : > { %v1785_v25 = vmul.f32 %v4217_v22, %v1737_v7  ;;  %v2009_v7 = vpop.f32.mrf.mxu0 }
 0x393   : > { %v4219_v26 = vpop.eup %4218 }
 0x394   : > { %v1784_v32 = vmul.f32 %v4219_v26, %v1736_v6  ;;  %v3941_v44 = vpop.f32.mrf.mxu0 }
 0x396   : > { %3923 = vmatprep.mubr.msk.f32.mxu1 %vm1126_vm3, %v1784_v32  ;;  %v2019_v33 = vpop.f32.mrf.mxu0 }
 0x397   : > { %3924 = vmatmul.mubr.msk.f32.gmra.mxu1 %vm1126_vm3, %v1785_v25  ;;  %v4221_v13 = vpop.eup %4220 }
 0x398   : > { %v1787_v60 = vmul.f32 %v4221_v13, %v1739_v31  ;;  %v3944_v61 = vpop.f32.mrf.mxu0 }
 0x39a   : > { %v4223_v1 = vpop.eup %4222  ;;  %v2029_v31 = vpop.f32.mrf.mxu0 }
 0x39b   : > { %v1786_v53 = vmul.f32 %v4223_v1, %v1738_v51 }
 0x39d   : > { %3926 = vmatprep.mubr.msk.f32.mxu1 %vm1126_vm3, %v1786_v53 }
 0x39e   : > { %3927 = vmatmul.mubr.msk.f32.gmra.mxu1 %vm1126_vm3, %v1787_v60 }
 0x448   : > { %v3919_v45 = vpop.f32.mrf.mxu1 }
 0x449   : > { %v5111_v9 = vadd.f32 %v3935_v16, %v3919_v45 }
 0x44a   : > { %v1878_v29 = vpop.f32.mrf.mxu1 }
 0x44b   : > { %v5113_v49 = vadd.f32 %v1999_v34, %v1878_v29  ;;  %2051 = vrot.lane.b32.xlu0 %v5111_v9, %s5772_s11 }
 0x44d   : > { %2049 = vrot.lane.b32.xlu1 %v5113_v49, %s5772_s11 }
 0x44f   : > { %v3922_v11 = vpop.f32.mrf.mxu1 }
 0x450   : > { %v5119_v41 = vadd.f32 %v3938_v21, %v3922_v11 }
 0x451   : > { %v1888_v58 = vpop.f32.mrf.mxu1 }
 0x452   : > { %v5121_v6 = vadd.f32 %v2009_v7, %v1888_v58  ;;  %2055 = vrot.lane.b32.xlu0 %v5119_v41, %s5772_s11 }
 0x454   : > { %2053 = vrot.lane.b32.xlu1 %v5121_v6, %s5772_s11 }
 0x457   : > { %v3925_v56 = vpop.f32.mrf.mxu1 }
 0x458   : > { %v5127_v52 = vadd.f32 %v3941_v44, %v3925_v56 }
 0x459   : > { %v1898_v55 = vpop.f32.mrf.mxu1 }
 0x45a   : > { %v5129_v27 = vadd.f32 %v2019_v33, %v1898_v55  ;;  %2059 = vrot.lane.b32.xlu0 %v5127_v52, %s5772_s11 }
 0x45c   : > { %2057 = vrot.lane.b32.xlu1 %v5129_v27, %s5772_s11 }
 0x45e   : > { %v3928_v3 = vpop.f32.mrf.mxu1 }
 0x45f   : > { %v5135_v30 = vadd.f32 %v3944_v61, %v3928_v3 }
 0x460   : > { %v1908_v57 = vpop.f32.mrf.mxu1 }
 0x461   : > { %v5137_v4 = vadd.f32 %v2029_v31, %v1908_v57  ;;  %2063 = vrot.lane.b32.xlu0 %v5135_v30, %s5772_s11 }
 0x463   : > { %2061 = vrot.lane.b32.xlu1 %v5137_v4, %s5772_s11  ;;  %s5781_s11 = sld [smem:[#allocation18_spill]] }
 0x469   : > { %s848_s10 = scalar_lea.vmem %s5781_s11, %s4589_s4  ;;  %s3496_s4 = scalar_lea.sflag [#allocation4], %s835_s8 }
 0x46a   : > { %s4331_s11 = scalar_lea.vmem %s4330_s0, 32 }
 0x46b   : > { %p4333_p1 = scmp.lt.s32.totalorder %s4331_s11, %s4325_s9 }
 0x46d   : > { %p4334_p2 = por %p4333_p1, %p4332_p0 }
 0x46f   : > { %p4335_p3 = pnand %p4334_p2, %p4328_p13 }
 0x4bd   : > { %v2052_v51 = vpop.permute.xlu0 %2051 }
 0x4bf   : > { %v2050_v12 = vpop.permute.xlu1 %2049 }
 0x4c0   : > { %3949 = vmatprep.mubr.msk.f32.mxu1 %vm1126_vm3, %v2050_v12 }
 0x4c1   : > { %3950 = vmatmul.mubr.msk.f32.vlgmr.msra.gmra.mxu1 %vm1126_vm3, %v2052_v51 }
 0x4c2   : > { %3990 = vmatpush3.msra.mxu1 %v5071_v36  ;;  %v3669_v36 = vld [vmem:[%s5760_s14 + $0x78] sm:$0xff] }
 0x4c3   : > { %3991 = vmatprep.subr.mxu1 %v5078_v37  ;;  %3961 = vmatprep.subr.mxu0 %v3669_v36 }
 0x4c4   : > { %3992 = vmatpush3.msra.mxu1 %v5078_v37  ;;  %v2056_v59 = vpop.permute.xlu0 %2055  ;;  %3962 = vmatpush3.msra.mxu0 %v3669_v36  ;;  %v3668_v37 = vld [vmem:[%s5760_s14 + $0x70] sm:$0xff] }
 0x4c5   : > { %3963 = vmatprep.subr.mxu0 %v3668_v37 }
 0x4c6   : > { %v2054_v35 = vpop.permute.xlu1 %2053  ;;  %3964 = vmatpush3.msra.mxu0 %v3668_v37 }
 0x4c7   : > { %3952 = vmatprep.mubr.msk.f32.mxu1 %vm1126_vm3, %v2054_v35  ;;  %3965 = vmatprep.subr.mxu0 %v3667_v18 }
 0x4c8   : > { %3953 = vmatmul.mubr.msk.f32.gmra.mxu1 %vm1126_vm3, %v2056_v59  ;;  %3966 = vmatpush3.msra.mxu0 %v3667_v18 }
 0x4c9   : > { %3967 = vmatprep.subr.mxu0 %v3666_v19 }
 0x4ca   : > { %3968 = vmatpush3.msra.mxu0 %v3666_v19  ;;  %v5773_v19 = vld [vmem:[#allocation11_spill] sm:$0xff] }
 0x4cb   : > { %3969 = vmatprep.subr.mxu0 %v3665_v8 }
 0x4cc   : > { %v2060_v24 = vpop.permute.xlu0 %2059  ;;  %3970 = vmatpush3.msra.mxu0 %v3665_v8 }
 0x4cd   : > { %3971 = vmatprep.subr.mxu0 %v3664_v62 }
 0x4ce   : > { %v2058_v50 = vpop.permute.xlu1 %2057  ;;  %3972 = vmatpush3.msra.mxu0 %v3664_v62  ;;  %v5774_v62 = vsub.s32 1, %v4614_v23 }
 0x4cf   : > { %3955 = vmatprep.mubr.msk.f32.mxu1 %vm1126_vm3, %v2058_v50  ;;  %3973 = vmatprep.subr.mxu0 %v3663_v15 }
 0x4d0   : > { %3956 = vmatmul.mubr.msk.f32.gmra.mxu1 %vm1126_vm3, %v2060_v24  ;;  %3974 = vmatpush3.msra.mxu0 %v3663_v15  ;;  %v3655_v24 = vld [vmem:[%s5764_s29 + $0x10] sm:$0xff] }
 0x4d1   : > { %3975 = vmatprep.subr.mxu0 %v3662_v17  ;;  %v5213_v8 = vrot.slane %v3655_v24, %v5773_v19  ;;  %v5217_v15 = vrot.slane %v3655_v24, %v5774_v62 }
 0x4d2   : > { %3976 = vmatpush3.msra.mxu0 %v3662_v17 }
 0x4d3   : > { %v2064_v46 = vpop.permute.xlu0 %2063  ;;  %4005 = vmatprep.subr.mxu0 %v4719_v2 }
 0x4d5   : > { %v2062_v40 = vpop.permute.xlu1 %2061 }
 0x4d6   : > { %3958 = vmatprep.mubr.msk.f32.mxu1 %vm1126_vm3, %v2062_v40 }
 0x4d7   : > { %3959 = vmatmul.mubr.msk.f32.gmra.mxu1 %vm1126_vm3, %v2064_v46 }
 0x581   : > { %v3951_v0 = vpop.f32.mrf.mxu1 }
 0x582   : > { %v2195_v5 = vmul.f32 %v3951_v0, %v3652_v28  ;;  %v2287_v0 = vmul.f32 0.0, %v5213_v8 }
 0x583   : > { %v2147_v42 = vpop.f32.mrf.mxu1 }
 0x584   : > { %v5185_v43 = vadd.f32 %v3654_v54, %v2195_v5  ;;  %v2194_v38 = vmul.f32 %v3652_v28, %v2147_v42  ;;  %v5775_v5 = vsub.s32 2, %v4614_v23 }
 0x586   : > { %v2219_v10 = vsub.f32 0.0, %v5185_v43  ;;  %v5188_v39 = vadd.f32 %v3654_v54, %v2194_v38  ;;  %v5223_v42 = vrot.slane %v3655_v24, %v5775_v5 }
 0x588   : > { %v2228_v63 = vmul.f32 1.442695, %v2219_v10  ;;  %v2218_v2 = vsub.f32 0.0, %v5188_v39  ;;  %v3954_v47 = vpop.f32.mrf.mxu1 }
 0x589   : > { %v2197_v22 = vmul.f32 %v3954_v47, %v3652_v28 }
 0x58a   : > { %4224 = vpow2.f32 %v2228_v63  ;;  %v2226_v26 = vmul.f32 1.442695, %v2218_v2  ;;  %v2157_v32 = vpop.f32.mrf.mxu1 }
 0x58b   : > { %v5191_v25 = vadd.f32 %v3654_v54, %v2197_v22  ;;  %v2196_v13 = vmul.f32 %v3652_v28, %v2157_v32 }
 0x58c   : > { %4226 = vpow2.f32 %v2226_v26  ;;  %v2341_v26 = vmul.f32 0.0, %v5223_v42 }
 0x58d   : > { %v2221_v1 = vsub.f32 0.0, %v5191_v25  ;;  %v5194_v53 = vadd.f32 %v3654_v54, %v2196_v13 }
 0x58f   : > { %v2232_v60 = vmul.f32 1.442695, %v2221_v1  ;;  %v2220_v14 = vsub.f32 0.0, %v5194_v53 }
 0x590   : > { %v3957_v20 = vpop.f32.mrf.mxu1 }
 0x591   : > { %4228 = vpow2.f32 %v2232_v60  ;;  %v2230_v16 = vmul.f32 1.442695, %v2220_v14  ;;  %v2199_v34 = vmul.f32 %v3957_v20, %v3652_v28  ;;  %v5776_v20 = vsub.s32 4, %v4614_v23 }
 0x592   : > { %v2167_v45 = vpop.f32.mrf.mxu1 }
 0x593   : > { %4230 = vpow2.f32 %v2230_v16  ;;  %v5197_v29 = vadd.f32 %v3654_v54, %v2199_v34  ;;  %v2198_v21 = vmul.f32 %v3652_v28, %v2167_v45  ;;  %v5234_v16 = vrot.slane %v3655_v24, %v5776_v20 }
 0x595   : > { %v2223_v11 = vsub.f32 0.0, %v5197_v29  ;;  %v5200_v7 = vadd.f32 %v3654_v54, %v2198_v21 }
 0x597   : > { %v4225_v58 = vpop.eup %4224  ;;  %v2236_v44 = vmul.f32 1.442695, %v2223_v11  ;;  %v2222_v56 = vsub.f32 0.0, %v5200_v7  ;;  %v3960_v33 = vpop.f32.mrf.mxu1 }
 0x598   : > { %v2243_v55 = vadd.f32 1.0, %v4225_v58  ;;  %v2201_v61 = vmul.f32 %v3960_v33, %v3652_v28 }
 0x599   : > { %v4227_v3 = vpop.eup %4226  ;;  %4232 = vpow2.f32 %v2236_v44  ;;  %v2234_v31 = vmul.f32 1.442695, %v2222_v56  ;;  %v2177_v57 = vpop.f32.mrf.mxu1 }
 0x59a   : > { %4234 = vrcp.f32 %v2243_v55  ;;  %v2242_v12 = vadd.f32 1.0, %v4227_v3  ;;  %v5203_v51 = vadd.f32 %v3654_v54, %v2201_v61  ;;  %v2200_v35 = vmul.f32 %v3652_v28, %v2177_v57 }
 0x59b   : > { %4236 = vpow2.f32 %v2234_v31  ;;  %v5779_v61 = vsub.s32 5, %v4614_v23  ;;  %v5780_v31 = vsub.s32 6, %v4614_v23 }
 0x59c   : > { %4238 = vrcp.f32 %v2242_v12  ;;  %v2225_v59 = vsub.f32 0.0, %v5203_v51  ;;  %v5206_v50 = vadd.f32 %v3654_v54, %v2200_v35  ;;  %v2307_v54 = vmul.f32 0.0, %v5217_v15 }
 0x59d   : > { %v5247_v3 = vrot.slane %v3655_v24, %v5779_v61  ;;  %v5251_v57 = vrot.slane %v3655_v24, %v5780_v31 }
 0x59e   : > { %v4229_v40 = vpop.eup %4228  ;;  %v2240_v46 = vmul.f32 1.442695, %v2225_v59  ;;  %v2224_v36 = vsub.f32 0.0, %v5206_v50  ;;  %v2315_v22 = vadd.f32 %v2307_v54, %v2287_v0 }
 0x59f   : > { %v2245_v37 = vadd.f32 1.0, %v4229_v40 }
 0x5a0   : > { %v4231_v18 = vpop.eup %4230  ;;  %4240 = vpow2.f32 %v2240_v46  ;;  %v2238_v17 = vmul.f32 1.442695, %v2224_v36  ;;  %v2349_v34 = vadd.f32 %v2341_v26, %v2315_v22 }
 0x5a1   : > { %4242 = vrcp.f32 %v2245_v37  ;;  %v2244_v28 = vadd.f32 1.0, %v4231_v18 }
 0x5a2   : > { %4244 = vpow2.f32 %v2238_v17 }
 0x5a3   : > { %4246 = vrcp.f32 %v2244_v28 }
 0x5a6   : > { %v4233_v38 = vpop.eup %4232 }
 0x5a7   : > { %v4235_v10 = vpop.eup %4234  ;;  %v2247_v63 = vadd.f32 1.0, %v4233_v38 }
 0x5a8   : > { %v4237_v2 = vpop.eup %4236  ;;  %v2259_v47 = vmul.f32 %v4235_v10, %v5185_v43  ;;  %v5777_v43 = vsub.s32 3, %v4614_v23 }
 0x5a9   : > { %v4239_v32 = vpop.eup %4238  ;;  %4248 = vrcp.f32 %v2247_v63  ;;  %v2246_v13 = vadd.f32 1.0, %v4237_v2 }
 0x5aa   : > { %v2270_v1 = vrot.slane %v2259_v47, 7  ;;  %v2258_v60 = vmul.f32 %v4239_v32, %v5188_v39  ;;  %v5238_v45 = vrot.slane %v3655_v24, %v5777_v43  ;;  %v2324_v11 = vrot.slane %v2259_v47, 1 }
 0x5ab   : > { %4250 = vrcp.f32 %v2246_v13  ;;  %v5778_v39 = vsub.s32 7, %v4614_v23  ;;  %v2309_v55 = vmul.f32 %v5217_v15, %v2259_v47  ;;  %v2384_v18 = vmul.f32 %v5234_v16, %v2259_v47 }
 0x5ac   : > { %v5230_v14 = vsel %vm1094_vm4, %v2270_v1, 0.0  ;;  %v2269_v58 = vrot.slane %v2258_v60, 7  ;;  %v2323_v44 = vrot.slane %v2258_v60, 1  ;;  %v2308_v62 = vmul.f32 %v5217_v15, %v2258_v60 }
 0x5ad   : > { %v4241_v21 = vpop.eup %4240  ;;  %v5242_v56 = vrot.slane %v3655_v24, %v5778_v39  ;;  %v2289_v59 = vmul.f32 %v5213_v8, %v5230_v14  ;;  %v2331_v54 = vsel %vm1095_vm5, %v2324_v11, 0.0  ;;  %v2383_v2 = vmul.f32 %v5234_v16, %v2258_v60 }
 0x5ae   : > { %v4243_v33 = vpop.eup %4242  ;;  %v2249_v12 = vadd.f32 1.0, %v4241_v21  ;;  %v2276_v40 = vsel %vm1094_vm4, %v2269_v58, 0.0  ;;  %v2330_v46 = vsel %vm1095_vm5, %v2323_v44, 0.0  ;;  %v2364_v13 = vmul.f32 %v5238_v45, %v5230_v14 }
 0x5af   : > { %v4245_v35 = vpop.eup %4244  ;;  %v5260_v36 = vmul.f32 %v4243_v33, %v5191_v25  ;;  %v2288_v24 = vmul.f32 %v5213_v8, %v2276_v40  ;;  %v2363_v17 = vmul.f32 %v5238_v45, %v2276_v40  ;;  %v2342_v28 = vmul.f32 %v5223_v42, %v2330_v46 }
 0x5b0   : > { %v4247_v37 = vpop.eup %4246  ;;  %v2445_v5 = vmul.f32 %v5242_v56, %v2259_v47  ;;  %4252 = vrcp.f32 %v2249_v12  ;;  %v2317_v63 = vadd.f32 %v2309_v55, %v2289_v59  ;;  %v2248_v26 = vadd.f32 1.0, %v4245_v35 }
 0x5b1   : > { %v2272_v0 = vrot.slane %v5260_v36, 7  ;;  %v2316_v25 = vadd.f32 %v2308_v62, %v2288_v24  ;;  %v2371_v38 = vadd.f32 %v2363_v17, %v2349_v34  ;;  %v2260_v10 = vmul.f32 %v4247_v37, %v5194_v53 }
 0x5b2   : > { %v2405_v1 = vmul.f32 %v5247_v3, %v2330_v46  ;;  %v2343_v47 = vmul.f32 %v5223_v42, %v2331_v54  ;;  %v2311_v53 = vmul.f32 %v5217_v15, %v5260_v36  ;;  %v2326_v58 = vrot.slane %v5260_v36, 1 }
 0x5b3   : > { %v5275_v22 = vsel %vm1094_vm4, %v2272_v0, 0.0  ;;  %v2350_v32 = vadd.f32 %v2342_v28, %v2316_v25  ;;  %v2391_v20 = vadd.f32 %v2383_v2, %v2371_v38  ;;  %v2271_v34 = vrot.slane %v2260_v10, 7 }
 0x5b4   : > { %v2325_v43 = vrot.slane %v2260_v10, 1  ;;  %v2291_v11 = vmul.f32 %v5213_v8, %v5275_v22  ;;  %v5288_v44 = vmul.f32 %v5234_v16, %v5260_v36  ;;  %4254 = vrcp.f32 %v2248_v26 }
 0x5b5   : > { %v2372_v21 = vadd.f32 %v2364_v13, %v2350_v32  ;;  %v2278_v39 = vsel %vm1094_vm4, %v2271_v34, 0.0  ;;  %v2351_v55 = vadd.f32 %v2343_v47, %v2317_v63  ;;  %v5297_v12 = vmul.f32 %v5238_v45, %v5275_v22  ;;  %v5319_v63 = vld [vmem:[%s5764_s29 + $0x18] ss:$0 sm:$0xff] }
 0x5b6   : > { %v4249_v60 = vpop.eup %4248  ;;  %v2290_v35 = vmul.f32 %v5213_v8, %v2278_v39  ;;  %v2406_v59 = vmul.f32 %v5247_v3, %v2331_v54  ;;  %v2413_v40 = vadd.f32 %v2405_v1, %v2391_v20  ;;  %v2310_v46 = vmul.f32 %v5217_v15, %v2260_v10 }
 0x5b7   : > { %v5293_v33 = vmul.f32 %v4249_v60, %v5197_v29  ;;  %v2392_v31 = vadd.f32 %v2384_v18, %v2372_v21  ;;  %v2332_v37 = vsel %vm1095_vm5, %v2325_v43, 0.0  ;;  %v2319_v24 = vadd.f32 %v2311_v53, %v2291_v11 }
 0x5b8   : > { %v4251_v61 = vpop.eup %4250  ;;  %v2385_v62 = vmul.f32 %v5234_v16, %v2260_v10  ;;  %v2446_v18 = vmul.f32 %v5242_v56, %v2260_v10  ;;  %v2318_v28 = vadd.f32 %v2310_v46, %v2290_v35  ;;  %v2425_v38 = vmul.f32 %v5251_v57, %v5230_v14  ;;  %v5347_v35 = vld [vmem:[%s5765_s12 + $0x1] ss:$0 sm:$0xff] }
 0x5b9   : > { %v2274_v29 = vrot.slane %v5293_v33, 7  ;;  %v5308_v17 = vmul.f32 %v4251_v61, %v5200_v7  ;;  %v2414_v25 = vadd.f32 %v2406_v59, %v2392_v31  ;;  %v2344_v2 = vmul.f32 %v5223_v42, %v2332_v37 }
 0x5ba   : > { %v2365_v10 = vmul.f32 %v5238_v45, %v2278_v39  ;;  %v2426_v7 = vmul.f32 %v5251_v57, %v2278_v39  ;;  %v2466_v32 = vmul.f32 %v5319_v63, %v2332_v37  ;;  %v2313_v13 = vmul.f32 %v5217_v15, %v5293_v33 }
 0x5bb   : > { %v5312_v0 = vsel %vm1094_vm4, %v2274_v29, 0.0  ;;  %v2273_v26 = vrot.slane %v5308_v17, 7  ;;  %v2328_v14 = vrot.slane %v5293_v33, 1  ;;  %v2433_v1 = vadd.f32 %v2425_v38, %v2413_v40 }
 0x5bc   : > { %v2293_v47 = vmul.f32 %v5213_v8, %v5312_v0  ;;  %v5333_v20 = vmul.f32 %v5234_v16, %v5293_v33  ;;  %v2434_v34 = vadd.f32 %v2426_v7, %v2414_v25  ;;  %v2352_v60 = vadd.f32 %v2344_v2, %v2318_v28 }
 0x5bd   : > { %v2280_v53 = vsel %vm1094_vm4, %v2273_v26, 0.0  ;;  %v4253_v43 = vpop.eup %4252  ;;  %v2453_v21 = vadd.f32 %v2445_v5, %v2433_v1  ;;  %v2465_v11 = vmul.f32 %v5319_v63, %v2331_v54  ;;  %v2333_v39 = vsel %vm1095_vm5, %v2326_v58, 0.0 }
 0x5be   : > { %v2292_v61 = vmul.f32 %v5213_v8, %v2280_v53  ;;  %v5342_v31 = vmul.f32 %v4253_v43, %v5203_v51  ;;  %v2454_v59 = vadd.f32 %v2446_v18, %v2434_v34  ;;  %v2373_v40 = vadd.f32 %v2365_v10, %v2351_v55  ;;  %v5364_v55 = vld [vmem:[%s5766_s13 + $0x1] ss:$0 sm:$0xff]  ;;  %s5782_s13 = sld [smem:[#allocation31_spill]] }
 0x5bf   : > { %v5351_v5 = vmul.f32 %v5238_v45, %v5312_v0  ;;  %v2312_v54 = vmul.f32 %v5217_v15, %v5308_v17  ;;  %v2327_v58 = vrot.slane %v5308_v17, 1  ;;  %v2473_v46 = vadd.f32 %v2465_v11, %v2453_v21 }
 0x5c0   : > { %v5356_v29 = vadd.f32 %v2313_v13, %v2293_v47  ;;  %v2387_v51 = vmul.f32 %v5234_v16, %v5308_v17  ;;  %v2357_v28 = vrot.slane %v5342_v31, 7  ;;  %v2345_v18 = vmul.f32 %v5223_v42, %v2333_v39 }
 0x5c1   : > { %v2367_v25 = vmul.f32 %v5238_v45, %v2280_v53  ;;  %v2489_v38 = vmul.f32 %v5347_v35, %v2473_v46  ;;  %v2474_v2 = vadd.f32 %v2466_v32, %v2454_v59  ;;  %v2393_v10 = vadd.f32 %v2385_v62, %v2373_v40  ;;  %v4255_v7 = vpop.eup %4254 }
 0x5c2   : > { %v2320_v26 = vadd.f32 %v2312_v54, %v2292_v61  ;;  %v2353_v13 = vadd.f32 %v2345_v18, %v2319_v24  ;;  %v2407_v1 = vmul.f32 %v5247_v3, %v2332_v37  ;;  %v2408_v47 = vmul.f32 %v5247_v3, %v2333_v39 }
 0x5c3   : > { %v5373_v34 = vsel %vm1094_vm4, %v2357_v28, 0.0  ;;  %v5376_v43 = vmul.f32 %v4255_v7, %v5206_v50  ;;  %v2505_v21 = vadd.f32 %v5364_v55, %v2489_v38  ;;  %v2427_v32 = vmul.f32 %v5251_v57, %v5275_v22 }
 0x5c4   : > { %v2490_v62 = vmul.f32 %v5347_v35, %v2474_v2  ;;  %v2415_v11 = vadd.f32 %v2407_v1, %v2393_v10  ;;  %v2334_v37 = vsel %vm1095_vm5, %v2327_v58, 0.0  ;;  %v2374_v24 = vadd.f32 %v5297_v12, %v2352_v60  ;;  %s5634_s14 = scalar_lea.hbm %s5782_s13, %s3719_s1 }
 0x5c5   : > { %v5387_v61 = vmul.f32 %v5234_v16, %v5342_v31  ;;  %v2399_v50 = vrot.slane %v5342_v31, 1  ;;  %v2275_v59 = vrot.slane %v5376_v43, 7  ;;  %3977 = vmatprep.mubr.msk.f32.mxu0 %vm1580_vm6, %v2505_v21  ;;  %v2447_v22 = vmul.f32 %v5242_v56, %v5260_v36  ;;  %v4324_v21 = vld [vmem:[%s5687_s17 + $0x8] sm:$0xff] }
 0x5c6   : > { %v2506_v40 = vadd.f32 %v5364_v55, %v2490_v62  ;;  %v2435_v54 = vadd.f32 %v2427_v32, %v2415_v11  ;;  %v2467_v58 = vmul.f32 %v5319_v63, %v2333_v39  ;;  %v2394_v12 = vadd.f32 %v5288_v44, %v2374_v24 }
 0x5c7   : > { %v2370_v60 = vmul.f32 %v5238_v45, %v5373_v34  ;;  %v2282_v46 = vsel %vm1094_vm4, %v2275_v59, 0.0  ;;  %v2329_v28 = vrot.slane %v5376_v43, 1  ;;  %v2346_v18 = vmul.f32 %v5223_v42, %v2334_v37 }
 0x5c8   : > { %v2294_v38 = vmul.f32 %v5213_v8, %v2282_v46  ;;  %3978 = vmatmul.mubr.msk.f32.vlgmr.msra.gmra.mxu0 %vm1580_vm6, %v2506_v40  ;;  %v2455_v36 = vadd.f32 %v2447_v22, %v2435_v54  ;;  %v2416_v2 = vadd.f32 %v2408_v47, %v2394_v12  ;;  %v2428_v39 = vmul.f32 %v5251_v57, %v2280_v53 }
 0x5c9   : > { %v2314_v44 = vmul.f32 %v5217_v15, %v5376_v43  ;;  %v2354_v10 = vadd.f32 %v2346_v18, %v2320_v26  ;;  %v2335_v7 = vsel %vm1095_vm5, %v2328_v14, 0.0  ;;  %v2375_v1 = vadd.f32 %v2367_v25, %v2353_v13  ;;  %4006 = vmatpush3.msra.mxu0 %v4324_v21 }
 0x5ca   : > { %v2475_v8 = vadd.f32 %v2467_v58, %v2455_v36  ;;  %v2409_v32 = vmul.f32 %v5247_v3, %v2334_v37  ;;  %v2436_v62 = vadd.f32 %v2428_v39, %v2416_v2  ;;  %v2448_v53 = vmul.f32 %v5242_v56, %v5308_v17  ;;  %4007 = vmatprep.subr.mxu0 %v4998_v48 }
 0x5cb   : > { %v2322_v15 = vadd.f32 %v2314_v44, %v2294_v38  ;;  %v2369_v26 = vmul.f32 %v5238_v45, %v2282_v46  ;;  %v2468_v14 = vmul.f32 %v5319_v63, %v2334_v37  ;;  %v2395_v25 = vadd.f32 %v2387_v51, %v2375_v1  ;;  %4008 = vmatpush3.msra.mxu0 %v4998_v48 }
 0x5cc   : > { %v2491_v13 = vmul.f32 %v5347_v35, %v2475_v8  ;;  %v2456_v47 = vadd.f32 %v2448_v53, %v2436_v62  ;;  %v2347_v11 = vmul.f32 %v5223_v42, %v2335_v7  ;;  %v2336_v24 = vsel %vm1095_vm5, %v2329_v28, 0.0 }
 0x5cd   : > { %v2417_v59 = vadd.f32 %v2409_v32, %v2395_v25  ;;  %v2429_v17 = vmul.f32 %v5251_v57, %v5312_v0  ;;  %v2348_v22 = vmul.f32 %v5223_v42, %v2336_v24  ;;  %v2376_v45 = vadd.f32 %v5351_v5, %v2354_v10 }
 0x5ce   : > { %v2507_v51 = vadd.f32 %v5364_v55, %v2491_v13  ;;  %v2476_v37 = vadd.f32 %v2468_v14, %v2456_v47  ;;  %v2355_v48 = vadd.f32 %v2347_v11, %v5356_v29  ;;  %v2410_v40 = vmul.f32 %v5247_v3, %v2335_v7 }
 0x5cf   : > { %v2437_v54 = vadd.f32 %v2429_v17, %v2417_v59  ;;  %v2449_v58 = vmul.f32 %v5242_v56, %v5293_v33  ;;  %v2356_v12 = vadd.f32 %v2348_v22, %v2322_v15  ;;  %v2396_v28 = vadd.f32 %v5333_v20, %v2376_v45 }
 0x5d0   : > { %v2389_v0 = vmul.f32 %v5234_v16, %v5376_v43  ;;  %3980 = vmatprep.mubr.msk.f32.mxu0 %vm1580_vm6, %v2507_v51  ;;  %v2492_v42 = vmul.f32 %v5347_v35, %v2476_v37  ;;  %v2469_v5 = vmul.f32 %v5319_v63, %v2335_v7  ;;  %v2377_v18 = vadd.f32 %v2369_v26, %v2355_v48 }
 0x5d1   : > { %v2457_v29 = vadd.f32 %v2449_v58, %v2437_v54  ;;  %v2418_v38 = vadd.f32 %v2410_v40, %v2396_v28  ;;  %v2430_v36 = vmul.f32 %v5251_v57, %v2282_v46  ;;  %v2400_v33 = vsel %vm1095_vm5, %v2399_v50, 0.0 }
 0x5d2   : > { %v2508_v2 = vadd.f32 %v5364_v55, %v2492_v42  ;;  %v2411_v20 = vmul.f32 %v5247_v3, %v2336_v24  ;;  %v2397_v39 = vadd.f32 %v2389_v0, %v2377_v18  ;;  %v2378_v16 = vadd.f32 %v2370_v60, %v2356_v12 }
 0x5d3   : > { %v2477_v44 = vadd.f32 %v2469_v5, %v2457_v29  ;;  %v2438_v10 = vadd.f32 %v2430_v36, %v2418_v38  ;;  %v2450_v1 = vmul.f32 %v5242_v56, %v5376_v43  ;;  %v2432_v7 = vmul.f32 0.0, %v5251_v57 }
 0x5d4   : > { %v2431_v21 = vmul.f32 %v5251_v57, %v5373_v34  ;;  %3981 = vmatmul.mubr.msk.f32.gmra.mxu0 %vm1580_vm6, %v2508_v2  ;;  %v2412_v23 = vmul.f32 %v5247_v3, %v2400_v33  ;;  %v2419_v50 = vadd.f32 %v2411_v20, %v2397_v39  ;;  %v2398_v46 = vadd.f32 %v5387_v61, %v2378_v16 }
 0x5d5   : > { %v2493_v8 = vmul.f32 %v5347_v35, %v2477_v44  ;;  %v2458_v60 = vadd.f32 %v2450_v1, %v2438_v10  ;;  %v2470_v32 = vmul.f32 %v5319_v63, %v2336_v24  ;;  %v2451_v43 = vmul.f32 %v5242_v56, %v5342_v31 }
 0x5d6   : > { %v2439_v62 = vadd.f32 %v2431_v21, %v2419_v50  ;;  %v2420_v53 = vadd.f32 %v2412_v23, %v2398_v46  ;;  %v2452_v15 = vmul.f32 0.0, %v5242_v56  ;;  %v2471_v3 = vmul.f32 %v5319_v63, %v2400_v33 }
 0x5d7   : > { %v2509_v57 = vadd.f32 %v5364_v55, %v2493_v8  ;;  %v2478_v34 = vadd.f32 %v2470_v32, %v2458_v60  ;;  %v2472_v61 = vmul.f32 0.0, %v5319_v63 }
 0x5d8   : > { %v2459_v26 = vadd.f32 %v2451_v43, %v2439_v62  ;;  %v2440_v14 = vadd.f32 %v2432_v7, %v2420_v53 }
 0x5d9   : > { %3983 = vmatprep.mubr.msk.f32.mxu0 %vm1580_vm6, %v2509_v57  ;;  %v2494_v25 = vmul.f32 %v5347_v35, %v2478_v34 }
 0x5da   : > { %v2479_v13 = vadd.f32 %v2471_v3, %v2459_v26  ;;  %v2460_v47 = vadd.f32 %v2452_v15, %v2440_v14 }
 0x5db   : > { %v2510_v31 = vadd.f32 %v5364_v55, %v2494_v25 }
 0x5dc   : > { %v2495_v11 = vmul.f32 %v5347_v35, %v2479_v13  ;;  %v2480_v56 = vadd.f32 %v2472_v61, %v2460_v47  ;;  %v2983_v47 = vld [vmem:[%s5688_s18 + $0x10] sm:$0xff] }
 0x5dd   : > { %3984 = vmatmul.mubr.msk.f32.gmra.mxu0 %vm1580_vm6, %v2510_v31 }
 0x5de   : > { %v2511_v24 = vadd.f32 %v5364_v55, %v2495_v11  ;;  %v2496_v59 = vmul.f32 %v5347_v35, %v2480_v56  ;;  %v2982_v56 = vld [vmem:[%s5688_s18 + $0x8] sm:$0xff] }
 0x5e0   : > { %3986 = vmatprep.mubr.msk.f32.mxu0 %vm1580_vm6, %v2511_v24  ;;  %v2512_v63 = vadd.f32 %v5364_v55, %v2496_v59 }
 0x5e2   : > { %3987 = vmatmul.mubr.msk.f32.gmra.mxu0 %vm1580_vm6, %v2512_v63 }
 0x5e3   : > { %4009 = vmatprep.mubr.msk.f32.mxu0 %vm1126_vm3, %v5113_v49  ;;  %v3679_v49 = vld [vmem:[%s5685_s15 + $0x1] ss:$0 sm:$0xff] }
 0x5e6   : > { %4010 = vmatmul.mubr.msk.f32.vlgmr.msra.gmra.mxu0 %vm1126_vm3, %v5111_v9  ;;  %v5489_v9 = vld [vmem:[%s5688_s18 + $0x18] sm:$0xff] }
 0x5e7   : > { %4012 = vmatprep.mubr.msk.f32.mxu0 %vm1126_vm3, %v5121_v6  ;;  %4021 = vmatprep.subr.mxu1 %v5489_v9  ;;  %v3681_v6 = vld [vmem:[%s5686_s16 + $0x1] ss:$0 sm:$0xff] }
 0x5ea   : > { %4013 = vmatmul.mubr.msk.f32.gmra.mxu0 %vm1126_vm3, %v5119_v41 }
 0x5eb   : > { %4015 = vmatprep.mubr.msk.f32.mxu0 %vm1126_vm3, %v5129_v27 }
 0x5ee   : > { %4016 = vmatmul.mubr.msk.f32.gmra.mxu0 %vm1126_vm3, %v5127_v52 }
 0x5ef   : > { %4018 = vmatprep.mubr.msk.f32.mxu0 %vm1126_vm3, %v5137_v4 }
 0x5f2   : > { %4019 = vmatmul.mubr.msk.f32.gmra.mxu0 %vm1126_vm3, %v5135_v30 }
 0x688   : > { %v3979_v41 = vpop.f32.mrf.mxu0 }
 0x689   : > { %v2660_v52 = vmul.f32 %v3979_v41, %v3679_v49 }
 0x68a   : > { %v2612_v27 = vpop.f32.mrf.mxu0 }
 0x68b   : > { %v2676_v4 = vadd.f32 %v3681_v6, %v2660_v52  ;;  %v2659_v30 = vmul.f32 %v3679_v49, %v2612_v27 }
 0x68d   : > { %v2684_v35 = vsub.f32 0.0, %v2676_v4  ;;  %v2675_v55 = vadd.f32 %v3681_v6, %v2659_v30 }
 0x68f   : > { %v2693_v17 = vmul.f32 1.442695, %v2684_v35  ;;  %v2683_v22 = vsub.f32 0.0, %v2675_v55 }
 0x691   : > { %4256 = vpow2.f32 %v2693_v17  ;;  %v2691_v45 = vmul.f32 1.442695, %v2683_v22 }
 0x693   : > { %4258 = vpow2.f32 %v2691_v45 }
 0x694   : > { %v3982_v51 = vpop.f32.mrf.mxu0 }
 0x695   : > { %v2662_v37 = vmul.f32 %v3982_v51, %v3679_v49 }
 0x696   : > { %v2622_v48 = vpop.f32.mrf.mxu0 }
 0x697   : > { %v5498_v40 = vadd.f32 %v3681_v6, %v2662_v37  ;;  %v2661_v54 = vmul.f32 %v3679_v49, %v2622_v48  ;;  %v2981_v37 = vld [vmem:[%s5688_s18] sm:$0xff] }
 0x699   : > { %v2686_v58 = vsub.f32 0.0, %v5498_v40  ;;  %v5501_v12 = vadd.f32 %v3681_v6, %v2661_v54 }
 0x69b   : > { %v2697_v28 = vmul.f32 1.442695, %v2686_v58  ;;  %v2685_v0 = vsub.f32 0.0, %v5501_v12 }
 0x69d   : > { %4260 = vpow2.f32 %v2697_v28  ;;  %v2695_v42 = vmul.f32 1.442695, %v2685_v0  ;;  %v3985_v5 = vpop.f32.mrf.mxu0 }
 0x69e   : > { %v4257_v18 = vpop.eup %4256  ;;  %v2664_v29 = vmul.f32 %v3985_v5, %v3679_v49 }
 0x69f   : > { %v2708_v38 = vadd.f32 1.0, %v4257_v18  ;;  %4262 = vpow2.f32 %v2695_v42  ;;  %v2632_v36 = vpop.f32.mrf.mxu0 }
 0x6a0   : > { %v4259_v33 = vpop.eup %4258  ;;  %v5504_v2 = vadd.f32 %v3681_v6, %v2664_v29  ;;  %v2663_v20 = vmul.f32 %v3679_v49, %v2632_v36 }
 0x6a1   : > { %v2707_v39 = vadd.f32 1.0, %v4259_v33  ;;  %4264 = vrcp.f32 %v2708_v38 }
 0x6a2   : > { %v2688_v16 = vsub.f32 0.0, %v5504_v2  ;;  %v2679_v44 = vadd.f32 %v3681_v6, %v2663_v20  ;;  %v3988_v10 = vpop.f32.mrf.mxu0 }
 0x6a3   : > { %4266 = vrcp.f32 %v2707_v39  ;;  %v2666_v1 = vmul.f32 %v3988_v10, %v3679_v49 }
 0x6a4   : > { %v2701_v7 = vmul.f32 1.442695, %v2688_v16  ;;  %v2687_v21 = vsub.f32 0.0, %v2679_v44  ;;  %v2642_v23 = vpop.f32.mrf.mxu0 }
 0x6a5   : > { %v2682_v50 = vadd.f32 %v3681_v6, %v2666_v1  ;;  %v2665_v46 = vmul.f32 %v3679_v49, %v2642_v23 }
 0x6a6   : > { %4268 = vpow2.f32 %v2701_v7  ;;  %v2699_v8 = vmul.f32 1.442695, %v2687_v21  ;;  %v4011_v48 = vpop.f32.mrf.mxu0 }
 0x6a7   : > { %v2690_v60 = vsub.f32 0.0, %v2682_v50  ;;  %v2681_v32 = vadd.f32 %v3681_v6, %v2665_v46  ;;  %v3218_v46 = vld [vmem:[%s5693_s23 + $0x18] sm:$0xff] }
 0x6a8   : > { %4270 = vpow2.f32 %v2699_v8  ;;  %v2942_v54 = vpop.f32.mrf.mxu0  ;;  %v3217_v8 = vld [vmem:[%s5693_s23 + $0x10] sm:$0xff] }
 0x6a9   : > { %v2705_v43 = vmul.f32 1.442695, %v2690_v60  ;;  %v2689_v62 = vsub.f32 0.0, %v2681_v32  ;;  %v3216_v60 = vld [vmem:[%s5693_s23 + $0x8] sm:$0xff] }
 0x6aa   : > { %v4261_v53 = vpop.eup %4260  ;;  %v4014_v0 = vpop.f32.mrf.mxu0 }
 0x6ab   : > { %v2710_v15 = vadd.f32 1.0, %v4261_v53  ;;  %4272 = vpow2.f32 %v2705_v43  ;;  %v2703_v57 = vmul.f32 1.442695, %v2689_v62  ;;  %v3706_v43 = vld [vmem:[%s5689_s19] ss:$0 sm:$0xff] }
 0x6ac   : > { %v4263_v34 = vpop.eup %4262  ;;  %v2952_v5 = vpop.f32.mrf.mxu0  ;;  %v3707_v53 = vld [vmem:[%s5690_s20] ss:$0 sm:$0xff] }
 0x6ad   : > { %4274 = vrcp.f32 %v2710_v15  ;;  %v2709_v26 = vadd.f32 1.0, %v4263_v34 }
 0x6ae   : > { %4276 = vpow2.f32 %v2703_v57  ;;  %v4265_v3 = vpop.eup %4264  ;;  %v4017_v36 = vpop.f32.mrf.mxu0 }
 0x6af   : > { %4278 = vrcp.f32 %v2709_v26  ;;  %v2724_v25 = vmul.f32 %v4265_v3, %v2676_v4 }
 0x6b0   : > { %v4267_v14 = vpop.eup %4266  ;;  %v2962_v33 = vpop.f32.mrf.mxu0 }
 0x6b1   : > { %v2723_v61 = vmul.f32 %v4267_v14, %v2675_v55 }
 0x6b2   : > { %v4020_v16 = vpop.f32.mrf.mxu0 }
 0x6b3   : > { %v4269_v13 = vpop.eup %4268  ;;  %3993 = vmatprep.mubr.msk.f32.mxu1 %vm1126_vm3, %v2723_v61 }
 0x6b4   : > { %v2712_v31 = vadd.f32 1.0, %v4269_v13  ;;  %3994 = vmatmul.mubr.msk.f32.vlgmr.msra.gmra.mxu1 %vm1126_vm3, %v2724_v25  ;;  %v2972_v1 = vpop.f32.mrf.mxu0 }
 0x6b5   : > { %v4271_v11 = vpop.eup %4270  ;;  %4022 = vmatpush3.msra.mxu1 %v5489_v9 }
 0x6b6   : > { %v2711_v24 = vadd.f32 1.0, %v4271_v11  ;;  %4023 = vmatprep.subr.mxu1 %v2983_v47  ;;  %4280 = vrcp.f32 %v2712_v31 }
 0x6b7   : > { %4024 = vmatpush3.msra.mxu1 %v2983_v47 }
 0x6b8   : > { %v4273_v59 = vpop.eup %4272  ;;  %4282 = vrcp.f32 %v2711_v24  ;;  %4025 = vmatprep.subr.mxu1 %v2982_v56 }
 0x6b9   : > { %v2714_v63 = vadd.f32 1.0, %v4273_v59  ;;  %4026 = vmatpush3.msra.mxu1 %v2982_v56 }
 0x6ba   : > { %v4275_v49 = vpop.eup %4274  ;;  %4027 = vmatprep.subr.mxu1 %v2981_v37 }
 0x6bb   : > { %v4277_v41 = vpop.eup %4276  ;;  %4284 = vrcp.f32 %v2714_v63  ;;  %v2726_v9 = vmul.f32 %v4275_v49, %v5498_v40  ;;  %4028 = vmatpush3.msra.mxu1 %v2981_v37 }
 0x6bc   : > { %v4279_v6 = vpop.eup %4278  ;;  %v2713_v52 = vadd.f32 1.0, %v4277_v41 }
 0x6bd   : > { %v2725_v27 = vmul.f32 %v4279_v6, %v5501_v12 }
 0x6be   : > { %4286 = vrcp.f32 %v2713_v52 }
 0x6bf   : > { %3996 = vmatprep.mubr.msk.f32.mxu1 %vm1126_vm3, %v2725_v27 }
 0x6c0   : > { %3997 = vmatmul.mubr.msk.f32.gmra.mxu1 %vm1126_vm3, %v2726_v9 }
 0x6c3   : > { %v4281_v4 = vpop.eup %4280 }
 0x6c4   : > { %v2728_v55 = vmul.f32 %v4281_v4, %v5504_v2 }
 0x6c5   : > { %v4283_v30 = vpop.eup %4282 }
 0x6c6   : > { %v2727_v35 = vmul.f32 %v4283_v30, %v2679_v44 }
 0x6c8   : > { %3999 = vmatprep.mubr.msk.f32.mxu1 %vm1126_vm3, %v2727_v35  ;;  %v4285_v17 = vpop.eup %4284 }
 0x6c9   : > { %4000 = vmatmul.mubr.msk.f32.gmra.mxu1 %vm1126_vm3, %v2728_v55  ;;  %v2730_v51 = vmul.f32 %v4285_v17, %v2682_v50  ;;  %v4389_v50 = vmov 0.0  }
 0x6ca   : > { %4063 = vmatprep.subr.mxu0 %v4389_v50  ;;  %4041 = vmatprep.subr.mxu1 %v4389_v50 }
 0x6cb   : > { %v4287_v22 = vpop.eup %4286  ;;  %4079 = vmatprep.mubr.msk.f32.mxu0 %vm4390_vm7, %v4389_v50 }
 0x6cc   : > { %v2729_v45 = vmul.f32 %v4287_v22, %v2681_v32  ;;  %v3215_v32 = vld [vmem:[%s5693_s23] sm:$0xff] }
 0x6ce   : > { %4002 = vmatprep.mubr.msk.f32.mxu1 %vm1126_vm3, %v2729_v45 }
 0x6cf   : > { %4003 = vmatmul.mubr.msk.f32.gmra.mxu1 %vm1126_vm3, %v2730_v51 }
 0x774   : > { %v3995_v40 = vpop.f32.mrf.mxu1 }
 0x775   : > { %v2948_v28 = vadd.f32 %v4011_v48, %v3995_v40 }
 0x776   : > { %v2821_v58 = vpop.f32.mrf.mxu1 }
 0x777   : > { %v2943_v12 = vadd.f32 %v2942_v54, %v2821_v58 }
 0x779   : > { %4029 = vmatprep.mubr.msk.f32.mxu1 %vm866_vm2, %v2943_v12 }
 0x77a   : > { %4030 = vmatmul.mubr.msk.f32.vlgmr.msra.gmra.mxu1 %vm866_vm2, %v2948_v28 }
 0x77b   : > { %4042 = vmatpush3.msra.mxu1 %v3218_v46 }
 0x77c   : > { %4043 = vmatprep.subr.mxu1 %v4389_v50 }
 0x77d   : > { %4044 = vmatpush3.msra.mxu1 %v3217_v8 }
 0x77e   : > { %4045 = vmatprep.subr.mxu1 %v4389_v50 }
 0x77f   : > { %4046 = vmatpush3.msra.mxu1 %v3216_v60 }
 0x780   : > { %v3998_v42 = vpop.f32.mrf.mxu1  ;;  %4047 = vmatprep.subr.mxu1 %v4389_v50 }
 0x781   : > { %v2958_v38 = vadd.f32 %v4014_v0, %v3998_v42  ;;  %4048 = vmatpush3.msra.mxu1 %v3215_v32 }
 0x782   : > { %v2831_v18 = vpop.f32.mrf.mxu1  ;;  %4052 = vmatprep.subr.mxu1 %v4389_v50 }
 0x783   : > { %v2953_v29 = vadd.f32 %v2952_v5, %v2831_v18 }
 0x785   : > { %4032 = vmatprep.mubr.msk.f32.mxu1 %vm866_vm2, %v2953_v29 }
 0x786   : > { %4033 = vmatmul.mubr.msk.f32.gmra.mxu1 %vm866_vm2, %v2958_v38 }
 0x789   : > { %v4001_v2 = vpop.f32.mrf.mxu1 }
 0x78a   : > { %v2968_v44 = vadd.f32 %v4017_v36, %v4001_v2 }
 0x78b   : > { %v2841_v20 = vpop.f32.mrf.mxu1 }
 0x78c   : > { %v2963_v39 = vadd.f32 %v2962_v33, %v2841_v20 }
 0x78e   : > { %4035 = vmatprep.mubr.msk.f32.mxu1 %vm866_vm2, %v2963_v39 }
 0x78f   : > { %v4004_v10 = vpop.f32.mrf.mxu1  ;;  %4036 = vmatmul.mubr.msk.f32.gmra.mxu1 %vm866_vm2, %v2968_v44 }
 0x790   : > { %v2978_v23 = vadd.f32 %v4020_v16, %v4004_v10 }
 0x791   : > { %v2851_v7 = vpop.f32.mrf.mxu1 }
 0x792   : > { %v2973_v21 = vadd.f32 %v2972_v1, %v2851_v7 }
 0x794   : > { %4038 = vmatprep.mubr.msk.f32.mxu1 %vm866_vm2, %v2973_v21 }
 0x795   : > { %4039 = vmatmul.mubr.msk.f32.gmra.mxu1 %vm866_vm2, %v2978_v23 }
 0x796   : > { %4049 = vmatprep.mubr.msk.f32.mxu1 %vm4390_vm7, %v4389_v50 }
 0x83a   : > { %v4031_v62 = vpop.f32.mrf.mxu1 }
 0x83b   : > { %v3122_v15 = vmul.f32 %v4031_v62, %v3706_v43 }
 0x83c   : > { %v3075_v57 = vpop.f32.mrf.mxu1 }
 0x83d   : > { %v5564_v34 = vadd.f32 %v3707_v53, %v3122_v15  ;;  %v3121_v26 = vmul.f32 %v3706_v43, %v3075_v57 }
 0x83f   : > { %v3145_v3 = vsub.f32 0.0, %v5564_v34  ;;  %v3136_v14 = vadd.f32 %v3707_v53, %v3121_v26 }
 0x841   : > { %v3144_v61 = vsub.f32 0.0, %v3136_v14  ;;  %v3154_v25 = vmul.f32 1.442695, %v3145_v3 }
 0x843   : > { %v3152_v13 = vmul.f32 1.442695, %v3144_v61 }
 0x845   : > { %4288 = vpow2.f32 %v3152_v13 }
 0x846   : > { %v4034_v47 = vpop.f32.mrf.mxu1  ;;  %4290 = vpow2.f32 %v3154_v25 }
 0x847   : > { %v3124_v31 = vmul.f32 %v4034_v47, %v3706_v43 }
 0x848   : > { %v3085_v11 = vpop.f32.mrf.mxu1 }
 0x849   : > { %v5567_v56 = vadd.f32 %v3707_v53, %v3124_v31  ;;  %v3123_v24 = vmul.f32 %v3706_v43, %v3085_v11 }
 0x84b   : > { %v3147_v59 = vsub.f32 0.0, %v5567_v56  ;;  %v3138_v63 = vadd.f32 %v3707_v53, %v3123_v24 }
 0x84d   : > { %v3158_v49 = vmul.f32 1.442695, %v3147_v59  ;;  %v3146_v41 = vsub.f32 0.0, %v3138_v63 }
 0x84f   : > { %4292 = vpow2.f32 %v3158_v49  ;;  %v3156_v6 = vmul.f32 1.442695, %v3146_v41  ;;  %v4037_v52 = vpop.f32.mrf.mxu1 }
 0x850   : > { %v3126_v27 = vmul.f32 %v4037_v52, %v3706_v43 }
 0x851   : > { %4294 = vpow2.f32 %v3156_v6  ;;  %v3095_v9 = vpop.f32.mrf.mxu1 }
 0x852   : > { %v4289_v4 = vpop.eup %4288  ;;  %v3141_v30 = vadd.f32 %v3707_v53, %v3126_v27  ;;  %v3125_v35 = vmul.f32 %v3706_v43, %v3095_v9 }
 0x853   : > { %v4291_v55 = vpop.eup %4290  ;;  %v3168_v45 = vadd.f32 1.0, %v4289_v4 }
 0x854   : > { %v3149_v17 = vsub.f32 0.0, %v3141_v30  ;;  %v3140_v22 = vadd.f32 %v3707_v53, %v3125_v35  ;;  %v3169_v54 = vadd.f32 1.0, %v4291_v55 }
 0x855   : > { %v4040_v51 = vpop.f32.mrf.mxu1 }
 0x856   : > { %v3162_v37 = vmul.f32 1.442695, %v3149_v17  ;;  %v3148_v48 = vsub.f32 0.0, %v3140_v22  ;;  %v3128_v40 = vmul.f32 %v4040_v51, %v3706_v43 }
 0x857   : > { %v3105_v58 = vpop.f32.mrf.mxu1 }
 0x858   : > { %4296 = vpow2.f32 %v3162_v37  ;;  %v3160_v12 = vmul.f32 1.442695, %v3148_v48  ;;  %v3143_v28 = vadd.f32 %v3707_v53, %v3128_v40  ;;  %v3127_v0 = vmul.f32 %v3706_v43, %v3105_v58  ;;  %v3302_v48 = vld [vmem:[%s5695_s25 + $0x18] sm:$0xff]  ;;  %v3301_v40 = vld [vmem:[%s5695_s25 + $0x10] sm:$0xff]  ;;  %v3377_v58 = vld [vmem:[%s5691_s21] sm:$0x1] }
 0x859   : > { %4298 = vrcp.f32 %v3168_v45 }
 0x85a   : > { %4300 = vpow2.f32 %v3160_v12  ;;  %v3151_v42 = vsub.f32 0.0, %v3143_v28  ;;  %v3142_v5 = vadd.f32 %v3707_v53, %v3127_v0  ;;  %v3378_v12 = vld [vmem:[#allocation2] sm:$0x1] }
 0x85b   : > { %4302 = vrcp.f32 %v3169_v54  ;;  %v3300_v54 = vld [vmem:[%s5695_s25 + $0x8] sm:$0xff]  ;;  %3381 = vperm.xlu1 %4127, %v3378_v12   ;;  %v3219_v0 = vld [vmem:[%s5694_s24] sm:$0x1] }
 0x85c   : > { %v4293_v18 = vpop.eup %4292  ;;  %v3166_v29 = vmul.f32 1.442695, %v3151_v42  ;;  %v3150_v38 = vsub.f32 0.0, %v3142_v5 }
 0x85d   : > { %v3171_v33 = vadd.f32 1.0, %v4293_v18 }
 0x85e   : > { %v4295_v36 = vpop.eup %4294  ;;  %4304 = vpow2.f32 %v3166_v29  ;;  %v3164_v2 = vmul.f32 1.442695, %v3150_v38 }
 0x85f   : > { %v3170_v20 = vadd.f32 1.0, %v4295_v36 }
 0x860   : > { %4306 = vpow2.f32 %v3164_v2 }
 0x861   : > { %4308 = vrcp.f32 %v3170_v20 }
 0x862   : > { %4310 = vrcp.f32 %v3171_v33 }
 0x865   : > { %v4297_v39 = vpop.eup %4296 }
 0x866   : > { %v4299_v16 = vpop.eup %4298  ;;  %v3173_v44 = vadd.f32 1.0, %v4297_v39 }
 0x867   : > { %v4301_v10 = vpop.eup %4300  ;;  %v3184_v21 = vmul.f32 %v4299_v16, %v3136_v14  ;;  %v3303_v16 = vld [vmem:[%s5696_s26] sm:$0x1] }
 0x868   : > { %4312 = vrcp.f32 %v3173_v44  ;;  %v3172_v1 = vadd.f32 1.0, %v4301_v10  ;;  %v4303_v7 = vpop.eup %4302 }
 0x869   : > { %v3185_v46 = vmul.f32 %v4303_v7, %v5564_v34  ;;  %v3192_v43 = vsel %vm866_vm2, %v3184_v21, 0.0 }
 0x86a   : > { %4314 = vrcp.f32 %v3172_v1 }
 0x86b   : > { %v4305_v23 = vpop.eup %4304  ;;  %v3193_v57 = vsel %vm866_vm2, %v3185_v46, 0.0 }
 0x86c   : > { %v3175_v8 = vadd.f32 1.0, %v4305_v23  ;;  %v3194_v26 = vadd.f32 %v3193_v57, %v3192_v43  ;;  %v3485_v23 = vld [vmem:[%s848_s10] sm:$0x1] }
 0x86d   : > { %v4307_v60 = vpop.eup %4306  ;;  %vm3486_vm8 = vcmp.eq.f32.partialorder %v3485_v23, 1.0 }
 0x86e   : > { %v4309_v32 = vpop.eup %4308  ;;  %4316 = vrcp.f32 %v3175_v8  ;;  %v3174_v62 = vadd.f32 1.0, %v4307_v60 }
 0x86f   : > { %v4311_v53 = vpop.eup %4310  ;;  %v3186_v15 = vmul.f32 %v4309_v32, %v3138_v63 }
 0x870   : > { %4318 = vrcp.f32 %v3174_v62  ;;  %v3187_v14 = vmul.f32 %v4311_v53, %v5567_v56 }
 0x871   : > { %v3195_v3 = vsel %vm866_vm2, %v3186_v15, 0.0 }
 0x872   : > { %v3196_v61 = vadd.f32 %v3195_v3, %v3194_v26  ;;  %v3197_v34 = vsel %vm866_vm2, %v3187_v14, 0.0 }
 0x874   : > { %v3198_v47 = vadd.f32 %v3197_v34, %v3196_v61 }
 0x875   : > { %v4313_v25 = vpop.eup %4312 }
 0x876   : > { %v3189_v31 = vmul.f32 %v4313_v25, %v3141_v30 }
 0x877   : > { %v4315_v13 = vpop.eup %4314 }
 0x878   : > { %v3188_v11 = vmul.f32 %v4315_v13, %v3140_v22  ;;  %v3201_v49 = vsel %vm866_vm2, %v3189_v31, 0.0 }
 0x87a   : > { %v3199_v24 = vsel %vm866_vm2, %v3188_v11, 0.0 }
 0x87b   : > { %v4317_v59 = vpop.eup %4316  ;;  %v3200_v63 = vadd.f32 %v3199_v24, %v3198_v47 }
 0x87c   : > { %v3191_v41 = vmul.f32 %v4317_v59, %v3143_v28  ;;  %v3299_v28 = vld [vmem:[%s5695_s25] sm:$0xff] }
 0x87d   : > { %v4319_v6 = vpop.eup %4318  ;;  %v3202_v52 = vadd.f32 %v3201_v49, %v3200_v63 }
 0x87e   : > { %v3190_v27 = vmul.f32 %v4319_v6, %v3142_v5  ;;  %4064 = vmatpush3.xpose.msk.msra.mxu0 %vm866_vm2, %v3191_v41  ;;  %v3205_v4 = vsel %vm866_vm2, %v3191_v41, 0.0 }
 0x87f   : > { %4065 = vmatprep.subr.mxu0 %v4389_v50 }
 0x880   : > { %v3203_v56 = vsel %vm866_vm2, %v3190_v27, 0.0 }
 0x881   : > { %v3204_v9 = vadd.f32 %v3203_v56, %v3202_v52 }
 0x882   : > { %4066 = vmatpush3.xpose.msk.msra.mxu0 %vm866_vm2, %v3190_v27 }
 0x883   : > { %v3206_v30 = vadd.f32 %v3205_v4, %v3204_v9  ;;  %4067 = vmatprep.subr.mxu0 %v4389_v50 }
 0x885   : > { %v3207_v35 = vrot.slane %v3206_v30, 4 }
 0x886   : > { %4068 = vmatpush3.xpose.msk.msra.mxu0 %vm866_vm2, %v3189_v31 }
 0x887   : > { %v3208_v55 = vadd.f32 %v3207_v35, %v3206_v30  ;;  %4069 = vmatprep.subr.mxu0 %v4389_v50 }
 0x889   : > { %v3209_v17 = vrot.slane %v3208_v55, 2 }
 0x88a   : > { %4070 = vmatpush3.xpose.msk.msra.mxu0 %vm866_vm2, %v3188_v11 }
 0x88b   : > { %v3210_v22 = vadd.f32 %v3209_v17, %v3208_v55  ;;  %4071 = vmatprep.subr.mxu0 %v4389_v50 }
 0x88d   : > { %v3211_v45 = vrot.slane %v3210_v22, 1 }
 0x88e   : > { %4072 = vmatpush3.xpose.msk.msra.mxu0 %vm866_vm2, %v3187_v14 }
 0x88f   : > { %v3212_v51 = vadd.f32 %v3211_v45, %v3210_v22  ;;  %4073 = vmatprep.subr.mxu0 %v4389_v50 }
 0x891   : > { %v3214_v37 = vmul.f32 0.015625, %v3212_v51 }
 0x892   : > { %4074 = vmatpush3.xpose.msk.msra.mxu0 %vm866_vm2, %v3186_v15 }
 0x893   : > { %4050 = vmatmul.mubr.msk.f32.vlgmr.msra.gmra.mxu1 %vm866_vm2, %v3214_v37  ;;  %4075 = vmatprep.subr.mxu0 %v4389_v50 }
 0x894   : > { %4060 = vmatprep.mubr.msk.f32.mxu1 %vm4390_vm7, %v4389_v50  ;;  %4053 = vmatpush3.msra.mxu1 %v3302_v48 }
 0x895   : > { %4054 = vmatprep.subr.mxu1 %v4389_v50 }
 0x896   : > { %4076 = vmatpush3.xpose.msk.msra.mxu0 %vm866_vm2, %v3185_v46  ;;  %4055 = vmatpush3.msra.mxu1 %v3301_v40 }
 0x897   : > { %4077 = vmatprep.subr.mxu0 %v4389_v50  ;;  %4056 = vmatprep.subr.mxu1 %v4389_v50 }
 0x898   : > { %4057 = vmatpush3.msra.mxu1 %v3300_v54 }
 0x899   : > { %4058 = vmatprep.subr.mxu1 %v4389_v50 }
 0x89a   : > { %4078 = vmatpush3.xpose.msk.msra.mxu0 %vm866_vm2, %v3184_v21  ;;  %4059 = vmatpush3.msra.mxu1 %v3299_v28 }
 0x89d   : > { %4080 = vmatmul.mubr.msk.f32.vlgmr.msra.gmra.mxu0 %vm866_vm2, %v3377_v58 }
 0x8d6   : > { %v3382_v7 = vpop.permute.xlu1 %3381 }
 0x8d7   : > { %v3387_v21 = vrot.slane %v3382_v7, %v5773_v19 }
 0x953   : > { %v3289_v42 = vpop.f32.mrf.mxu1 }
 0x954   : > { %v3290_v5 = vadd.f32 %v3289_v42, %v3219_v0 }
 0x955   : > { %v4051_v18 = vpop.f32.mrf.mxu1 }
 0x956   : > { %v3293_v29 = vsub.f32 0.0, %v3290_v5 }
 0x958   : > { %v3294_v38 = vmul.f32 1.442695, %v3293_v29 }
 0x95a   : > { %4320 = vpow2.f32 %v3294_v38 }
 0x95d   : > { %v3481_v50 = vpop.f32.mrf.mxu0 }
 0x95e   : > { %v3482_v46 = vadd.f32 %v3481_v50, %v3387_v21 }
 0x95f   : > { %v4081_v39 = vpop.f32.mrf.mxu0 }
 0x960   : > { %v3487_v8 = vsel %vm3486_vm8, %v3482_v46, -inf }
 0x967   : > { %v4321_v36 = vpop.eup %4320 }
 0x968   : > { %v3296_v33 = vadd.f32 1.0, %v4321_v36 }
 0x96a   : > { %4322 = vrcp.f32 %v3296_v33 }
 0x977   : > { %v4323_v2 = vpop.eup %4322 }
 0x978   : > { %v3298_v20 = vmul.f32 %v4323_v2, %v3290_v5 }
 0x97a   : > { %4061 = vmatmul.mubr.msk.f32.vlgmr.msra.gmra.mxu1 %vm866_vm2, %v3298_v20 }
 0xa3a   : > { %v3373_v44 = vpop.f32.mrf.mxu1 }
 0xa3b   : > { %v3374_v10 = vadd.f32 %v3373_v44, %v3303_v16 }
 0xa3c   : > { %v4062_v1 = vpop.f32.mrf.mxu1 }
 0xa3d   : > { %3489 = vrot.lane.b32.xlu0 %v3374_v10, %s4391_s7 }
 0xaaf   : > { %v3490_v60 = vpop.permute.xlu0 %3489 }
 0xab0   : > { %v3492_v32 = vsel %vm1580_vm6, %v3487_v8, %v3490_v60 }
 0xab1   : > { %3494 = vst.msk [vmem:[%s836_s3] sm:$0x1] %vm3493_vm9, %v3492_v32 }
 0xab2   : > { %4338 = shalt.err (!%p4335_p3)
}
 0xab3   : > { %s4339_s12 = scalar_lea.hbm %s5634_s14, 16  ;;  %s4343_s8 = scalar_lea.hbm %s5782_s13, 32 }
 0xab4   : > { %p4340_p4 = scmp.ne.s32.totalorder %s5634_s14, %s4339_s12  ;;  %p4344_p9 = scmp.lt.s32.totalorder %s5634_s14, %s5782_s13 }
 0xab5   : > { %p4345_p10 = scmp.lt.s32.totalorder %s4343_s8, %s4339_s12 }
 0xab6   : > { %p4341_p7 = pnand %p4340_p4, %p4574_p5 }
 0xab7   : > { %p4346_p11 = por %p4345_p10, %p4344_p9 }
 0xab8   : > { %p4342_p8 = pneg %p4341_p7 }
 0xaba   : > { %p4347_p12 = pnand %p4346_p11, %p4342_p8 }
 0xabc   : > { %4350 = shalt.err (!%p4347_p12)
}
 0xabd   : > { %4082 = dma.vmem_to_hbm [thread:$0]  (%p4574_p5), %s3509_s2, 16, %s5634_s14, %s3496_s4  }
 0xabe PF: > { %s5783_s9 = sld [smem:[#allocation6_spill]]  ;;  %p4088_p13 = scmp.ge.s32.totalorder %s4385_s5, 2 }
 0xac0   : > { %p4085_p0 = pnand %p4088_p13, %p4578_p6 }
 0xac2   : > { %p4086_p1 = pneg %p4085_p0 }
 0xac4   : > { %s3520_s0 = sand.u32 1, %s5783_s9  }
 0xac5   : > { %s3521_s11 = scalar_lea.sflag [#allocation4], %s3520_s0 }
 0xac6   : > { %4368 = dma.done.wait (%p4086_p1), %s3521_s11, 16  }
 0xac7   : > { %4370 = vsyncadd (%p4086_p1), %s3521_s11, 4294967280  ;;  %s5785_s5 = sld [smem:[#allocation8_spill]]  ;;  %s5788_s8 = smov %s4377_s30 }
 0xac8   : > { %s5786_s12 = sld [smem:[#allocation7_spill]] }
 0xac9   : > { %s5787_s9 = sld [smem:[#allocation9_spill]] }
 0xacd   : > { %p39_p2 = scmp.ge.s32.totalorder %s5785_s5, 4  }
 0xace   : > { %s5789_s30 = smov %s5786_s12 }
 0xacf   :  { %41 = sbr.rel (!%p39_p2) target bundleno = 20 (0x14), region = 178 }
 0xad4   :  { %3525 = vsyncpa [#allocation4], 1 }
 0xad5   :  { %3527 = vsyncpa [#allocation4 + $0x1], 1 }

</bundles_post_ra>
